<compile_context>
chip_gen: v5e
topology: v5e:2x2
jax: 0.10.0
libtpu: 0.0.40
codegen_flags: <defaults>
</compile_context>

<pallas_src>
import functools
import math

import jax
import jax.numpy as jnp
from jax.experimental import pallas as pl
from jax.experimental.pallas import tpu as pltpu


# ----------------------------- model config ---------------------------------
K = 8            # input feature dim k
LAYER_SIZE = 32  # hidden width (PyTorch default 128, scaled down for the test)
LAYER_COUNT = 8  # total "layer_count" as in the PyTorch module
BATCH = 16
NUM_HIDDEN = LAYER_COUNT - 2   # number of Linear(L, L) blocks
BN_EPS = 1e-5


def _gelu_exact(x):
    # PyTorch nn.GELU() default = exact erf formulation (kept exact on purpose;
    # the tanh approximation would break 1e-5 agreement with PyTorch).
    return 0.5 * x * (1.0 + jax.lax.erf(x * (1.0 / math.sqrt(2.0))))


# ------------------------------- kernel -------------------------------------
def lunot_kernel(x_ref, w_ref, vec_ref, o_ref, *, num_hidden):
    """Transposed layout: activations are (L, N) -- features x batch.

    x_ref   : (L, N)               input, rows K..L-1 are zero padding
    w_ref   : (num_hidden+1, L, L) weights in (out, in) layout; slab 0 is the
                                   input projection zero-padded on the in-dim
    vec_ref : (num_hidden+3, L, 1) slabs 0..num_hidden = biases (columns),
                                   slab num_hidden+1 = w_out as a column,
                                   slab num_hidden+2 = b_out broadcast
    o_ref   : (1, N)               lane-dense sigmoid output
    """
    n = x_ref.shape[1]
    inv_n = 1.0 / float(n)

    # Input projection: (L, L) @ (L, N) + (L, 1).  Dropout(p=0.0) is identity;
    # the zero-padded weight columns make the padded x rows inert.
    h = jnp.dot(w_ref[0], x_ref[...],
                preferred_element_type=jnp.float32) + vec_ref[0]
    h = _gelu_exact(h)

    # Hidden blocks: Linear -> (Dropout) -> GELU, BatchNorm1d after even blocks.
    # Loop intentionally Python-unrolled: 6 static iterations, static slab
    # indices into w_ref / vec_ref -> the LLO scheduler sees the full chain.
    for i in range(num_hidden):
        h = jnp.dot(w_ref[i + 1], h,
                    preferred_element_type=jnp.float32) + vec_ref[i + 1]
        h = _gelu_exact(h)
        if i % 2 == 0:
            # BatchNorm1d(affine=False), train-mode batch statistics (biased
            # variance), eps = 1e-5.  Shifted single-pass moments: the two XLU
            # reductions are independent (no mean -> subtract -> reduce serial
            # chain) and the shift keeps the E[d^2] - E[d]^2 cancellation
            # benign in fp32 (verified <1e-6 vs the two-pass reference).
            shift = h[:, 0:1]                                   # (L, 1)
            d = h - shift
            m1 = jnp.sum(d, axis=1, keepdims=True) * inv_n      # E[d]
            m2 = jnp.sum(d * d, axis=1, keepdims=True) * inv_n  # E[d^2]
            mean = shift + m1
            var = m2 - m1 * m1
            h = (h - mean) * jax.lax.rsqrt(var + BN_EPS)

    # Output head: VPU multiply + sublane (XLU) reduction instead of an N=1
    # MXU matmul; result is already lane-dense (1, N).
    w_col = vec_ref[num_hidden + 1]                  # (L, 1)
    b_out = vec_ref[num_hidden + 2][0:1, :]          # (1, 1)
    logits = jnp.sum(h * w_col, axis=0, keepdims=True) + b_out   # (1, N)
    o_ref[...] = jax.nn.sigmoid(logits)


# ------------------------------- wrapper -------------------------------------
def lunot_forward(x, w_stack, vec_stack):
    """x: (N, K) float32 -> (N,) sigmoid outputs (matches torch.squeeze(out, 1))."""
    n = x.shape[0]
    # Layout plumbing (outside the kernel): transpose to (K, N) and zero-pad the
    # feature dim to LAYER_SIZE so the packed (L, L) input-projection slab applies.
    x_t = jnp.zeros((LAYER_SIZE, n), dtype=jnp.float32).at[:K, :].set(
        x.astype(jnp.float32).T)

    kernel = functools.partial(lunot_kernel, num_hidden=NUM_HIDDEN)
    out = pl.pallas_call(
        kernel,
        out_shape=jax.ShapeDtypeStruct((1, n), jnp.float32),
        in_specs=[pl.BlockSpec(memory_space=pltpu.MemorySpace.VMEM)] * 3,
        out_specs=pl.BlockSpec(memory_space=pltpu.MemorySpace.VMEM),
    )(x_t, w_stack, vec_stack)
    return out[0]                      # (N,)


# --------------------------- parameter init ----------------------------------
def init_params(key):
    """PyTorch-default init: uniform(-1/sqrt(fan_in), 1/sqrt(fan_in)), weights
    kept in PyTorch (out, in) layout, then packed into two stacked arrays."""
    keys = jax.random.split(key, 2 * (NUM_HIDDEN + 2))
    ki = iter(keys)

    def linear(fan_in, fan_out):
        bound = 1.0 / math.sqrt(fan_in)
        w = jax.random.uniform(next(ki), (fan_out, fan_in),
                               minval=-bound, maxval=bound, dtype=jnp.float32)
        b = jax.random.uniform(next(ki), (fan_out,),
                               minval=-bound, maxval=bound, dtype=jnp.float32)
        return w, b

    w_in, b_in = linear(K, LAYER_SIZE)                       # (L, K), (L,)
    hidden = [linear(LAYER_SIZE, LAYER_SIZE) for _ in range(NUM_HIDDEN)]
    w_out, b_out = linear(LAYER_SIZE, 1)                     # (1, L), (1,)

    # Weight stack: slab 0 = input projection zero-padded on the in-dim.
    w0 = jnp.zeros((LAYER_SIZE, LAYER_SIZE), jnp.float32).at[:, :K].set(w_in)
    w_stack = jnp.stack([w0] + [w for (w, _) in hidden], axis=0)

    # Column-vector stack: biases, output weight column, b_out (broadcast).
    cols = [b_in.reshape(LAYER_SIZE, 1)]
    cols += [b.reshape(LAYER_SIZE, 1) for (_, b) in hidden]
    cols += [w_out.reshape(LAYER_SIZE, 1)]                   # w_out^T
    cols += [jnp.full((LAYER_SIZE, 1), b_out[0], dtype=jnp.float32)]
    vec_stack = jnp.stack(cols, axis=0)                      # (NUM_HIDDEN+3, L, 1)

    return w_stack, vec_stack


# ---------------------------- pure-JAX reference ------------------------------
def lunot_reference(x, w_stack, vec_stack):
    h = x @ w_stack[0, :, :K].T + vec_stack[0, :, 0]
    h = _gelu_exact(h)
    for i in range(NUM_HIDDEN):
        h = _gelu_exact(h @ w_stack[i + 1].T + vec_stack[i + 1, :, 0])
        if i % 2 == 0:
            mean = jnp.mean(h, axis=0, keepdims=True)
            var = jnp.mean((h - mean) ** 2, axis=0, keepdims=True)
            h = (h - mean) * jax.lax.rsqrt(var + BN_EPS)
    logits = h @ vec_stack[NUM_HIDDEN + 1, :, 0] + vec_stack[NUM_HIDDEN + 2, 0, 0]
    return jax.nn.sigmoid(logits)


if __name__ == "__main__":
    root = jax.random.PRNGKey(0)
    k_x, k_p = jax.random.split(root)
    x = jax.random.normal(k_x, (BATCH, K), dtype=jnp.float32)
    w_stack, vec_stack = init_params(k_p)

    out = jax.block_until_ready(lunot_forward(x, w_stack, vec_stack))

    ref = lunot_reference(x, w_stack, vec_stack)
    assert out.shape == (BATCH,)
    assert jnp.allclose(out, ref, atol=1e-5, rtol=1e-5), (out, ref)

    print("KERNEL_OK")
</pallas_src>

<mosaic_0001>
module attributes {stable_mosaic.version = 11 : i64} {
  func.func @lunot_kernel(%arg0: memref<32x16xf32, #tpu.memory_space<vmem>>, %arg1: memref<7x32x32xf32, #tpu.memory_space<vmem>>, %arg2: memref<9x32x1xf32, #tpu.memory_space<vmem>>, %arg3: memref<1x16xf32, #tpu.memory_space<vmem>>) attributes {dimension_semantics = [], scalar_prefetch = 0 : i64, scratch_operands = 0 : i64, tpu.core_type = #tpu.core_type<tc>} {
    %c0 = arith.constant 0 : index
    %c0_0 = arith.constant 0 : index
    %c0_1 = arith.constant 0 : index
    %0 = vector.load %arg1[%c0, %c0_0, %c0_1] : memref<7x32x32xf32, #tpu.memory_space<vmem>>, vector<1x32x32xf32>
    %1 = vector.shape_cast %0 : vector<1x32x32xf32> to vector<32x32xf32>
    %c0_2 = arith.constant 0 : index
    %c0_3 = arith.constant 0 : index
    %2 = vector.load %arg0[%c0_2, %c0_3] : memref<32x16xf32, #tpu.memory_space<vmem>>, vector<32x16xf32>
    %cst = arith.constant dense<0.000000e+00> : vector<32x16xf32>
    %3 = tpu.matmul %1, %2, %cst {dimension_numbers = #tpu.dot_dimension_numbers<[1], [0], [0], [1], [0, 0, 1, 1], [], []>} : vector<32x32xf32>, vector<32x16xf32>, vector<32x16xf32> -> vector<32x16xf32>
    %c0_4 = arith.constant 0 : index
    %c0_5 = arith.constant 0 : index
    %c0_6 = arith.constant 0 : index
    %4 = vector.load %arg2[%c0_4, %c0_5, %c0_6] : memref<9x32x1xf32, #tpu.memory_space<vmem>>, vector<1x32x1xf32>
    %5 = vector.shape_cast %4 : vector<1x32x1xf32> to vector<32x1xf32>
    %6 = vector.broadcast %5 : vector<32x1xf32> to vector<32x16xf32>
    %7 = arith.addf %3, %6 : vector<32x16xf32>
    %cst_7 = arith.constant 5.000000e-01 : f32
    %8 = vector.broadcast %cst_7 : f32 to vector<32x16xf32>
    %9 = arith.mulf %8, %7 : vector<32x16xf32>
    %cst_8 = arith.constant 0.707106769 : f32
    %10 = vector.broadcast %cst_8 : f32 to vector<32x16xf32>
    %11 = arith.mulf %7, %10 : vector<32x16xf32>
    %12 = math.erf %11 : vector<32x16xf32>
    %cst_9 = arith.constant 1.000000e+00 : f32
    %13 = vector.broadcast %cst_9 : f32 to vector<32x16xf32>
    %14 = arith.addf %13, %12 : vector<32x16xf32>
    %15 = arith.mulf %9, %14 : vector<32x16xf32>
    %c1 = arith.constant 1 : index
    %c0_10 = arith.constant 0 : index
    %c0_11 = arith.constant 0 : index
    %16 = vector.load %arg1[%c1, %c0_10, %c0_11] : memref<7x32x32xf32, #tpu.memory_space<vmem>>, vector<1x32x32xf32>
    %17 = vector.shape_cast %16 : vector<1x32x32xf32> to vector<32x32xf32>
    %cst_12 = arith.constant dense<0.000000e+00> : vector<32x16xf32>
    %18 = tpu.matmul %17, %15, %cst_12 {dimension_numbers = #tpu.dot_dimension_numbers<[1], [0], [0], [1], [0, 0, 1, 1], [], []>} : vector<32x32xf32>, vector<32x16xf32>, vector<32x16xf32> -> vector<32x16xf32>
    %c1_13 = arith.constant 1 : index
    %c0_14 = arith.constant 0 : index
    %c0_15 = arith.constant 0 : index
    %19 = vector.load %arg2[%c1_13, %c0_14, %c0_15] : memref<9x32x1xf32, #tpu.memory_space<vmem>>, vector<1x32x1xf32>
    %20 = vector.shape_cast %19 : vector<1x32x1xf32> to vector<32x1xf32>
    %21 = vector.broadcast %20 : vector<32x1xf32> to vector<32x16xf32>
    %22 = arith.addf %18, %21 : vector<32x16xf32>
    %cst_16 = arith.constant 5.000000e-01 : f32
    %23 = vector.broadcast %cst_16 : f32 to vector<32x16xf32>
    %24 = arith.mulf %23, %22 : vector<32x16xf32>
    %cst_17 = arith.constant 0.707106769 : f32
    %25 = vector.broadcast %cst_17 : f32 to vector<32x16xf32>
    %26 = arith.mulf %22, %25 : vector<32x16xf32>
    %27 = math.erf %26 : vector<32x16xf32>
    %cst_18 = arith.constant 1.000000e+00 : f32
    %28 = vector.broadcast %cst_18 : f32 to vector<32x16xf32>
    %29 = arith.addf %28, %27 : vector<32x16xf32>
    %30 = arith.mulf %24, %29 : vector<32x16xf32>
    %31 = vector.extract_strided_slice %30 {offsets = [0, 0], sizes = [32, 1], strides = [1, 1]} : vector<32x16xf32> to vector<32x1xf32>
    %32 = vector.broadcast %31 : vector<32x1xf32> to vector<32x16xf32>
    %33 = arith.subf %30, %32 : vector<32x16xf32>
    %cst_19 = arith.constant dense<0.000000e+00> : vector<32xf32>
    %34 = vector.multi_reduction <add>, %33, %cst_19 [1] : vector<32x16xf32> to vector<32xf32>
    %35 = vector.shape_cast %34 : vector<32xf32> to vector<32x1xf32>
    %cst_20 = arith.constant 6.250000e-02 : f32
    %36 = vector.broadcast %cst_20 : f32 to vector<32x1xf32>
    %37 = arith.mulf %35, %36 : vector<32x1xf32>
    %38 = arith.mulf %33, %33 : vector<32x16xf32>
    %cst_21 = arith.constant dense<0.000000e+00> : vector<32xf32>
    %39 = vector.multi_reduction <add>, %38, %cst_21 [1] : vector<32x16xf32> to vector<32xf32>
    %40 = vector.shape_cast %39 : vector<32xf32> to vector<32x1xf32>
    %cst_22 = arith.constant 6.250000e-02 : f32
    %41 = vector.broadcast %cst_22 : f32 to vector<32x1xf32>
    %42 = arith.mulf %40, %41 : vector<32x1xf32>
    %43 = arith.addf %31, %37 : vector<32x1xf32>
    %44 = arith.mulf %37, %37 : vector<32x1xf32>
    %45 = arith.subf %42, %44 : vector<32x1xf32>
    %46 = vector.broadcast %43 : vector<32x1xf32> to vector<32x16xf32>
    %47 = arith.subf %30, %46 : vector<32x16xf32>
    %cst_23 = arith.constant 9.99999974E-6 : f32
    %48 = vector.broadcast %cst_23 : f32 to vector<32x1xf32>
    %49 = arith.addf %45, %48 : vector<32x1xf32>
    %50 = math.rsqrt %49 : vector<32x1xf32>
    %51 = vector.broadcast %50 : vector<32x1xf32> to vector<32x16xf32>
    %52 = arith.mulf %47, %51 : vector<32x16xf32>
    %c2 = arith.constant 2 : index
    %c0_24 = arith.constant 0 : index
    %c0_25 = arith.constant 0 : index
    %53 = vector.load %arg1[%c2, %c0_24, %c0_25] : memref<7x32x32xf32, #tpu.memory_space<vmem>>, vector<1x32x32xf32>
    %54 = vector.shape_cast %53 : vector<1x32x32xf32> to vector<32x32xf32>
    %cst_26 = arith.constant dense<0.000000e+00> : vector<32x16xf32>
    %55 = tpu.matmul %54, %52, %cst_26 {dimension_numbers = #tpu.dot_dimension_numbers<[1], [0], [0], [1], [0, 0, 1, 1], [], []>} : vector<32x32xf32>, vector<32x16xf32>, vector<32x16xf32> -> vector<32x16xf32>
    %c2_27 = arith.constant 2 : index
    %c0_28 = arith.constant 0 : index
    %c0_29 = arith.constant 0 : index
    %56 = vector.load %arg2[%c2_27, %c0_28, %c0_29] : memref<9x32x1xf32, #tpu.memory_space<vmem>>, vector<1x32x1xf32>
    %57 = vector.shape_cast %56 : vector<1x32x1xf32> to vector<32x1xf32>
    %58 = vector.broadcast %57 : vector<32x1xf32> to vector<32x16xf32>
    %59 = arith.addf %55, %58 : vector<32x16xf32>
    %cst_30 = arith.constant 5.000000e-01 : f32
    %60 = vector.broadcast %cst_30 : f32 to vector<32x16xf32>
    %61 = arith.mulf %60, %59 : vector<32x16xf32>
    %cst_31 = arith.constant 0.707106769 : f32
    %62 = vector.broadcast %cst_31 : f32 to vector<32x16xf32>
    %63 = arith.mulf %59, %62 : vector<32x16xf32>
    %64 = math.erf %63 : vector<32x16xf32>
    %cst_32 = arith.constant 1.000000e+00 : f32
    %65 = vector.broadcast %cst_32 : f32 to vector<32x16xf32>
    %66 = arith.addf %65, %64 : vector<32x16xf32>
    %67 = arith.mulf %61, %66 : vector<32x16xf32>
    %c3 = arith.constant 3 : index
    %c0_33 = arith.constant 0 : index
    %c0_34 = arith.constant 0 : index
    %68 = vector.load %arg1[%c3, %c0_33, %c0_34] : memref<7x32x32xf32, #tpu.memory_space<vmem>>, vector<1x32x32xf32>
    %69 = vector.shape_cast %68 : vector<1x32x32xf32> to vector<32x32xf32>
    %cst_35 = arith.constant dense<0.000000e+00> : vector<32x16xf32>
    %70 = tpu.matmul %69, %67, %cst_35 {dimension_numbers = #tpu.dot_dimension_numbers<[1], [0], [0], [1], [0, 0, 1, 1], [], []>} : vector<32x32xf32>, vector<32x16xf32>, vector<32x16xf32> -> vector<32x16xf32>
    %c3_36 = arith.constant 3 : index
    %c0_37 = arith.constant 0 : index
    %c0_38 = arith.constant 0 : index
    %71 = vector.load %arg2[%c3_36, %c0_37, %c0_38] : memref<9x32x1xf32, #tpu.memory_space<vmem>>, vector<1x32x1xf32>
    %72 = vector.shape_cast %71 : vector<1x32x1xf32> to vector<32x1xf32>
    %73 = vector.broadcast %72 : vector<32x1xf32> to vector<32x16xf32>
    %74 = arith.addf %70, %73 : vector<32x16xf32>
    %cst_39 = arith.constant 5.000000e-01 : f32
    %75 = vector.broadcast %cst_39 : f32 to vector<32x16xf32>
    %76 = arith.mulf %75, %74 : vector<32x16xf32>
    %cst_40 = arith.constant 0.707106769 : f32
    %77 = vector.broadcast %cst_40 : f32 to vector<32x16xf32>
    %78 = arith.mulf %74, %77 : vector<32x16xf32>
    %79 = math.erf %78 : vector<32x16xf32>
    %cst_41 = arith.constant 1.000000e+00 : f32
    %80 = vector.broadcast %cst_41 : f32 to vector<32x16xf32>
    %81 = arith.addf %80, %79 : vector<32x16xf32>
    %82 = arith.mulf %76, %81 : vector<32x16xf32>
    %83 = vector.extract_strided_slice %82 {offsets = [0, 0], sizes = [32, 1], strides = [1, 1]} : vector<32x16xf32> to vector<32x1xf32>
    %84 = vector.broadcast %83 : vector<32x1xf32> to vector<32x16xf32>
    %85 = arith.subf %82, %84 : vector<32x16xf32>
    %cst_42 = arith.constant dense<0.000000e+00> : vector<32xf32>
    %86 = vector.multi_reduction <add>, %85, %cst_42 [1] : vector<32x16xf32> to vector<32xf32>
    %87 = vector.shape_cast %86 : vector<32xf32> to vector<32x1xf32>
    %cst_43 = arith.constant 6.250000e-02 : f32
    %88 = vector.broadcast %cst_43 : f32 to vector<32x1xf32>
    %89 = arith.mulf %87, %88 : vector<32x1xf32>
    %90 = arith.mulf %85, %85 : vector<32x16xf32>
    %cst_44 = arith.constant dense<0.000000e+00> : vector<32xf32>
    %91 = vector.multi_reduction <add>, %90, %cst_44 [1] : vector<32x16xf32> to vector<32xf32>
    %92 = vector.shape_cast %91 : vector<32xf32> to vector<32x1xf32>
    %cst_45 = arith.constant 6.250000e-02 : f32
    %93 = vector.broadcast %cst_45 : f32 to vector<32x1xf32>
    %94 = arith.mulf %92, %93 : vector<32x1xf32>
    %95 = arith.addf %83, %89 : vector<32x1xf32>
    %96 = arith.mulf %89, %89 : vector<32x1xf32>
    %97 = arith.subf %94, %96 : vector<32x1xf32>
    %98 = vector.broadcast %95 : vector<32x1xf32> to vector<32x16xf32>
    %99 = arith.subf %82, %98 : vector<32x16xf32>
    %cst_46 = arith.constant 9.99999974E-6 : f32
    %100 = vector.broadcast %cst_46 : f32 to vector<32x1xf32>
    %101 = arith.addf %97, %100 : vector<32x1xf32>
    %102 = math.rsqrt %101 : vector<32x1xf32>
    %103 = vector.broadcast %102 : vector<32x1xf32> to vector<32x16xf32>
    %104 = arith.mulf %99, %103 : vector<32x16xf32>
    %c4 = arith.constant 4 : index
    %c0_47 = arith.constant 0 : index
    %c0_48 = arith.constant 0 : index
    %105 = vector.load %arg1[%c4, %c0_47, %c0_48] : memref<7x32x32xf32, #tpu.memory_space<vmem>>, vector<1x32x32xf32>
    %106 = vector.shape_cast %105 : vector<1x32x32xf32> to vector<32x32xf32>
    %cst_49 = arith.constant dense<0.000000e+00> : vector<32x16xf32>
    %107 = tpu.matmul %106, %104, %cst_49 {dimension_numbers = #tpu.dot_dimension_numbers<[1], [0], [0], [1], [0, 0, 1, 1], [], []>} : vector<32x32xf32>, vector<32x16xf32>, vector<32x16xf32> -> vector<32x16xf32>
    %c4_50 = arith.constant 4 : index
    %c0_51 = arith.constant 0 : index
    %c0_52 = arith.constant 0 : index
    %108 = vector.load %arg2[%c4_50, %c0_51, %c0_52] : memref<9x32x1xf32, #tpu.memory_space<vmem>>, vector<1x32x1xf32>
    %109 = vector.shape_cast %108 : vector<1x32x1xf32> to vector<32x1xf32>
    %110 = vector.broadcast %109 : vector<32x1xf32> to vector<32x16xf32>
    %111 = arith.addf %107, %110 : vector<32x16xf32>
    %cst_53 = arith.constant 5.000000e-01 : f32
    %112 = vector.broadcast %cst_53 : f32 to vector<32x16xf32>
    %113 = arith.mulf %112, %111 : vector<32x16xf32>
    %cst_54 = arith.constant 0.707106769 : f32
    %114 = vector.broadcast %cst_54 : f32 to vector<32x16xf32>
    %115 = arith.mulf %111, %114 : vector<32x16xf32>
    %116 = math.erf %115 : vector<32x16xf32>
    %cst_55 = arith.constant 1.000000e+00 : f32
    %117 = vector.broadcast %cst_55 : f32 to vector<32x16xf32>
    %118 = arith.addf %117, %116 : vector<32x16xf32>
    %119 = arith.mulf %113, %118 : vector<32x16xf32>
    %c5 = arith.constant 5 : index
    %c0_56 = arith.constant 0 : index
    %c0_57 = arith.constant 0 : index
    %120 = vector.load %arg1[%c5, %c0_56, %c0_57] : memref<7x32x32xf32, #tpu.memory_space<vmem>>, vector<1x32x32xf32>
    %121 = vector.shape_cast %120 : vector<1x32x32xf32> to vector<32x32xf32>
    %cst_58 = arith.constant dense<0.000000e+00> : vector<32x16xf32>
    %122 = tpu.matmul %121, %119, %cst_58 {dimension_numbers = #tpu.dot_dimension_numbers<[1], [0], [0], [1], [0, 0, 1, 1], [], []>} : vector<32x32xf32>, vector<32x16xf32>, vector<32x16xf32> -> vector<32x16xf32>
    %c5_59 = arith.constant 5 : index
    %c0_60 = arith.constant 0 : index
    %c0_61 = arith.constant 0 : index
    %123 = vector.load %arg2[%c5_59, %c0_60, %c0_61] : memref<9x32x1xf32, #tpu.memory_space<vmem>>, vector<1x32x1xf32>
    %124 = vector.shape_cast %123 : vector<1x32x1xf32> to vector<32x1xf32>
    %125 = vector.broadcast %124 : vector<32x1xf32> to vector<32x16xf32>
    %126 = arith.addf %122, %125 : vector<32x16xf32>
    %cst_62 = arith.constant 5.000000e-01 : f32
    %127 = vector.broadcast %cst_62 : f32 to vector<32x16xf32>
    %128 = arith.mulf %127, %126 : vector<32x16xf32>
    %cst_63 = arith.constant 0.707106769 : f32
    %129 = vector.broadcast %cst_63 : f32 to vector<32x16xf32>
    %130 = arith.mulf %126, %129 : vector<32x16xf32>
    %131 = math.erf %130 : vector<32x16xf32>
    %cst_64 = arith.constant 1.000000e+00 : f32
    %132 = vector.broadcast %cst_64 : f32 to vector<32x16xf32>
    %133 = arith.addf %132, %131 : vector<32x16xf32>
    %134 = arith.mulf %128, %133 : vector<32x16xf32>
    %135 = vector.extract_strided_slice %134 {offsets = [0, 0], sizes = [32, 1], strides = [1, 1]} : vector<32x16xf32> to vector<32x1xf32>
    %136 = vector.broadcast %135 : vector<32x1xf32> to vector<32x16xf32>
    %137 = arith.subf %134, %136 : vector<32x16xf32>
    %cst_65 = arith.constant dense<0.000000e+00> : vector<32xf32>
    %138 = vector.multi_reduction <add>, %137, %cst_65 [1] : vector<32x16xf32> to vector<32xf32>
    %139 = vector.shape_cast %138 : vector<32xf32> to vector<32x1xf32>
    %cst_66 = arith.constant 6.250000e-02 : f32
    %140 = vector.broadcast %cst_66 : f32 to vector<32x1xf32>
    %141 = arith.mulf %139, %140 : vector<32x1xf32>
    %142 = arith.mulf %137, %137 : vector<32x16xf32>
    %cst_67 = arith.constant dense<0.000000e+00> : vector<32xf32>
    %143 = vector.multi_reduction <add>, %142, %cst_67 [1] : vector<32x16xf32> to vector<32xf32>
    %144 = vector.shape_cast %143 : vector<32xf32> to vector<32x1xf32>
    %cst_68 = arith.constant 6.250000e-02 : f32
    %145 = vector.broadcast %cst_68 : f32 to vector<32x1xf32>
    %146 = arith.mulf %144, %145 : vector<32x1xf32>
    %147 = arith.addf %135, %141 : vector<32x1xf32>
    %148 = arith.mulf %141, %141 : vector<32x1xf32>
    %149 = arith.subf %146, %148 : vector<32x1xf32>
    %150 = vector.broadcast %147 : vector<32x1xf32> to vector<32x16xf32>
    %151 = arith.subf %134, %150 : vector<32x16xf32>
    %cst_69 = arith.constant 9.99999974E-6 : f32
    %152 = vector.broadcast %cst_69 : f32 to vector<32x1xf32>
    %153 = arith.addf %149, %152 : vector<32x1xf32>
    %154 = math.rsqrt %153 : vector<32x1xf32>
    %155 = vector.broadcast %154 : vector<32x1xf32> to vector<32x16xf32>
    %156 = arith.mulf %151, %155 : vector<32x16xf32>
    %c6 = arith.constant 6 : index
    %c0_70 = arith.constant 0 : index
    %c0_71 = arith.constant 0 : index
    %157 = vector.load %arg1[%c6, %c0_70, %c0_71] : memref<7x32x32xf32, #tpu.memory_space<vmem>>, vector<1x32x32xf32>
    %158 = vector.shape_cast %157 : vector<1x32x32xf32> to vector<32x32xf32>
    %cst_72 = arith.constant dense<0.000000e+00> : vector<32x16xf32>
    %159 = tpu.matmul %158, %156, %cst_72 {dimension_numbers = #tpu.dot_dimension_numbers<[1], [0], [0], [1], [0, 0, 1, 1], [], []>} : vector<32x32xf32>, vector<32x16xf32>, vector<32x16xf32> -> vector<32x16xf32>
    %c6_73 = arith.constant 6 : index
    %c0_74 = arith.constant 0 : index
    %c0_75 = arith.constant 0 : index
    %160 = vector.load %arg2[%c6_73, %c0_74, %c0_75] : memref<9x32x1xf32, #tpu.memory_space<vmem>>, vector<1x32x1xf32>
    %161 = vector.shape_cast %160 : vector<1x32x1xf32> to vector<32x1xf32>
    %162 = vector.broadcast %161 : vector<32x1xf32> to vector<32x16xf32>
    %163 = arith.addf %159, %162 : vector<32x16xf32>
    %cst_76 = arith.constant 5.000000e-01 : f32
    %164 = vector.broadcast %cst_76 : f32 to vector<32x16xf32>
    %165 = arith.mulf %164, %163 : vector<32x16xf32>
    %cst_77 = arith.constant 0.707106769 : f32
    %166 = vector.broadcast %cst_77 : f32 to vector<32x16xf32>
    %167 = arith.mulf %163, %166 : vector<32x16xf32>
    %168 = math.erf %167 : vector<32x16xf32>
    %cst_78 = arith.constant 1.000000e+00 : f32
    %169 = vector.broadcast %cst_78 : f32 to vector<32x16xf32>
    %170 = arith.addf %169, %168 : vector<32x16xf32>
    %171 = arith.mulf %165, %170 : vector<32x16xf32>
    %c7 = arith.constant 7 : index
    %c0_79 = arith.constant 0 : index
    %c0_80 = arith.constant 0 : index
    %172 = vector.load %arg2[%c7, %c0_79, %c0_80] : memref<9x32x1xf32, #tpu.memory_space<vmem>>, vector<1x32x1xf32>
    %173 = vector.shape_cast %172 : vector<1x32x1xf32> to vector<32x1xf32>
    %c8 = arith.constant 8 : index
    %c0_81 = arith.constant 0 : index
    %c0_82 = arith.constant 0 : index
    %174 = vector.load %arg2[%c8, %c0_81, %c0_82] : memref<9x32x1xf32, #tpu.memory_space<vmem>>, vector<1x32x1xf32>
    %175 = vector.shape_cast %174 : vector<1x32x1xf32> to vector<32x1xf32>
    %176 = vector.extract_strided_slice %175 {offsets = [0, 0], sizes = [1, 1], strides = [1, 1]} : vector<32x1xf32> to vector<1x1xf32>
    %177 = vector.broadcast %173 : vector<32x1xf32> to vector<32x16xf32>
    %178 = arith.mulf %171, %177 : vector<32x16xf32>
    %cst_83 = arith.constant dense<0.000000e+00> : vector<16xf32>
    %179 = vector.multi_reduction <add>, %178, %cst_83 [0] : vector<32x16xf32> to vector<16xf32>
    %180 = vector.shape_cast %179 : vector<16xf32> to vector<1x16xf32>
    %181 = vector.broadcast %176 : vector<1x1xf32> to vector<1x16xf32>
    %182 = arith.addf %180, %181 : vector<1x16xf32>
    %183 = arith.negf %182 : vector<1x16xf32>
    %184 = math.exp %183 : vector<1x16xf32>
    %cst_84 = arith.constant 1.000000e+00 : f32
    %185 = vector.broadcast %cst_84 : f32 to vector<1x16xf32>
    %186 = arith.addf %185, %184 : vector<1x16xf32>
    %187 = arith.divf %185, %186 : vector<1x16xf32>
    %c0_85 = arith.constant 0 : index
    %c0_86 = arith.constant 0 : index
    %188 = vector.load %arg3[%c0_85, %c0_86] : memref<1x16xf32, #tpu.memory_space<vmem>>, vector<1x16xf32>
    tpu.vector_store %arg3[%c0_85, %c0_86], %187 {strides = array<i32>} : memref<1x16xf32, #tpu.memory_space<vmem>>, vector<1x16xf32>,
    return
  }
}

</mosaic_0001>

<bundles_post_ra>
// kernel: tpu_custom_call.1
= control target key start
LH: loop header
LB: loop body
LE: loop exit
PB: predicated region body
PF: predicated region fallthrough
CT: control target
= control target key end

     0   :  { %v2504_v3 = vmov 0   ;;  %s3667_s0 = inlined_call_operand.vmem [shape: f32[32,16], index: 0, kind: input, shape index: {}]   ;;  %s3668_s1 = inlined_call_operand.vmem [shape: f32[7,32,32], index: 1, kind: input, shape index: {}]   ;;  %s3669_s2 = inlined_call_operand.vmem [shape: f32[9,32,1], index: 2, kind: input, shape index: {}]   ;;  %s3670_s3 = inlined_call_operand.hbm [shape: f32[1,16], index: 3, kind: output, shape index: {}]  }
   0x1   :  { %v22_v0 = vld [vmem:[%s3667_s0 + $0x18] sm:$0xff]  ;;  %v21_v1 = vld [vmem:[%s3667_s0 + $0x10] sm:$0xff]  ;;  %v20_v2 = vld [vmem:[%s3667_s0 + $0x8] sm:$0xff]  ;;  %2392 = vset.pattern.permute.xlu1 %v2504_v3  ;;  %2391 = vset.pattern.permute.xlu0 %v2504_v3 }
   0x2   :  { %72 = vmatpush.msra.mxu0 %v22_v0  ;;  %2377 = vmatpush.msra.mxu3 %v22_v0  ;;  %v24_v4 = vld [vmem:[%s3669_s2 + $0x8] sm:$0xff]  ;;  %v26_v5 = vld [vmem:[%s3669_s2 + $0x18] sm:$0xff]  ;;  %v19_v6 = vld [vmem:[%s3667_s0] sm:$0xff] }
   0x3   :  { %34 = vperm.xlu1 %2392, %v24_v4   ;;  %44 = vperm.xlu0 %2391, %v26_v5  }
   0x4   :  { %73 = vmatpush.msra.mxu0 %v21_v1  ;;  %2378 = vmatpush.msra.mxu3 %v21_v1 }
   0x5   :  { %8 = vsyncpa [#allocation3], 0  ;;  %v15_v7 = vld [vmem:[%s3668_s1] sm:$0xff]  ;;  %vm47_vm0 = vcmask 261120   ;;  %v16_v8 = vld [vmem:[%s3668_s1 + $0x8] sm:$0xff]  ;;  %2393 = vset.pattern.permute.xlu2 %v2504_v3  ;;  %s2258_s4 = sshll.u32 %s3670_s3, 4  ;;  %s2259_s4 = int_to_ptr.hbm [resolvable:$true] %s2258_s4 }
   0x6   :  { %74 = vmatpush.msra.mxu0 %v20_v2  ;;  %2379 = vmatpush.msra.mxu3 %v20_v2  ;;  %v23_v9 = vld [vmem:[%s3669_s2] sm:$0xff]  ;;  %v25_v10 = vld [vmem:[%s3669_s2 + $0x10] sm:$0xff]  ;;  %v2280_v12 = vld [vmem:[%s3669_s2 + $0x28] sm:$0xff] }
   0x7   :  { %v17_v11 = vld [vmem:[%s3668_s1 + $0x10] sm:$0xff]  ;;  %v2279_v13 = vld [vmem:[%s3669_s2 + $0x20] sm:$0xff]  ;;  %v18_v14 = vld [vmem:[%s3668_s1 + $0x18] sm:$0xff] }
   0x8   :  { %75 = vmatpush.msra.mxu0 %v19_v6  ;;  %2380 = vmatpush.msra.mxu3 %v19_v6 }
   0x9   :  { %2267 = vmatmul.msk.f32.vlgmr.msra.gmra.mxu0 %vm47_vm0, %v15_v7  ;;  %2268 = vmatmul.msk.f32.vlgmr.msra.gmra.mxu3 %vm47_vm0, %v16_v8 }
   0xb   :  { %29 = vperm.xlu1 %2392, %v23_v9   ;;  %39 = vperm.xlu0 %2391, %v25_v10  }
  0x11   :  { %2269 = vmatmul.msk.f32.gmra.mxu3 %vm47_vm0, %v17_v11 }
  0x13   :  { %282 = vperm.xlu0 %2391, %v2280_v12   ;;  %277 = vperm.xlu1 %2392, %v2279_v13  }
  0x19   :  { %2270 = vmatmul.msk.f32.gmra.mxu3 %vm47_vm0, %v18_v14 }
  0x75   :  { %v35_v15 = vpop.permute.xlu1 %34  ;;  %v45_v20 = vpop.permute.xlu0 %44 }
  0x7d   :  { %v30_v16 = vpop.permute.xlu1 %29  ;;  %v40_v30 = vpop.permute.xlu0 %39 }
  0x86   :  { %v77_v17 = vpop.f32.mrf.mxu0 }
  0x87   :  { %v2572_v18 = vadd.f32 %v77_v17, %v30_v16 }
  0x89   :  { %v2575_v19 = vmul.f32 0.70710677, %v2572_v18 }
  0x8b   :  { %v97_v21 = vmul.f32 %v2575_v19, %v2575_v19 }
  0x8c   :  { %v80_v22 = vpop.f32.mrf.mxu3 }
  0x8d   :  { %v2579_v23 = vmin.f32 %v97_v21, 16.0  ;;  %v2581_v24 = vadd.f32 %v80_v22, %v35_v15 }
  0x8f   :  { %v2584_v25 = vmul.f32 0.70710677, %v2581_v24  ;;  %v110_v26 = vmul.f32 3.8918573e-05, %v2579_v23  ;;  %v99_v36 = vmul.f32 2.1237322e-06, %v2579_v23 }
  0x91   :  { %v137_v27 = vmul.f32 %v2584_v25, %v2584_v25  ;;  %v111_v28 = vadd.f32 0.001143296, %v110_v26  ;;  %v100_v43 = vadd.f32 0.00028619796, %v99_v36 }
  0x93   :  { %v2589_v29 = vmin.f32 %v137_v27, 16.0  ;;  %v112_v32 = vmul.f32 %v111_v28, %v2579_v23  ;;  %v101_v54 = vmul.f32 %v100_v43, %v2579_v23 }
  0x94   :  { %v83_v31 = vpop.f32.mrf.mxu3 }
  0x95   :  { %v2592_v33 = vadd.f32 %v83_v31, %v40_v30  ;;  %v150_v34 = vmul.f32 3.8918573e-05, %v2589_v29  ;;  %v113_v35 = vadd.f32 0.014752088, %v112_v32  ;;  %v139_v44 = vmul.f32 2.1237322e-06, %v2589_v29 }
  0x96   :  { %v102_v0 = vadd.f32 0.0036580483, %v101_v54 }
  0x97   :  { %v2597_v37 = vmul.f32 0.70710677, %v2592_v33  ;;  %v151_v38 = vadd.f32 0.001143296, %v150_v34  ;;  %v114_v39 = vmul.f32 %v113_v35, %v2579_v23  ;;  %v140_v55 = vadd.f32 0.00028619796, %v139_v44 }
  0x98   :  { %v103_v11 = vmul.f32 %v102_v0, %v2579_v23 }
  0x99   :  { %v177_v40 = vmul.f32 %v2597_v37, %v2597_v37  ;;  %v152_v41 = vmul.f32 %v151_v38, %v2589_v29  ;;  %v115_v42 = vadd.f32 0.112945676, %v114_v39  ;;  %v141_v1 = vmul.f32 %v140_v55, %v2589_v29 }
  0x9a   :  { %v104_v26 = vadd.f32 0.05243302, %v103_v11 }
  0x9b   :  { %v2604_v45 = vmin.f32 %v177_v40, 16.0  ;;  %v153_v47 = vadd.f32 0.014752088, %v152_v41  ;;  %v116_v48 = vmul.f32 %v115_v42, %v2579_v23  ;;  %v142_v12 = vadd.f32 0.0036580483, %v141_v1 }
  0x9c   :  { %v86_v46 = vpop.f32.mrf.mxu3  ;;  %v105_v36 = vmul.f32 %v104_v26, %v2579_v23 }
  0x9d   :  { %v179_v49 = vmul.f32 2.1237322e-06, %v2604_v45  ;;  %v2608_v50 = vadd.f32 %v86_v46, %v45_v20  ;;  %v190_v51 = vmul.f32 3.8918573e-05, %v2604_v45  ;;  %v154_v52 = vmul.f32 %v153_v47, %v2589_v29 }
  0x9e   :  { %v117_v53 = vadd.f32 0.4994258, %v116_v48  ;;  %v143_v27 = vmul.f32 %v142_v12, %v2589_v29  ;;  %v106_v47 = vadd.f32 0.18741608, %v105_v36 }
  0x9f   :  { %v180_v56 = vadd.f32 0.00028619796, %v179_v49  ;;  %v2614_v57 = vmul.f32 0.70710677, %v2608_v50  ;;  %v191_v58 = vadd.f32 0.001143296, %v190_v51 }
  0xa0   :  { %v155_v59 = vadd.f32 0.112945676, %v154_v52  ;;  %v118_v60 = vmul.f32 %v117_v53, %v2579_v23  ;;  %v144_v38 = vadd.f32 0.05243302, %v143_v27 }
  0xa1   :  { %v217_v61 = vmul.f32 %v2614_v57, %v2614_v57  ;;  %v192_v62 = vmul.f32 %v191_v58, %v2604_v45  ;;  %v181_v2 = vmul.f32 %v180_v56, %v2604_v45  ;;  %v107_v56 = vmul.f32 %v106_v47, %v2579_v23 }
  0xa2   :  { %v156_v63 = vmul.f32 %v155_v59, %v2589_v29  ;;  %v2625_v6 = vadd.f32 1.0, %v118_v60  ;;  %v145_v49 = vmul.f32 %v144_v38, %v2589_v29 }
  0xa3   :  { %v2623_v3 = vmin.f32 %v217_v61, 16.0  ;;  %v193_v4 = vadd.f32 0.014752088, %v192_v62  ;;  %v182_v13 = vadd.f32 0.0036580483, %v181_v2 }
  0xa4   :  { %v157_v5 = vadd.f32 0.4994258, %v156_v63  ;;  %2394 = vrcp.f32 %v2625_v6  ;;  %v146_v60 = vadd.f32 0.18741608, %v145_v49  ;;  %vm125_vm2 = vweird.f32 %v2625_v6 }
  0xa5   :  { %v219_v7 = vmul.f32 2.1237322e-06, %v2623_v3  ;;  %v230_v8 = vmul.f32 3.8918573e-05, %v2623_v3  ;;  %v194_v9 = vmul.f32 %v193_v4, %v2604_v45  ;;  %v183_v28 = vmul.f32 %v182_v13, %v2604_v45 }
  0xa6   :  { %v158_v10 = vmul.f32 %v157_v5, %v2589_v29  ;;  %v108_v5 = vadd.f32 1.1283791, %v107_v56 }
  0xa7   :  { %v220_v14 = vadd.f32 0.00028619796, %v219_v7  ;;  %v231_v15 = vadd.f32 0.001143296, %v230_v8  ;;  %v195_v16 = vadd.f32 0.112945676, %v194_v9  ;;  %v147_v7 = vmul.f32 %v146_v60, %v2589_v29 }
  0xa8   :  { %v2632_v17 = vadd.f32 1.0, %v158_v10  ;;  %v184_v40 = vadd.f32 0.05243302, %v183_v28 }
  0xa9   :  { %v221_v20 = vmul.f32 %v220_v14, %v2623_v3  ;;  %v232_v21 = vmul.f32 %v231_v15, %v2623_v3  ;;  %v196_v22 = vmul.f32 %v195_v16, %v2604_v45 }
  0xaa   :  { %2396 = vrcp.f32 %v2632_v17  ;;  %v2644_v39 = vpop.eup %2394  ;;  %v185_v51 = vmul.f32 %v184_v40, %v2604_v45  ;;  %v169_v12 = vand.u32 2147483647, %v2632_v17  ;;  %v171_v13 = vand.u32 2147483648, %v2632_v17 }
  0xab   :  { %v233_v30 = vadd.f32 0.014752088, %v232_v21  ;;  %v197_v31 = vadd.f32 0.4994258, %v196_v22  ;;  %v222_v32 = vadd.f32 0.0036580483, %v221_v20  ;;  %v121_v53 = vmul.f32 %v2644_v39, %v2625_v6 }
  0xac   :  { %v186_v61 = vadd.f32 0.18741608, %v185_v51  ;;  %vm126_vm6 = vweird.f32 %v2644_v39  ;;  %v129_v22 = vand.u32 2147483647, %v2625_v6  ;;  %vm165_vm7 = vweird.f32 %v2632_v17 }
  0xad   :  { %v234_v34 = vmul.f32 %v233_v30, %v2623_v3  ;;  %v198_v35 = vmul.f32 %v197_v31, %v2604_v45  ;;  %v223_v44 = vmul.f32 %v222_v32, %v2623_v3  ;;  %v122_v63 = vsub.f32 1.0, %v121_v53  ;;  %vm2695_vm11 = vmor %vm125_vm2, %vm126_vm6 }
  0xae   :  { %v187_v23 = vmul.f32 %v186_v61, %v2604_v45  ;;  %v148_v30 = vadd.f32 1.1283791, %v147_v7  ;;  %vm170_vm9 = vcmp.eq.f32.partialorder %v169_v12, 8.507059e+37  ;;  %v172_v36 = vor.u32 1.1754944e-38, %v171_v13  ;;  %v283_v13 = vpop.permute.xlu0 %282 }
  0xaf   :  { %v235_v41 = vadd.f32 0.112945676, %v234_v34  ;;  %v199_v42 = vadd.f32 1.0, %v198_v35  ;;  %v224_v54 = vadd.f32 0.05243302, %v223_v44  ;;  %v123_v8 = vmul.f32 %v2644_v39, %v122_v63 }
  0xb0   :  { %v2646_v43 = vpop.eup %2396  ;;  %v188_v45 = vadd.f32 1.1283791, %v187_v23  ;;  %v131_v34 = vand.u32 2147483648, %v2625_v6  ;;  %vm130_vm13 = vcmp.eq.f32.partialorder %v129_v22, 8.507059e+37  ;;  %v109_v51 = vmul.f32 %v108_v5, %v2575_v19  ;;  %v2281_v5 = vld [vmem:[%s3669_s2 + $0x30] sm:$0xff] }
  0xb1   :  { %v236_v46 = vmul.f32 %v235_v41, %v2623_v3  ;;  %2398 = vrcp.f32 %v199_v42  ;;  %v161_v48 = vmul.f32 %v2646_v43, %v2632_v17  ;;  %v225_v0 = vmul.f32 %v224_v54, %v2623_v3 }
  0xb2   :  { %vm205_vm3 = vweird.f32 %v199_v42  ;;  %v211_v11 = vand.u32 2147483648, %v199_v42  ;;  %v209_v15 = vand.u32 2147483647, %v199_v42  ;;  %vm166_vm4 = vweird.f32 %v2646_v43 }
  0xb3   :  { %v237_v52 = vadd.f32 0.4994258, %v236_v46  ;;  %v162_v58 = vsub.f32 1.0, %v161_v48  ;;  %v226_v9 = vadd.f32 0.18741608, %v225_v0  ;;  %v124_v21 = vadd.f32 %v2644_v39, %v123_v8  ;;  %vm2683_vm8 = vmor %vm165_vm7, %vm166_vm4 }
  0xb4   :  { %v212_v31 = vor.u32 1.1754944e-38, %v211_v11  ;;  %vm210_vm10 = vcmp.eq.f32.partialorder %v209_v15, 8.507059e+37  ;;  %v189_v38 = vmul.f32 %v188_v45, %v2597_v37  ;;  %v132_v6 = vor.u32 1.1754944e-38, %v131_v34  ;;  %v2278_v11 = vld [vmem:[%s3668_s1 + $0x38] sm:$0xff] }
  0xb5   :  { %v238_v55 = vmul.f32 %v237_v52, %v2623_v3  ;;  %v163_v4 = vmul.f32 %v2646_v43, %v162_v58  ;;  %v227_v26 = vmul.f32 %v226_v9, %v2623_v3  ;;  %v149_v48 = vmul.f32 %v148_v30, %v2584_v25  ;;  %v2282_v58 = vld [vmem:[%s3669_s2 + $0x38] sm:$0xff] }
  0xb6   :  { %292 = vperm.xlu2 %2393, %v2282_v58   ;;  %v92_v19 = vmul.f32 0.5, %v2608_v50  ;;  %v90_v7 = vmul.f32 0.5, %v2581_v24  ;;  %v89_v50 = vmul.f32 0.5, %v2572_v18  ;;  %v2276_v24 = vld [vmem:[%s3668_s1 + $0x28] sm:$0xff]  ;;  %v2277_v18 = vld [vmem:[%s3668_s1 + $0x30] sm:$0xff] }
  0xb7   :  { %v2399_v59 = vpop.eup %2398  ;;  %v2658_v62 = vadd.f32 1.0, %v238_v55  ;;  %v164_v16 = vadd.f32 %v2646_v43, %v163_v4  ;;  %v228_v44 = vadd.f32 1.1283791, %v227_v26 }
  0xb8   :  { %v201_v1 = vmul.f32 %v2399_v59, %v199_v42  ;;  %vm206_vm1 = vweird.f32 %v2399_v59  ;;  %v128_v42 = vsel %vm2695_vm11, %v2644_v39, %v124_v21 }
  0xb9   :  { %2400 = vrcp.f32 %v2658_v62  ;;  %vm2671_vm5 = vmor %vm205_vm3, %vm206_vm1  ;;  %v168_v3 = vsel %vm2683_vm8, %v2646_v43, %v164_v16  ;;  %v251_v40 = vand.u32 2147483648, %v2658_v62  ;;  %v249_v46 = vand.u32 2147483647, %v2658_v62 }
  0xba   :  { %v202_v2 = vsub.f32 1.0, %v201_v1  ;;  %v173_v47 = vsel %vm170_vm9, %v172_v36, %v168_v3  ;;  %vm245_vm14 = vweird.f32 %v2658_v62  ;;  %v133_v53 = vsel %vm130_vm13, %v132_v6, %v128_v42 }
  0xbb   :  { %v252_v52 = vor.u32 1.1754944e-38, %v251_v40  ;;  %v229_v39 = vmul.f32 %v228_v44, %v2614_v57  ;;  %vm250_vm1 = vcmp.eq.f32.partialorder %v249_v46, 8.507059e+37  ;;  %v174_v55 = vmul.f32 %v173_v47, %v149_v48 }
  0xbc   :  { %v203_v10 = vmul.f32 %v2399_v59, %v202_v2  ;;  %v134_v60 = vmul.f32 %v133_v53, %v109_v51  ;;  %v91_v57 = vmul.f32 0.5, %v2592_v33 }
  0xbe   :  { %v204_v14 = vadd.f32 %v2399_v59, %v203_v10  ;;  %v2271_v1 = vclamps-f32 %v134_v60, 1.0  ;;  %287 = vperm.xlu2 %2393, %v2281_v5   ;;  %v2275_v10 = vld [vmem:[%s3668_s1 + $0x20] sm:$0xff] }
  0xbf   :  { %v2401_v29 = vpop.eup %2400 }
  0xc0   :  { %v241_v27 = vmul.f32 %v2401_v29, %v2658_v62  ;;  %v208_v28 = vsel %vm2671_vm5, %v2399_v59, %v204_v14  ;;  %vm246_vm12 = vweird.f32 %v2401_v29  ;;  %v2272_v62 = vclamps-f32 %v174_v55, 1.0  ;;  %v278_v14 = vpop.permute.xlu1 %277 }
  0xc1   :  { %v213_v41 = vsel %vm210_vm10, %v212_v31, %v208_v28  ;;  %vm247_vm15 = vmor %vm245_vm14, %vm246_vm12  ;;  %v257_v8 = vadd.f32 1.0, %v2271_v1 }
  0xc2   :  { %v242_v35 = vsub.f32 1.0, %v241_v27  ;;  %v214_v37 = vmul.f32 %v213_v41, %v189_v38  ;;  %v258_v4 = vadd.f32 1.0, %v2272_v62 }
  0xc3   :  { %v261_v33 = vmul.f32 %v257_v8, %v89_v50 }
  0xc4   :  { %v243_v43 = vmul.f32 %v2401_v29, %v242_v35  ;;  %v2273_v59 = vclamps-f32 %v214_v37, 1.0  ;;  %v262_v9 = vmul.f32 %v258_v4, %v90_v7 }
  0xc6   :  { %v244_v49 = vadd.f32 %v2401_v29, %v243_v43  ;;  %v259_v0 = vadd.f32 1.0, %v2273_v59 }
  0xc8   :  { %v248_v54 = vsel %vm247_vm15, %v2401_v29, %v244_v49  ;;  %v263_v23 = vmul.f32 %v259_v0, %v91_v57 }
  0xc9   :  { %v253_v56 = vsel %vm250_vm1, %v252_v52, %v248_v54 }
  0xca   :  { %v254_v25 = vmul.f32 %v253_v56, %v229_v39 }
  0xcc   :  { %v2274_v61 = vclamps-f32 %v254_v25, 1.0 }
  0xce   :  { %v260_v63 = vadd.f32 1.0, %v2274_v61 }
  0xd0   :  { %v264_v2 = vmul.f32 %v260_v63, %v92_v19 }
  0xd2   :  { %319 = vmatpush.msrb.mxu0 %v264_v2  ;;  %2381 = vmatpush.msra.mxu1 %v264_v2 }
  0xd4   :  { %320 = vmatpush.msrb.mxu0 %v263_v23  ;;  %2382 = vmatpush.msra.mxu1 %v263_v23 }
  0xd6   :  { %321 = vmatpush.msrb.mxu0 %v262_v9  ;;  %2383 = vmatpush.msra.mxu1 %v262_v9 }
  0xd8   :  { %322 = vmatpush.msrb.mxu0 %v261_v33  ;;  %2384 = vmatpush.msra.mxu1 %v261_v33 }
  0xd9   :  { %2283 = vmatmul.msk.f32.vlgmr.msrb.gmra.mxu0 %vm47_vm0, %v2275_v10  ;;  %2284 = vmatmul.msk.f32.vlgmr.msra.gmra.mxu1 %vm47_vm0, %v2276_v24 }
  0xe1   :  { %2285 = vmatmul.msk.f32.gmra.mxu1 %vm47_vm0, %v2277_v18 }
  0xe9   :  { %2286 = vmatmul.msk.f32.gmra.mxu1 %vm47_vm0, %v2278_v11 }
 0x110   :  { %v293_v12 = vpop.permute.xlu2 %292 }
 0x118   :  { %v288_v27 = vpop.permute.xlu2 %287 }
 0x156   :  { %v324_v15 = vpop.f32.mrf.mxu0  ;;  %v327_v16 = vpop.f32.mrf.mxu1 }
 0x157   :  { %v2735_v29 = vadd.f32 %v324_v15, %v278_v14  ;;  %v2737_v45 = vadd.f32 %v327_v16, %v283_v13 }
 0x159   :  { %v2740_v20 = vmul.f32 0.70710677, %v2735_v29  ;;  %v2743_v21 = vmul.f32 0.70710677, %v2737_v45 }
 0x15b   :  { %v344_v22 = vmul.f32 %v2740_v20, %v2740_v20  ;;  %v384_v26 = vmul.f32 %v2743_v21, %v2743_v21 }
 0x15d   :  { %v2749_v28 = vmin.f32 %v344_v22, 16.0  ;;  %v385_v30 = vmin.f32 %v384_v26, 16.0 }
 0x15e   :  { %v330_v31 = vpop.f32.mrf.mxu1 }
 0x15f   :  { %v357_v32 = vmul.f32 3.8918573e-05, %v2749_v28  ;;  %v386_v34 = vmul.f32 2.1237322e-06, %v385_v30  ;;  %v2752_v35 = vadd.f32 %v330_v31, %v288_v27  ;;  %v397_v3 = vmul.f32 3.8918573e-05, %v385_v30 }
 0x160   :  { %v346_v7 = vmul.f32 2.1237322e-06, %v2749_v28 }
 0x161   :  { %v358_v36 = vadd.f32 0.001143296, %v357_v32  ;;  %v387_v17 = vadd.f32 0.00028619796, %v386_v34  ;;  %v398_v38 = vadd.f32 0.001143296, %v397_v3 }
 0x162   :  { %v2755_v40 = vmul.f32 0.70710677, %v2752_v35  ;;  %v347_v24 = vadd.f32 0.00028619796, %v346_v7 }
 0x163   :  { %v359_v41 = vmul.f32 %v358_v36, %v2749_v28  ;;  %v388_v42 = vmul.f32 %v387_v17, %v385_v30  ;;  %v399_v44 = vmul.f32 %v398_v38, %v385_v30 }
 0x164   :  { %v424_v43 = vmul.f32 %v2755_v40, %v2755_v40  ;;  %v348_v27 = vmul.f32 %v347_v24, %v2749_v28 }
 0x165   :  { %v360_v46 = vadd.f32 0.014752088, %v359_v41  ;;  %v389_v47 = vadd.f32 0.0036580483, %v388_v42  ;;  %v400_v6 = vadd.f32 0.014752088, %v399_v44 }
 0x166   :  { %v2760_v48 = vmin.f32 %v424_v43, 16.0  ;;  %v333_v49 = vpop.f32.mrf.mxu1  ;;  %v349_v44 = vadd.f32 0.0036580483, %v348_v27 }
 0x167   :  { %v361_v37 = vmul.f32 %v360_v46, %v2749_v28  ;;  %v401_v51 = vmul.f32 %v400_v6, %v385_v30  ;;  %v2765_v39 = vadd.f32 %v333_v49, %v293_v12  ;;  %v390_v55 = vmul.f32 %v389_v47, %v385_v30 }
 0x168   :  { %v426_v52 = vmul.f32 2.1237322e-06, %v2760_v48  ;;  %v437_v53 = vmul.f32 3.8918573e-05, %v2760_v48 }
 0x169   :  { %v362_v54 = vadd.f32 0.112945676, %v361_v37  ;;  %v402_v56 = vadd.f32 0.112945676, %v401_v51  ;;  %v2770_v62 = vmul.f32 0.70710677, %v2765_v39 }
 0x16a   :  { %v427_v58 = vadd.f32 0.00028619796, %v426_v52  ;;  %v438_v25 = vadd.f32 0.001143296, %v437_v53  ;;  %v391_v63 = vadd.f32 0.05243302, %v390_v55  ;;  %v350_v55 = vmul.f32 %v349_v44, %v2749_v28 }
 0x16b   :  { %v403_v59 = vmul.f32 %v402_v56, %v385_v30  ;;  %v363_v19 = vmul.f32 %v362_v54, %v2749_v28  ;;  %v464_v57 = vmul.f32 %v2770_v62, %v2770_v62 }
 0x16c   :  { %v428_v60 = vmul.f32 %v427_v58, %v2760_v48  ;;  %v439_v61 = vmul.f32 %v438_v25, %v2760_v48  ;;  %v392_v8 = vmul.f32 %v391_v63, %v385_v30 }
 0x16d   :  { %v404_v0 = vadd.f32 0.4994258, %v403_v59  ;;  %v364_v23 = vadd.f32 0.4994258, %v363_v19  ;;  %v2777_v33 = vmin.f32 %v464_v57, 16.0 }
 0x16e   :  { %v440_v1 = vadd.f32 0.014752088, %v439_v61  ;;  %v429_v2 = vadd.f32 0.0036580483, %v428_v60  ;;  %v393_v11 = vadd.f32 0.18741608, %v392_v8 }
 0x16f   :  { %v405_v4 = vmul.f32 %v404_v0, %v385_v30  ;;  %v365_v18 = vmul.f32 %v364_v23, %v2749_v28  ;;  %v466_v13 = vmul.f32 2.1237322e-06, %v2777_v33  ;;  %v477_v14 = vmul.f32 3.8918573e-05, %v2777_v33 }
 0x170   :  { %v441_v5 = vmul.f32 %v440_v1, %v2760_v48  ;;  %v430_v10 = vmul.f32 %v429_v2, %v2760_v48  ;;  %v394_v34 = vmul.f32 %v393_v11, %v385_v30  ;;  %v337_v2 = vmul.f32 0.5, %v2737_v45 }
 0x171   :  { %v406_v50 = vadd.f32 1.0, %v405_v4  ;;  %v467_v22 = vadd.f32 0.00028619796, %v466_v13  ;;  %v478_v26 = vadd.f32 0.001143296, %v477_v14  ;;  %v2785_v31 = vadd.f32 1.0, %v365_v18 }
 0x172   :  { %v442_v9 = vadd.f32 0.112945676, %v441_v5  ;;  %v431_v15 = vadd.f32 0.05243302, %v430_v10  ;;  %v395_v47 = vadd.f32 1.1283791, %v394_v34 }
 0x173   :  { %2402 = vrcp.f32 %v406_v50  ;;  %v468_v17 = vmul.f32 %v467_v22, %v2777_v33  ;;  %v479_v38 = vmul.f32 %v478_v26, %v2777_v33  ;;  %v416_v6 = vand.u32 2147483647, %v406_v50 }
 0x174   :  { %v443_v12 = vmul.f32 %v442_v9, %v2760_v48  ;;  %v432_v41 = vmul.f32 %v431_v15, %v2760_v48  ;;  %2404 = vrcp.f32 %v2785_v31  ;;  %v418_v49 = vand.u32 2147483648, %v406_v50 }
 0x175   :  { %v480_v46 = vadd.f32 0.014752088, %v479_v38  ;;  %v469_v37 = vadd.f32 0.0036580483, %v468_v17  ;;  %vm412_vm3 = vweird.f32 %v406_v50  ;;  %v396_v56 = vmul.f32 %v395_v47, %v2743_v21 }
 0x176   :  { %v444_v16 = vadd.f32 0.4994258, %v443_v12  ;;  %v433_v52 = vadd.f32 0.18741608, %v432_v41  ;;  %v419_v58 = vor.u32 1.1754944e-38, %v418_v49  ;;  %vm417_vm5 = vcmp.eq.f32.partialorder %v416_v6, 8.507059e+37 }
 0x177   :  { %v481_v51 = vmul.f32 %v480_v46, %v2777_v33  ;;  %v470_v60 = vmul.f32 %v469_v37, %v2777_v33  ;;  %v351_v21 = vadd.f32 0.05243302, %v350_v55  ;;  %v338_v41 = vmul.f32 0.5, %v2752_v35 }
 0x178   :  { %v445_v3 = vmul.f32 %v444_v16, %v2760_v48  ;;  %v434_v0 = vmul.f32 %v433_v52, %v2760_v48  ;;  %vm372_vm11 = vweird.f32 %v2785_v31  ;;  %v376_v49 = vand.u32 2147483647, %v2785_v31 }
 0x179   :  { %v2403_v32 = vpop.eup %2402  ;;  %v482_v54 = vadd.f32 0.112945676, %v481_v51  ;;  %v471_v23 = vadd.f32 0.05243302, %v470_v60  ;;  %v352_v14 = vmul.f32 %v351_v21, %v2749_v28 }
 0x17a   :  { %v408_v36 = vmul.f32 %v2403_v32, %v406_v50  ;;  %v446_v42 = vadd.f32 1.0, %v445_v3  ;;  %vm413_vm2 = vweird.f32 %v2403_v32  ;;  %v2795_v25 = vpop.eup %2404  ;;  %v435_v50 = vadd.f32 1.1283791, %v434_v0 }
 0x17b   :  { %vm414_vm4 = vmor %vm412_vm3, %vm413_vm2  ;;  %v483_v61 = vmul.f32 %v482_v54, %v2777_v33  ;;  %v368_v8 = vmul.f32 %v2795_v25, %v2785_v31  ;;  %v472_v13 = vmul.f32 %v471_v23, %v2777_v33  ;;  %v353_v3 = vadd.f32 0.18741608, %v352_v14 }
 0x17c   :  { %v409_v43 = vsub.f32 1.0, %v408_v36  ;;  %2406 = vrcp.f32 %v446_v42  ;;  %v458_v9 = vand.u32 2147483648, %v446_v42  ;;  %v456_v48 = vand.u32 2147483647, %v446_v42 }
 0x17d   :  { %v484_v4 = vadd.f32 0.4994258, %v483_v61  ;;  %vm452_vm7 = vweird.f32 %v446_v42  ;;  %v369_v16 = vsub.f32 1.0, %v368_v8  ;;  %v436_v22 = vmul.f32 %v435_v50, %v2755_v40 }
 0x17e   :  { %v410_v30 = vmul.f32 %v2403_v32, %v409_v43  ;;  %v459_v15 = vor.u32 1.1754944e-38, %v458_v9  ;;  %vm457_vm9 = vcmp.eq.f32.partialorder %v456_v48, 8.507059e+37  ;;  %v473_v34 = vadd.f32 0.18741608, %v472_v13 }
 0x17f   :  { %v485_v10 = vmul.f32 %v484_v4, %v2777_v33  ;;  %v370_v36 = vmul.f32 %v2795_v25, %v369_v16  ;;  %v354_v40 = vmul.f32 %v353_v3, %v2749_v28  ;;  %vm373_vm10 = vweird.f32 %v2795_v25 }
 0x180   :  { %v411_v53 = vadd.f32 %v2403_v32, %v410_v30  ;;  %v474_v44 = vmul.f32 %v473_v34, %v2777_v33  ;;  %v378_v30 = vand.u32 2147483648, %v2785_v31  ;;  %vm374_vm13 = vmor %vm372_vm11, %vm373_vm10  ;;  %vm377_vm1 = vcmp.eq.f32.partialorder %v376_v49, 8.507059e+37  ;;  %v2297_v49 = vld [vmem:[%s3669_s2 + $0x50] sm:$0xff] }
 0x181   :  { %v486_v11 = vadd.f32 1.0, %v485_v10  ;;  %v371_v46 = vadd.f32 %v2795_v25, %v370_v36  ;;  %v355_v28 = vadd.f32 1.1283791, %v354_v40  ;;  %v339_v0 = vmul.f32 0.5, %v2765_v39 }
 0x182   :  { %v415_v59 = vsel %vm414_vm4, %v2403_v32, %v411_v53  ;;  %v2407_v19 = vpop.eup %2406  ;;  %v475_v37 = vadd.f32 1.1283791, %v474_v44  ;;  %v379_v54 = vor.u32 1.1754944e-38, %v378_v30  ;;  %vm536_vm3 = vcmask 130048  }
 0x183   :  { %v420_v63 = vsel %vm417_vm5, %v419_v58, %v415_v59  ;;  %v448_v57 = vmul.f32 %v2407_v19, %v446_v42  ;;  %vm453_vm6 = vweird.f32 %v2407_v19  ;;  %2408 = vrcp.f32 %v486_v11 }
 0x184   :  { %v421_v1 = vmul.f32 %v420_v63, %v396_v56  ;;  %vm454_vm8 = vmor %vm452_vm7, %vm453_vm6  ;;  %v498_v35 = vand.u32 2147483648, %v486_v11  ;;  %v496_v33 = vand.u32 2147483647, %v486_v11  ;;  %v375_v52 = vsel %vm374_vm13, %v2795_v25, %v371_v46  ;;  %v2295_v46 = vld [vmem:[%s3669_s2 + $0x40] sm:$0xff] }
 0x185   :  { %v449_v7 = vsub.f32 1.0, %v448_v57  ;;  %vm492_vm14 = vweird.f32 %v486_v11  ;;  %v476_v56 = vmul.f32 %v475_v37, %v2770_v62  ;;  %v380_v58 = vsel %vm377_vm1, %v379_v54, %v375_v52  ;;  %v2314_v37 = vld [vmem:[%s3669_s2 + $0x78] sm:$0xff]  ;;  %v2313_v52 = vld [vmem:[%s3669_s2 + $0x70] sm:$0xff] }
 0x186   :  { %v2288_v5 = vclamps-f32 %v421_v1, 1.0  ;;  %v499_v55 = vor.u32 1.1754944e-38, %v498_v35  ;;  %vm497_vm2 = vcmp.eq.f32.partialorder %v496_v33, 8.507059e+37  ;;  %v356_v60 = vmul.f32 %v355_v28, %v2740_v20  ;;  %v2312_v35 = vld [vmem:[%s3669_s2 + $0x68] sm:$0xff]  ;;  %v2311_v28 = vld [vmem:[%s3669_s2 + $0x60] sm:$0xff] }
 0x187   :  { %v450_v18 = vmul.f32 %v2407_v19, %v449_v7  ;;  %v336_v62 = vmul.f32 0.5, %v2735_v29  ;;  %v2296_v33 = vld [vmem:[%s3669_s2 + $0x48] sm:$0xff] }
 0x188   :  { %v505_v24 = vadd.f32 1.0, %v2288_v5 }
 0x189   :  { %v451_v45 = vadd.f32 %v2407_v19, %v450_v18  ;;  %v2409_v38 = vpop.eup %2408 }
 0x18a   :  { %v2804_v12 = vmul.f32 %v505_v24, %v337_v2  ;;  %v488_v43 = vmul.f32 %v2409_v38, %v486_v11  ;;  %vm493_vm12 = vweird.f32 %v2409_v38 }
 0x18b   :  { %v455_v26 = vsel %vm454_vm8, %v2407_v19, %v451_v45  ;;  %vm494_vm15 = vmor %vm492_vm14, %vm493_vm12  ;;  %v381_v19 = vmul.f32 %v380_v58, %v356_v60 }
 0x18c   :  { %519 = vperm.xlu1 %2392, %v2804_v12   ;;  %v460_v27 = vsel %vm457_vm9, %v459_v15, %v455_v26  ;;  %v489_v6 = vsub.f32 1.0, %v488_v43 }
 0x18d   :  { %v461_v32 = vmul.f32 %v460_v27, %v436_v22  ;;  %v2287_v1 = vclamps-f32 %v381_v19, 1.0 }
 0x18e   :  { %v490_v51 = vmul.f32 %v2409_v38, %v489_v6 }
 0x18f   :  { %v2289_v17 = vclamps-f32 %v461_v32, 1.0  ;;  %v504_v2 = vadd.f32 1.0, %v2287_v1 }
 0x190   :  { %v491_v53 = vadd.f32 %v2409_v38, %v490_v51 }
 0x191   :  { %v506_v42 = vadd.f32 1.0, %v2289_v17  ;;  %v2830_v4 = vmul.f32 %v504_v2, %v336_v62  ;;  %v2298_v17 = vld [vmem:[%s3669_s2 + $0x58] sm:$0xff] }
 0x192   :  { %v495_v31 = vsel %vm494_vm15, %v2409_v38, %v491_v53 }
 0x193   :  { %v2816_v47 = vmul.f32 %v506_v42, %v338_v41  ;;  %v500_v59 = vsel %vm497_vm2, %v499_v55, %v495_v31 }
 0x194   :  { %v501_v61 = vmul.f32 %v500_v59, %v476_v56 }
 0x195   :  { %524 = vperm.xlu0 %2391, %v2816_v47  }
 0x196   :  { %v2290_v63 = vclamps-f32 %v501_v61, 1.0 }
 0x198   :  { %v507_v25 = vadd.f32 1.0, %v2290_v63 }
 0x19a   :  { %v2826_v57 = vmul.f32 %v507_v25, %v339_v0 }
 0x19c   :  { %529 = vperm.xlu2 %2393, %v2826_v57  }
 0x1a4   :  { %514 = vperm.xlu2 %2393, %v2830_v4  }
 0x1f6   :  { %v530_v21 = vpop.permute.xlu2 %529 }
 0x1f7   :  { %v535_v48 = vsub.f32 %v2826_v57, %v530_v21 }
 0x1f9   :  { %v546_v13 = vsel %vm536_vm3, %v535_v48, 0.0  ;;  %v556_v15 = vmul.f32 %v535_v48, %v535_v48 }
 0x1fb   :  { %v566_v16 = vsel %vm536_vm3, %v556_v15, 0.0 }
 0x1fe   :  { %v520_v20 = vpop.permute.xlu1 %519  ;;  %v515_v7 = vpop.permute.xlu2 %514 }
 0x1ff   :  { %v533_v5 = vsub.f32 %v2804_v12, %v520_v20  ;;  %v532_v23 = vsub.f32 %v2830_v4, %v515_v7 }
 0x201   :  { %v540_v39 = vsel %vm536_vm3, %v533_v5, 0.0  ;;  %v553_v50 = vmul.f32 %v532_v23, %v532_v23  ;;  %v537_v29 = vsel %vm536_vm3, %v532_v23, 0.0  ;;  %v554_v18 = vmul.f32 %v533_v5, %v533_v5 }
 0x202   :  { %541 = vadd.xlane.f32.xlu2 %v540_v39 }
 0x203   :  { %v557_v10 = vsel %vm536_vm3, %v553_v50, 0.0  ;;  %v560_v45 = vsel %vm536_vm3, %v554_v18, 0.0 }
 0x204   :  { %558 = vadd.xlane.f32.xlu0 %v557_v10 }
 0x207   :  { %v525_v8 = vpop.permute.xlu0 %524 }
 0x208   :  { %v534_v9 = vsub.f32 %v2816_v47, %v525_v8 }
 0x20a   :  { %538 = vadd.xlane.f32.xlu2 %v537_v29  ;;  %v543_v24 = vsel %vm536_vm3, %v534_v9, 0.0  ;;  %v555_v11 = vmul.f32 %v534_v9, %v534_v9 }
 0x20b   :  { %544 = vadd.xlane.f32.xlu1 %v543_v24 }
 0x20c   :  { %v563_v14 = vsel %vm536_vm3, %v555_v11, 0.0  ;;  %547 = vadd.xlane.f32.xlu0 %v546_v13 }
 0x212   :  { %561 = vadd.xlane.f32.xlu2 %v560_v45 }
 0x213   :  { %564 = vadd.xlane.f32.xlu1 %v563_v14 }
 0x214   :  { %567 = vadd.xlane.f32.xlu0 %v566_v16 }
 0x275   :  { %v542_v22 = vpop.xlane.xlu2 %541 }
 0x276   :  { %v550_v26 = vmul.f32 0.0625, %v542_v22 }
 0x277   :  { %v559_v3 = vpop.xlane.xlu0 %558 }
 0x278   :  { %v574_v27 = vadd.f32 %v550_v26, %v2804_v12  ;;  %v569_v38 = vmul.f32 0.0625, %v559_v3  ;;  %v578_v19 = vmul.f32 %v550_v26, %v550_v26 }
 0x27a   :  { %592 = vperm.xlu0 %2391, %v574_v27  }
 0x27d   :  { %v539_v32 = vpop.xlane.xlu2 %538 }
 0x27e   :  { %v549_v34 = vmul.f32 0.0625, %v539_v32  ;;  %v545_v36 = vpop.xlane.xlu1 %544 }
 0x27f   :  { %v551_v41 = vmul.f32 0.0625, %v545_v36  ;;  %v548_v40 = vpop.xlane.xlu0 %547 }
 0x280   :  { %v577_v42 = vmul.f32 %v549_v34, %v549_v34  ;;  %v552_v6 = vmul.f32 0.0625, %v548_v40  ;;  %v573_v51 = vadd.f32 %v549_v34, %v2830_v4 }
 0x281   :  { %v575_v44 = vadd.f32 %v551_v41, %v2816_v47  ;;  %v579_v59 = vmul.f32 %v551_v41, %v551_v41 }
 0x282   :  { %v581_v43 = vsub.f32 %v569_v38, %v577_v42  ;;  %684 = vperm.xlu0 %2391, %v2298_v17   ;;  %v576_v30 = vadd.f32 %v552_v6, %v2826_v57  ;;  %v580_v31 = vmul.f32 %v552_v6, %v552_v6 }
 0x283   :  { %597 = vperm.xlu2 %2393, %v575_v44  }
 0x284   :  { %602 = vperm.xlu1 %2392, %v576_v30   ;;  %v609_v62 = vadd.f32 1e-05, %v581_v43  ;;  %v2291_v30 = vld [vmem:[%s3668_s1 + $0x40] sm:$0xff] }
 0x285   :  { %v562_v56 = vpop.xlane.xlu2 %561 }
 0x286   :  { %v565_v54 = vpop.xlane.xlu1 %564  ;;  %v570_v60 = vmul.f32 0.0625, %v562_v56  ;;  %vm619_vm14 = vweird.f32 %v609_v62 }
 0x287   :  { %v568_v53 = vpop.xlane.xlu0 %567  ;;  %v571_v58 = vmul.f32 0.0625, %v565_v54 }
 0x288   :  { %v572_v55 = vmul.f32 0.0625, %v568_v53  ;;  %v582_v0 = vsub.f32 %v570_v60, %v578_v19 }
 0x289   :  { %v583_v63 = vsub.f32 %v571_v58, %v579_v59 }
 0x28a   :  { %669 = vperm.xlu0 %2391, %v2295_v46   ;;  %v584_v61 = vsub.f32 %v572_v55, %v580_v31  ;;  %v610_v2 = vadd.f32 1e-05, %v582_v0 }
 0x28b   :  { %679 = vperm.xlu2 %2393, %v2297_v49   ;;  %v611_v1 = vadd.f32 1e-05, %v583_v63 }
 0x28c   :  { %587 = vperm.xlu1 %2392, %v573_v51   ;;  %v612_v25 = vadd.f32 1e-05, %v584_v61  ;;  %vm629_vm11 = vweird.f32 %v610_v2 }
 0x28d   :  { %vm639_vm7 = vweird.f32 %v611_v1 }
 0x28e   :  { %2410 = vrsqrt.f32 %v612_v25  ;;  %vm649_vm6 = vweird.f32 %v612_v25 }
 0x28f   :  { %2412 = vrsqrt.f32 %v611_v1 }
 0x290   :  { %2414 = vrsqrt.f32 %v610_v2 }
 0x291   :  { %2416 = vrsqrt.f32 %v609_v62 }
 0x292   :  { %921 = vperm.xlu0 %2391, %v2312_v35   ;;  %v2292_v35 = vld [vmem:[%s3668_s1 + $0x48] sm:$0xff] }
 0x293   :  { %931 = vperm.xlu2 %2393, %v2314_v37   ;;  %v2294_v37 = vld [vmem:[%s3668_s1 + $0x58] sm:$0xff] }
 0x294   :  { %674 = vperm.xlu1 %2392, %v2296_v33   ;;  %v2411_v21 = vpop.eup %2410 }
 0x295   :  { %v2413_v20 = vpop.eup %2412  ;;  %v644_v5 = vmul.f32 %v2411_v21, %v612_v25  ;;  %vm650_vm4 = vweird.f32 %v2411_v21 }
 0x296   :  { %v2415_v39 = vpop.eup %2414  ;;  %v634_v7 = vmul.f32 %v2413_v20, %v611_v1  ;;  %vm640_vm5 = vweird.f32 %v2413_v20  ;;  %vm651_vm8 = vmor %vm649_vm6, %vm650_vm4 }
 0x297   :  { %v624_v23 = vmul.f32 %v2415_v39, %v610_v2  ;;  %v645_v8 = vmul.f32 %v2411_v21, %v644_v5  ;;  %v2417_v50 = vpop.eup %2416  ;;  %vm630_vm9 = vweird.f32 %v2415_v39  ;;  %vm641_vm10 = vmor %vm639_vm7, %vm640_vm5 }
 0x298   :  { %v635_v9 = vmul.f32 %v2413_v20, %v634_v7  ;;  %v614_v29 = vmul.f32 %v2417_v50, %v609_v62  ;;  %vm631_vm12 = vmor %vm629_vm11, %vm630_vm9  ;;  %vm620_vm13 = vweird.f32 %v2417_v50 }
 0x299   :  { %v625_v10 = vmul.f32 %v2415_v39, %v624_v23  ;;  %v646_v24 = vmul.f32 0.5, %v645_v8  ;;  %vm621_vm15 = vmor %vm619_vm14, %vm620_vm13 }
 0x29a   :  { %v636_v18 = vmul.f32 0.5, %v635_v9  ;;  %v615_v45 = vmul.f32 %v2417_v50, %v614_v29 }
 0x29b   :  { %916 = vperm.xlu2 %2393, %v2311_v28   ;;  %v626_v48 = vmul.f32 0.5, %v625_v10  ;;  %v647_v11 = vsub.f32 1.5, %v646_v24 }
 0x29c   :  { %926 = vperm.xlu1 %2392, %v2313_v52   ;;  %v637_v13 = vsub.f32 1.5, %v636_v18  ;;  %v616_v22 = vmul.f32 0.5, %v615_v45 }
 0x29d   :  { %v627_v15 = vsub.f32 1.5, %v626_v48  ;;  %v648_v16 = vmul.f32 %v2411_v21, %v647_v11 }
 0x29e   :  { %v638_v26 = vmul.f32 %v2413_v20, %v637_v13  ;;  %v617_v38 = vsub.f32 1.5, %v616_v22 }
 0x29f   :  { %v628_v36 = vmul.f32 %v2415_v39, %v627_v15  ;;  %v652_v17 = vsel %vm651_vm8, %v2411_v21, %v648_v16 }
 0x2a0   :  { %v642_v44 = vsel %vm641_vm10, %v2413_v20, %v638_v26  ;;  %v618_v46 = vmul.f32 %v2417_v50, %v617_v38 }
 0x2a1   :  { %v632_v40 = vsel %vm631_vm12, %v2415_v39, %v628_v36 }
 0x2dd   :  { %v598_v14 = vpop.permute.xlu2 %597 }
 0x2de   :  { %v607_v34 = vsub.f32 %v2816_v47, %v598_v14 }
 0x2e0   :  { %v655_v43 = vmul.f32 %v642_v44, %v607_v34 }
 0x2e5   :  { %v680_v0 = vpop.permute.xlu2 %679 }
 0x2ec   :  { %v593_v27 = vpop.permute.xlu0 %592 }
 0x2ed   :  { %v606_v41 = vsub.f32 %v2804_v12, %v593_v27  ;;  %v622_v12 = vsel %vm621_vm15, %v2417_v50, %v618_v46 }
 0x2ef   :  { %v654_v47 = vmul.f32 %v632_v40, %v606_v41 }
 0x2f4   :  { %v685_v51 = vpop.permute.xlu0 %684 }
 0x2f6   :  { %v603_v32 = vpop.permute.xlu1 %602 }
 0x2f7   :  { %v608_v3 = vsub.f32 %v2826_v57, %v603_v32 }
 0x2f9   :  { %v656_v42 = vmul.f32 %v652_v17, %v608_v3 }
 0x2fb   :  { %711 = vmatpush.msra.mxu0 %v656_v42  ;;  %2385 = vmatpush.msra.mxu2 %v656_v42 }
 0x2fc   :  { %v670_v33 = vpop.permute.xlu0 %669 }
 0x2fd   :  { %712 = vmatpush.msra.mxu0 %v655_v43  ;;  %2386 = vmatpush.msra.mxu2 %v655_v43 }
 0x2fe   :  { %v588_v57 = vpop.permute.xlu1 %587 }
 0x2ff   :  { %v605_v6 = vsub.f32 %v2830_v4, %v588_v57  ;;  %713 = vmatpush.msra.mxu0 %v654_v47  ;;  %2387 = vmatpush.msra.mxu2 %v654_v47  ;;  %v2293_v4 = vld [vmem:[%s3668_s1 + $0x50] sm:$0xff] }
 0x301   :  { %v653_v49 = vmul.f32 %v622_v12, %v605_v6 }
 0x303   :  { %714 = vmatpush.msra.mxu0 %v653_v49  ;;  %2388 = vmatpush.msra.mxu2 %v653_v49 }
 0x304   :  { %2299 = vmatmul.msk.f32.vlgmr.msra.gmra.mxu0 %vm47_vm0, %v2291_v30  ;;  %2300 = vmatmul.msk.f32.vlgmr.msra.gmra.mxu2 %vm47_vm0, %v2292_v35 }
 0x306   :  { %v675_v55 = vpop.permute.xlu1 %674 }
 0x30c   :  { %2301 = vmatmul.msk.f32.gmra.mxu2 %vm47_vm0, %v2293_v4 }
 0x314   :  { %2302 = vmatmul.msk.f32.gmra.mxu2 %vm47_vm0, %v2294_v37 }
 0x381   :  { %v716_v28 = vpop.f32.mrf.mxu0 }
 0x382   :  { %v2893_v52 = vadd.f32 %v716_v28, %v670_v33 }
 0x384   :  { %v2896_v53 = vmul.f32 0.70710677, %v2893_v52 }
 0x386   :  { %v736_v54 = vmul.f32 %v2896_v53, %v2896_v53 }
 0x387   :  { %v719_v56 = vpop.f32.mrf.mxu2 }
 0x388   :  { %v2900_v31 = vmin.f32 %v736_v54, 16.0  ;;  %v2902_v58 = vadd.f32 %v719_v56, %v675_v55 }
 0x38a   :  { %v2905_v59 = vmul.f32 0.70710677, %v2902_v58  ;;  %v749_v60 = vmul.f32 3.8918573e-05, %v2900_v31  ;;  %v738_v20 = vmul.f32 2.1237322e-06, %v2900_v31 }
 0x38c   :  { %v776_v61 = vmul.f32 %v2905_v59, %v2905_v59  ;;  %v750_v19 = vadd.f32 0.001143296, %v749_v60  ;;  %v739_v9 = vadd.f32 0.00028619796, %v738_v20 }
 0x38e   :  { %v2910_v63 = vmin.f32 %v776_v61, 16.0  ;;  %v751_v1 = vmul.f32 %v750_v19, %v2900_v31  ;;  %v740_v16 = vmul.f32 %v739_v9, %v2900_v31 }
 0x38f   :  { %v722_v25 = vpop.f32.mrf.mxu2 }
 0x390   :  { %v2913_v2 = vadd.f32 %v722_v25, %v680_v0  ;;  %v789_v62 = vmul.f32 3.8918573e-05, %v2910_v63  ;;  %v752_v21 = vadd.f32 0.014752088, %v751_v1  ;;  %v778_v29 = vmul.f32 2.1237322e-06, %v2910_v63 }
 0x391   :  { %v741_v41 = vadd.f32 0.0036580483, %v740_v16 }
 0x392   :  { %v2918_v5 = vmul.f32 0.70710677, %v2913_v2  ;;  %v790_v39 = vadd.f32 0.001143296, %v789_v62  ;;  %v753_v7 = vmul.f32 %v752_v21, %v2900_v31  ;;  %v779_v22 = vadd.f32 0.00028619796, %v778_v29 }
 0x393   :  { %v742_v30 = vmul.f32 %v741_v41, %v2900_v31 }
 0x394   :  { %v816_v23 = vmul.f32 %v2918_v5, %v2918_v5  ;;  %v791_v8 = vmul.f32 %v790_v39, %v2910_v63  ;;  %v754_v50 = vadd.f32 0.112945676, %v753_v7  ;;  %v780_v42 = vmul.f32 %v779_v22, %v2910_v63 }
 0x395   :  { %v743_v60 = vadd.f32 0.05243302, %v742_v30 }
 0x396   :  { %v2925_v10 = vmin.f32 %v816_v23, 16.0  ;;  %v792_v18 = vadd.f32 0.014752088, %v791_v8  ;;  %v755_v48 = vmul.f32 %v754_v50, %v2900_v31  ;;  %v781_v35 = vadd.f32 0.0036580483, %v780_v42 }
 0x397   :  { %v725_v24 = vpop.f32.mrf.mxu2  ;;  %v744_v20 = vmul.f32 %v743_v60, %v2900_v31 }
 0x398   :  { %v818_v11 = vmul.f32 2.1237322e-06, %v2925_v10  ;;  %v2929_v45 = vadd.f32 %v725_v24, %v685_v51  ;;  %v829_v13 = vmul.f32 3.8918573e-05, %v2925_v10  ;;  %v793_v14 = vmul.f32 %v792_v18, %v2910_v63 }
 0x399   :  { %v756_v15 = vadd.f32 0.4994258, %v755_v48  ;;  %v782_v61 = vmul.f32 %v781_v35, %v2910_v63  ;;  %v745_v18 = vadd.f32 0.18741608, %v744_v20 }
 0x39a   :  { %v819_v26 = vadd.f32 0.00028619796, %v818_v11  ;;  %v2935_v27 = vmul.f32 0.70710677, %v2929_v45  ;;  %v830_v32 = vadd.f32 0.001143296, %v829_v13 }
 0x39b   :  { %v794_v34 = vadd.f32 0.112945676, %v793_v14  ;;  %v757_v3 = vmul.f32 %v756_v15, %v2900_v31  ;;  %v783_v39 = vadd.f32 0.05243302, %v782_v61 }
 0x39c   :  { %v856_v36 = vmul.f32 %v2935_v27, %v2935_v27  ;;  %v831_v17 = vmul.f32 %v830_v32, %v2925_v10  ;;  %v820_v44 = vmul.f32 %v819_v26, %v2925_v10  ;;  %v746_v26 = vmul.f32 %v745_v18, %v2900_v31 }
 0x39d   :  { %v795_v38 = vmul.f32 %v794_v34, %v2910_v63  ;;  %v2946_v47 = vadd.f32 1.0, %v757_v3  ;;  %v784_v11 = vmul.f32 %v783_v39, %v2910_v63 }
 0x39e   :  { %v2944_v43 = vmin.f32 %v856_v36, 16.0  ;;  %v832_v40 = vadd.f32 0.014752088, %v831_v17  ;;  %v821_v4 = vadd.f32 0.0036580483, %v820_v44 }
 0x39f   :  { %v796_v46 = vadd.f32 0.4994258, %v795_v38  ;;  %2418 = vrcp.f32 %v2946_v47  ;;  %v785_v3 = vadd.f32 0.18741608, %v784_v11  ;;  %vm764_vm2 = vweird.f32 %v2946_v47 }
 0x3a0   :  { %v858_v57 = vmul.f32 2.1237322e-06, %v2944_v43  ;;  %v869_v6 = vmul.f32 3.8918573e-05, %v2944_v43  ;;  %v833_v12 = vmul.f32 %v832_v40, %v2925_v10  ;;  %v822_v19 = vmul.f32 %v821_v4, %v2925_v10 }
 0x3a1   :  { %v797_v49 = vmul.f32 %v796_v46, %v2910_v63  ;;  %v747_v46 = vadd.f32 1.1283791, %v746_v26 }
 0x3a2   :  { %v859_v37 = vadd.f32 0.00028619796, %v858_v57  ;;  %v870_v51 = vadd.f32 0.001143296, %v869_v6  ;;  %v834_v33 = vadd.f32 0.112945676, %v833_v12  ;;  %v786_v57 = vmul.f32 %v785_v3, %v2910_v63 }
 0x3a3   :  { %v2953_v28 = vadd.f32 1.0, %v797_v49  ;;  %v823_v23 = vadd.f32 0.05243302, %v822_v19 }
 0x3a4   :  { %v860_v54 = vmul.f32 %v859_v37, %v2944_v43  ;;  %v871_v55 = vmul.f32 %v870_v51, %v2944_v43  ;;  %v835_v56 = vmul.f32 %v834_v33, %v2925_v10 }
 0x3a5   :  { %2420 = vrcp.f32 %v2953_v28  ;;  %v2965_v7 = vpop.eup %2418  ;;  %v824_v13 = vmul.f32 %v823_v23, %v2925_v10  ;;  %v808_v35 = vand.u32 2147483647, %v2953_v28  ;;  %v810_v4 = vand.u32 2147483648, %v2953_v28 }
 0x3a6   :  { %v872_v0 = vadd.f32 0.014752088, %v871_v55  ;;  %v836_v25 = vadd.f32 0.4994258, %v835_v56  ;;  %v861_v1 = vadd.f32 0.0036580483, %v860_v54  ;;  %v760_v15 = vmul.f32 %v2965_v7, %v2946_v47 }
 0x3a7   :  { %v825_v36 = vadd.f32 0.18741608, %v824_v13  ;;  %vm765_vm7 = vweird.f32 %v2965_v7  ;;  %v768_v56 = vand.u32 2147483647, %v2946_v47  ;;  %vm804_vm8 = vweird.f32 %v2953_v28 }
 0x3a8   :  { %v873_v62 = vmul.f32 %v872_v0, %v2944_v43  ;;  %v837_v21 = vmul.f32 %v836_v25, %v2925_v10  ;;  %v862_v29 = vmul.f32 %v861_v1, %v2944_v43  ;;  %v761_v38 = vsub.f32 1.0, %v760_v15  ;;  %vm3016_vm12 = vmor %vm764_vm2, %vm765_vm7 }
 0x3a9   :  { %v826_v31 = vmul.f32 %v825_v36, %v2925_v10  ;;  %v787_v0 = vadd.f32 1.1283791, %v786_v57  ;;  %vm809_vm10 = vcmp.eq.f32.partialorder %v808_v35, 8.507059e+37  ;;  %v811_v20 = vor.u32 1.1754944e-38, %v810_v4 }
 0x3aa   :  { %v874_v8 = vadd.f32 0.112945676, %v873_v62  ;;  %v838_v50 = vadd.f32 1.0, %v837_v21  ;;  %v863_v16 = vadd.f32 0.05243302, %v862_v29  ;;  %v762_v6 = vmul.f32 %v2965_v7, %v761_v38 }
 0x3ab   :  { %v2967_v9 = vpop.eup %2420  ;;  %v827_v10 = vadd.f32 1.1283791, %v826_v31  ;;  %v770_v62 = vand.u32 2147483648, %v2946_v47  ;;  %vm769_vm14 = vcmp.eq.f32.partialorder %v768_v56, 8.507059e+37  ;;  %v748_v13 = vmul.f32 %v747_v46, %v2896_v53 }
 0x3ac   :  { %v875_v24 = vmul.f32 %v874_v8, %v2944_v43  ;;  %2422 = vrcp.f32 %v838_v50  ;;  %v800_v48 = vmul.f32 %v2967_v9, %v2953_v28  ;;  %v864_v41 = vmul.f32 %v863_v16, %v2944_v43 }
 0x3ad   :  { %vm844_vm4 = vweird.f32 %v838_v50  ;;  %v850_v30 = vand.u32 2147483648, %v838_v50  ;;  %v848_v51 = vand.u32 2147483647, %v838_v50  ;;  %vm805_vm5 = vweird.f32 %v2967_v9 }
 0x3ae   :  { %v876_v14 = vadd.f32 0.4994258, %v875_v24  ;;  %v801_v32 = vsub.f32 1.0, %v800_v48  ;;  %v865_v12 = vadd.f32 0.18741608, %v864_v41  ;;  %v763_v55 = vadd.f32 %v2965_v7, %v762_v6  ;;  %vm3004_vm9 = vmor %vm804_vm8, %vm805_vm5 }
 0x3af   :  { %v851_v25 = vor.u32 1.1754944e-38, %v850_v30  ;;  %vm849_vm11 = vcmp.eq.f32.partialorder %v848_v51, 8.507059e+37  ;;  %v828_v39 = vmul.f32 %v827_v10, %v2918_v5  ;;  %v771_v47 = vor.u32 1.1754944e-38, %v770_v62 }
 0x3b0   :  { %v877_v22 = vmul.f32 %v876_v14, %v2944_v43  ;;  %v802_v40 = vmul.f32 %v2967_v9, %v801_v32  ;;  %v866_v60 = vmul.f32 %v865_v12, %v2944_v43  ;;  %v788_v48 = vmul.f32 %v787_v0, %v2905_v59  ;;  %v927_v0 = vpop.permute.xlu1 %926 }
 0x3b1   :  { %v731_v38 = vmul.f32 0.5, %v2929_v45  ;;  %v730_v53 = vmul.f32 0.5, %v2913_v2  ;;  %v728_v31 = vmul.f32 0.5, %v2893_v52  ;;  %v2307_v45 = vld [vmem:[%s3668_s1 + $0x60] sm:$0xff]  ;;  %v2309_v52 = vld [vmem:[%s3668_s1 + $0x70] sm:$0xff]  ;;  %v2310_v2 = vld [vmem:[%s3668_s1 + $0x78] sm:$0xff] }
 0x3b2   :  { %v2423_v34 = vpop.eup %2422  ;;  %v2979_v17 = vadd.f32 1.0, %v877_v22  ;;  %v803_v33 = vadd.f32 %v2967_v9, %v802_v40  ;;  %v867_v29 = vadd.f32 1.1283791, %v866_v60 }
 0x3b3   :  { %v840_v42 = vmul.f32 %v2423_v34, %v838_v50  ;;  %vm845_vm1 = vweird.f32 %v2423_v34  ;;  %v767_v50 = vsel %vm3016_vm12, %v2965_v7, %v763_v55 }
 0x3b4   :  { %2424 = vrcp.f32 %v2979_v17  ;;  %vm2992_vm6 = vmor %vm844_vm4, %vm845_vm1  ;;  %v807_v43 = vsel %vm3004_vm9, %v2967_v9, %v803_v33  ;;  %v890_v23 = vand.u32 2147483648, %v2979_v17  ;;  %v888_v24 = vand.u32 2147483647, %v2979_v17 }
 0x3b5   :  { %v841_v44 = vsub.f32 1.0, %v840_v42  ;;  %v812_v18 = vsel %vm809_vm10, %v811_v20, %v807_v43  ;;  %vm884_vm15 = vweird.f32 %v2979_v17  ;;  %v772_v15 = vsel %vm769_vm14, %v771_v47, %v767_v50 }
 0x3b6   :  { %v891_v14 = vor.u32 1.1754944e-38, %v890_v23  ;;  %v868_v7 = vmul.f32 %v867_v29, %v2935_v27  ;;  %vm889_vm2 = vcmp.eq.f32.partialorder %v888_v24, 8.507059e+37  ;;  %v813_v22 = vmul.f32 %v812_v18, %v788_v48 }
 0x3b7   :  { %v842_v49 = vmul.f32 %v2423_v34, %v841_v44  ;;  %v773_v3 = vmul.f32 %v772_v15, %v748_v13  ;;  %v729_v27 = vmul.f32 0.5, %v2902_v58  ;;  %v2308_v58 = vld [vmem:[%s3668_s1 + $0x68] sm:$0xff] }
 0x3b8   :  { %v2304_v59 = vclamps-f32 %v813_v22, 1.0 }
 0x3b9   :  { %v843_v37 = vadd.f32 %v2423_v34, %v842_v49  ;;  %v2303_v42 = vclamps-f32 %v773_v3, 1.0  ;;  %v932_v49 = vpop.permute.xlu2 %931 }
 0x3ba   :  { %v2425_v63 = vpop.eup %2424  ;;  %v897_v40 = vadd.f32 1.0, %v2304_v59 }
 0x3bb   :  { %v880_v61 = vmul.f32 %v2425_v63, %v2979_v17  ;;  %v847_v19 = vsel %vm2992_vm6, %v2423_v34, %v843_v37  ;;  %vm885_vm13 = vweird.f32 %v2425_v63  ;;  %v896_v57 = vadd.f32 1.0, %v2303_v42 }
 0x3bc   :  { %v852_v8 = vsel %vm849_vm11, %v851_v25, %v847_v19  ;;  %vm886_vm1 = vmor %vm884_vm15, %vm885_vm13  ;;  %v901_v6 = vmul.f32 %v897_v40, %v729_v27 }
 0x3bd   :  { %v881_v21 = vsub.f32 1.0, %v880_v61  ;;  %v853_v5 = vmul.f32 %v852_v8, %v828_v39  ;;  %v900_v12 = vmul.f32 %v896_v57, %v728_v31 }
 0x3bf   :  { %v882_v9 = vmul.f32 %v2425_v63, %v881_v21  ;;  %v2305_v34 = vclamps-f32 %v853_v5, 1.0 }
 0x3c1   :  { %v883_v11 = vadd.f32 %v2425_v63, %v882_v9  ;;  %v898_v41 = vadd.f32 1.0, %v2305_v34  ;;  %v917_v30 = vpop.permute.xlu2 %916 }
 0x3c3   :  { %v887_v16 = vsel %vm886_vm1, %v2425_v63, %v883_v11  ;;  %v902_v46 = vmul.f32 %v898_v41, %v730_v53  ;;  %v922_v63 = vpop.permute.xlu0 %921 }
 0x3c4   :  { %v892_v26 = vsel %vm889_vm2, %v891_v14, %v887_v16 }
 0x3c5   :  { %v893_v32 = vmul.f32 %v892_v26, %v868_v7 }
 0x3c7   :  { %v2306_v36 = vclamps-f32 %v893_v32, 1.0 }
 0x3c9   :  { %v899_v17 = vadd.f32 1.0, %v2306_v36 }
 0x3cb   :  { %v903_v44 = vmul.f32 %v899_v17, %v731_v38 }
 0x3cd   :  { %958 = vmatpush.msrb.mxu3 %v903_v44 }
 0x3cf   :  { %959 = vmatpush.msrb.mxu3 %v902_v46 }
 0x3d1   :  { %960 = vmatpush.msrb.mxu3 %v901_v6 }
 0x3d3   :  { %961 = vmatpush.msrb.mxu3 %v900_v12 }
 0x3d4   :  { %2315 = vmatmul.msk.f32.vlgmr.msrb.gmra.mxu3 %vm47_vm0, %v2307_v45 }
 0x3dc   :  { %2316 = vmatmul.msk.f32.gmra.mxu3 %vm47_vm0, %v2308_v58 }
 0x3e4   :  { %2317 = vmatmul.msk.f32.gmra.mxu3 %vm47_vm0, %v2309_v52 }
 0x3ec   :  { %2318 = vmatmul.msk.f32.gmra.mxu3 %vm47_vm0, %v2310_v2 }
 0x457   :  { %v963_v35 = vpop.f32.mrf.mxu3 }
 0x458   :  { %v3050_v4 = vadd.f32 %v963_v35, %v917_v30 }
 0x45a   :  { %v3053_v37 = vmul.f32 0.70710677, %v3050_v4 }
 0x45c   :  { %v983_v51 = vmul.f32 %v3053_v37, %v3053_v37 }
 0x45e   :  { %v3057_v33 = vmin.f32 %v983_v51, 16.0 }
 0x45f   :  { %v966_v10 = vpop.f32.mrf.mxu3 }
 0x460   :  { %v996_v54 = vmul.f32 3.8918573e-05, %v3057_v33  ;;  %v3060_v55 = vadd.f32 %v966_v10, %v922_v63  ;;  %v985_v53 = vmul.f32 2.1237322e-06, %v3057_v33 }
 0x462   :  { %v997_v56 = vadd.f32 0.001143296, %v996_v54  ;;  %v3063_v60 = vmul.f32 0.70710677, %v3060_v55  ;;  %v986_v2 = vadd.f32 0.00028619796, %v985_v53 }
 0x464   :  { %v998_v61 = vmul.f32 %v997_v56, %v3057_v33  ;;  %v1023_v19 = vmul.f32 %v3063_v60, %v3063_v60  ;;  %v987_v56 = vmul.f32 %v986_v2, %v3057_v33 }
 0x466   :  { %v3068_v25 = vmin.f32 %v1023_v19, 16.0  ;;  %v999_v21 = vadd.f32 0.014752088, %v998_v61 }
 0x467   :  { %v969_v1 = vpop.f32.mrf.mxu3 }
 0x468   :  { %v3070_v62 = vadd.f32 %v969_v1, %v927_v0  ;;  %v1025_v43 = vmul.f32 2.1237322e-06, %v3068_v25  ;;  %v1036_v20 = vmul.f32 3.8918573e-05, %v3068_v25  ;;  %v1000_v8 = vmul.f32 %v999_v21, %v3057_v33 }
 0x46a   :  { %v1026_v28 = vadd.f32 0.00028619796, %v1025_v43  ;;  %v1037_v39 = vadd.f32 0.001143296, %v1036_v20  ;;  %v3075_v23 = vmul.f32 0.70710677, %v3070_v62 }
 0x46b   :  { %v1001_v5 = vadd.f32 0.112945676, %v1000_v8  ;;  %v988_v8 = vadd.f32 0.0036580483, %v987_v56 }
 0x46c   :  { %v1027_v50 = vmul.f32 %v1026_v28, %v3068_v25  ;;  %v1038_v29 = vmul.f32 %v1037_v39, %v3068_v25  ;;  %v1063_v9 = vmul.f32 %v3075_v23, %v3075_v23 }
 0x46d   :  { %v1002_v32 = vmul.f32 %v1001_v5, %v3057_v33 }
 0x46e   :  { %v1039_v24 = vadd.f32 0.014752088, %v1038_v29  ;;  %v3082_v18 = vmin.f32 %v1063_v9, 16.0  ;;  %v1028_v48 = vadd.f32 0.0036580483, %v1027_v50 }
 0x46f   :  { %v972_v47 = vpop.f32.mrf.mxu3  ;;  %v1003_v44 = vadd.f32 0.4994258, %v1002_v32 }
 0x470   :  { %v3084_v11 = vadd.f32 %v972_v47, %v932_v49  ;;  %v1040_v13 = vmul.f32 %v1039_v24, %v3068_v25  ;;  %v1065_v14 = vmul.f32 2.1237322e-06, %v3082_v18  ;;  %v1076_v15 = vmul.f32 3.8918573e-05, %v3082_v18 }
 0x471   :  { %v1029_v26 = vmul.f32 %v1028_v48, %v3068_v25  ;;  %v1004_v49 = vmul.f32 %v1003_v44, %v3057_v33 }
 0x472   :  { %v3090_v7 = vmul.f32 0.70710677, %v3084_v11  ;;  %v1041_v16 = vadd.f32 0.112945676, %v1040_v13  ;;  %v1066_v22 = vadd.f32 0.00028619796, %v1065_v14 }
 0x473   :  { %v1077_v3 = vadd.f32 0.001143296, %v1076_v15  ;;  %v1030_v17 = vadd.f32 0.05243302, %v1029_v26  ;;  %v3113_v61 = vadd.f32 1.0, %v1004_v49 }
 0x474   :  { %v1042_v34 = vmul.f32 %v1041_v16, %v3068_v25  ;;  %v1103_v36 = vmul.f32 %v3090_v7, %v3090_v7  ;;  %v1067_v38 = vmul.f32 %v1066_v22, %v3082_v18  ;;  %v989_v16 = vmul.f32 %v988_v8, %v3057_v33 }
 0x475   :  { %v1078_v41 = vmul.f32 %v1077_v3, %v3082_v18  ;;  %v1031_v12 = vmul.f32 %v1030_v17, %v3068_v25  ;;  %vm1011_vm12 = vweird.f32 %v3113_v61 }
 0x476   :  { %v1043_v59 = vadd.f32 0.4994258, %v1042_v34  ;;  %v3099_v42 = vmin.f32 %v1103_v36, 16.0  ;;  %v1068_v6 = vadd.f32 0.0036580483, %v1067_v38 }
 0x477   :  { %v1079_v27 = vadd.f32 0.014752088, %v1078_v41  ;;  %v1032_v10 = vadd.f32 0.18741608, %v1031_v12  ;;  %v990_v41 = vadd.f32 0.05243302, %v989_v16 }
 0x478   :  { %v1044_v40 = vmul.f32 %v1043_v59, %v3068_v25  ;;  %v1105_v46 = vmul.f32 2.1237322e-06, %v3099_v42  ;;  %v1116_v57 = vmul.f32 3.8918573e-05, %v3099_v42  ;;  %v1069_v35 = vmul.f32 %v1068_v6, %v3082_v18 }
 0x479   :  { %v1080_v45 = vmul.f32 %v1079_v27, %v3082_v18  ;;  %v1033_v28 = vmul.f32 %v1032_v10, %v3068_v25 }
 0x47a   :  { %v1045_v31 = vadd.f32 1.0, %v1044_v40  ;;  %v1106_v58 = vadd.f32 0.00028619796, %v1105_v46  ;;  %v1117_v52 = vadd.f32 0.001143296, %v1116_v57 }
 0x47b   :  { %v1081_v30 = vadd.f32 0.112945676, %v1080_v45  ;;  %v1070_v21 = vadd.f32 0.05243302, %v1069_v35  ;;  %v1034_v14 = vadd.f32 1.1283791, %v1033_v28 }
 0x47c   :  { %2426 = vrcp.f32 %v1045_v31  ;;  %v1107_v51 = vmul.f32 %v1106_v58, %v3099_v42  ;;  %v1118_v63 = vmul.f32 %v1117_v52, %v3099_v42  ;;  %v1057_v24 = vand.u32 2147483648, %v1045_v31 }
 0x47d   :  { %v1082_v54 = vmul.f32 %v1081_v30, %v3082_v18  ;;  %2428 = vrcp.f32 %v3113_v61  ;;  %v1071_v47 = vmul.f32 %v1070_v21, %v3082_v18  ;;  %v1055_v25 = vand.u32 2147483647, %v1045_v31 }
 0x47e   :  { %v1119_v19 = vadd.f32 0.014752088, %v1118_v63  ;;  %v1108_v43 = vadd.f32 0.0036580483, %v1107_v51  ;;  %vm1051_vm5 = vweird.f32 %v1045_v31  ;;  %v1058_v34 = vor.u32 1.1754944e-38, %v1057_v24 }
 0x47f   :  { %v1083_v0 = vadd.f32 0.4994258, %v1082_v54  ;;  %v1072_v3 = vadd.f32 0.18741608, %v1071_v47  ;;  %v1035_v59 = vmul.f32 %v1034_v14, %v3063_v60  ;;  %vm1056_vm7 = vcmp.eq.f32.partialorder %v1055_v25, 8.507059e+37 }
 0x480   :  { %v1120_v20 = vmul.f32 %v1119_v19, %v3099_v42  ;;  %v1109_v5 = vmul.f32 %v1108_v43, %v3099_v42  ;;  %v991_v60 = vmul.f32 %v990_v41, %v3057_v33  ;;  %v976_v58 = vmul.f32 0.5, %v3060_v55 }
 0x481   :  { %v1084_v50 = vmul.f32 %v1083_v0, %v3082_v18  ;;  %v1073_v57 = vmul.f32 %v1072_v3, %v3082_v18 }
 0x482   :  { %v2427_v1 = vpop.eup %2426  ;;  %v1121_v29 = vadd.f32 0.112945676, %v1120_v20  ;;  %v1110_v36 = vadd.f32 0.05243302, %v1109_v5  ;;  %v992_v10 = vadd.f32 0.18741608, %v991_v60 }
 0x483   :  { %v1047_v39 = vmul.f32 %v2427_v1, %v1045_v31  ;;  %v1085_v48 = vadd.f32 1.0, %v1084_v50  ;;  %vm1052_vm4 = vweird.f32 %v2427_v1  ;;  %v3123_v32 = vpop.eup %2428  ;;  %v1074_v49 = vadd.f32 1.1283791, %v1073_v57 }
 0x484   :  { %v1122_v13 = vmul.f32 %v1121_v29, %v3099_v42  ;;  %vm1053_vm6 = vmor %vm1051_vm5, %vm1052_vm4  ;;  %v1007_v44 = vmul.f32 %v3123_v32, %v3113_v61  ;;  %v1111_v31 = vmul.f32 %v1110_v36, %v3099_v42  ;;  %v993_v20 = vmul.f32 %v992_v10, %v3057_v33 }
 0x485   :  { %v1048_v9 = vsub.f32 1.0, %v1047_v39  ;;  %2430 = vrcp.f32 %v1085_v48  ;;  %v1097_v30 = vand.u32 2147483648, %v1085_v48  ;;  %v1095_v18 = vand.u32 2147483647, %v1085_v48 }
 0x486   :  { %v1123_v26 = vadd.f32 0.4994258, %v1122_v13  ;;  %v1008_v45 = vsub.f32 1.0, %v1007_v44  ;;  %v1112_v35 = vadd.f32 0.18741608, %v1111_v31  ;;  %vm1091_vm9 = vweird.f32 %v1085_v48 }
 0x487   :  { %v1049_v15 = vmul.f32 %v2427_v1, %v1048_v9  ;;  %v1098_v55 = vor.u32 1.1754944e-38, %v1097_v30  ;;  %vm1096_vm11 = vcmp.eq.f32.partialorder %v1095_v18, 8.507059e+37  ;;  %vm1012_vm13 = vweird.f32 %v3123_v32 }
 0x488   :  { %v1124_v17 = vmul.f32 %v1123_v26, %v3099_v42  ;;  %v1009_v54 = vmul.f32 %v3123_v32, %v1008_v45  ;;  %v1113_v0 = vmul.f32 %v1112_v35, %v3099_v42  ;;  %v1015_v29 = vand.u32 2147483647, %v3113_v61  ;;  %vm1013_vm15 = vmor %vm1011_vm12, %vm1012_vm13 }
 0x489   :  { %v1050_v22 = vadd.f32 %v2427_v1, %v1049_v15  ;;  %v1017_v42 = vand.u32 2147483648, %v3113_v61  ;;  %v994_v33 = vadd.f32 1.1283791, %v993_v20  ;;  %v977_v5 = vmul.f32 0.5, %v3070_v62 }
 0x48a   :  { %v1125_v27 = vadd.f32 1.0, %v1124_v17  ;;  %v1010_v39 = vadd.f32 %v3123_v32, %v1009_v54  ;;  %v1114_v9 = vadd.f32 1.1283791, %v1113_v0  ;;  %vm1016_vm2 = vcmp.eq.f32.partialorder %v1015_v29, 8.507059e+37  ;;  %v2346_v0 = vld [vmem:[%s3669_s2 + $0xb8] sm:$0xff] }
 0x48b   :  { %v1054_v38 = vsel %vm1053_vm6, %v2427_v1, %v1050_v22  ;;  %v2431_v46 = vpop.eup %2430  ;;  %v1075_v1 = vmul.f32 %v1074_v49, %v3075_v23  ;;  %v1018_v25 = vor.u32 1.1754944e-38, %v1017_v42  ;;  %v995_v36 = vmul.f32 %v994_v33, %v3053_v37 }
 0x48c   :  { %v1059_v53 = vsel %vm1056_vm7, %v1058_v34, %v1054_v38  ;;  %v1087_v12 = vmul.f32 %v2431_v46, %v1085_v48  ;;  %2432 = vrcp.f32 %v1125_v27  ;;  %vm1092_vm8 = vweird.f32 %v2431_v46 }
 0x48d   :  { %v1060_v40 = vmul.f32 %v1059_v53, %v1035_v59  ;;  %vm1093_vm10 = vmor %vm1091_vm9, %vm1092_vm8  ;;  %v1137_v23 = vand.u32 2147483648, %v1125_v27  ;;  %v1135_v48 = vand.u32 2147483647, %v1125_v27  ;;  %v1014_v13 = vsel %vm1013_vm15, %v3123_v32, %v1010_v39 }
 0x48e   :  { %v1088_v2 = vsub.f32 1.0, %v1087_v12  ;;  %vm1131_vm1 = vweird.f32 %v1125_v27  ;;  %v1115_v26 = vmul.f32 %v1114_v9, %v3090_v7  ;;  %v1019_v3 = vsel %vm1016_vm2, %v1018_v25, %v1014_v13  ;;  %v2327_v25 = vld [vmem:[%s3669_s2 + $0x80] sm:$0xff] }
 0x48f   :  { %v2320_v6 = vclamps-f32 %v1060_v40, 1.0  ;;  %v1138_v16 = vor.u32 1.1754944e-38, %v1137_v23  ;;  %vm1136_vm5 = vcmp.eq.f32.partialorder %v1135_v48, 8.507059e+37  ;;  %v1020_v32 = vmul.f32 %v1019_v3, %v995_v36 }
 0x490   :  { %v1089_v63 = vmul.f32 %v2431_v46, %v1088_v2  ;;  %v978_v38 = vmul.f32 0.5, %v3084_v11  ;;  %v975_v44 = vmul.f32 0.5, %v3050_v4 }
 0x491   :  { %v1144_v52 = vadd.f32 1.0, %v2320_v6  ;;  %v2319_v41 = vclamps-f32 %v1020_v32, 1.0 }
 0x492   :  { %v1090_v56 = vadd.f32 %v2431_v46, %v1089_v63  ;;  %v2433_v19 = vpop.eup %2432 }
 0x493   :  { %v3133_v51 = vmul.f32 %v1144_v52, %v976_v58  ;;  %v1127_v43 = vmul.f32 %v2433_v19, %v1125_v27  ;;  %vm1132_vm14 = vweird.f32 %v2433_v19  ;;  %v1143_v7 = vadd.f32 1.0, %v2319_v41 }
 0x494   :  { %v1094_v21 = vsel %vm1093_vm10, %v2431_v46, %v1090_v56  ;;  %vm1133_vm4 = vmor %vm1131_vm1, %vm1132_vm14 }
 0x495   :  { %1158 = vperm.xlu2 %2393, %v3133_v51   ;;  %v1099_v28 = vsel %vm1096_vm11, %v1098_v55, %v1094_v21  ;;  %v1128_v50 = vsub.f32 1.0, %v1127_v43  ;;  %v3159_v40 = vmul.f32 %v1143_v7, %v975_v44  ;;  %v2329_v55 = vld [vmem:[%s3669_s2 + $0x90] sm:$0xff] }
 0x496   :  { %v1100_v8 = vmul.f32 %v1099_v28, %v1075_v1  ;;  %v2343_v1 = vld [vmem:[%s3669_s2 + $0xa0] sm:$0xff] }
 0x497   :  { %v1129_v47 = vmul.f32 %v2433_v19, %v1128_v50 }
 0x498   :  { %v2321_v24 = vclamps-f32 %v1100_v8, 1.0 }
 0x499   :  { %v1130_v15 = vadd.f32 %v2433_v19, %v1129_v47 }
 0x49a   :  { %v1145_v14 = vadd.f32 1.0, %v2321_v24 }
 0x49b   :  { %v1134_v34 = vsel %vm1133_vm4, %v2433_v19, %v1130_v15  ;;  %v2328_v15 = vld [vmem:[%s3669_s2 + $0x88] sm:$0xff] }
 0x49c   :  { %v3149_v22 = vmul.f32 %v1145_v14, %v977_v5  ;;  %v1139_v61 = vsel %vm1136_vm5, %v1138_v16, %v1134_v34  ;;  %v2330_v14 = vld [vmem:[%s3669_s2 + $0x98] sm:$0xff]  ;;  %v2345_v16 = vld [vmem:[%s3669_s2 + $0xb0] sm:$0xff] }
 0x49d   :  { %v1140_v62 = vmul.f32 %v1139_v61, %v1115_v26  ;;  %v2344_v26 = vld [vmem:[%s3669_s2 + $0xa8] sm:$0xff] }
 0x49e   :  { %1163 = vperm.xlu0 %2391, %v3149_v22  }
 0x49f   :  { %v2322_v59 = vclamps-f32 %v1140_v62, 1.0 }
 0x4a1   :  { %v1146_v17 = vadd.f32 1.0, %v2322_v59 }
 0x4a3   :  { %v3155_v53 = vmul.f32 %v1146_v17, %v978_v38 }
 0x4a5   :  { %1168 = vperm.xlu1 %2392, %v3155_v53  }
 0x4ad   :  { %1153 = vperm.xlu1 %2392, %v3159_v40  }
 0x4ef   :  { %v1159_v37 = vpop.permute.xlu2 %1158 }
 0x4f0   :  { %v1172_v27 = vsub.f32 %v3133_v51, %v1159_v37 }
 0x4f2   :  { %v1178_v46 = vsel %vm536_vm3, %v1172_v27, 0.0  ;;  %v1192_v2 = vmul.f32 %v1172_v27, %v1172_v27 }
 0x4f3   :  { %1179 = vadd.xlane.f32.xlu1 %v1178_v46 }
 0x4f4   :  { %v1198_v49 = vsel %vm536_vm3, %v1192_v2, 0.0 }
 0x510   :  { %v1164_v11 = vpop.permute.xlu0 %1163 }
 0x511   :  { %v1173_v57 = vsub.f32 %v3149_v22, %v1164_v11 }
 0x513   :  { %v1193_v31 = vmul.f32 %v1173_v57, %v1173_v57  ;;  %v1181_v35 = vsel %vm536_vm3, %v1173_v57, 0.0 }
 0x515   :  { %v1201_v6 = vsel %vm536_vm3, %v1193_v31, 0.0 }
 0x516   :  { %1202 = vadd.xlane.f32.xlu1 %v1201_v6 }
 0x517   :  { %v1169_v12 = vpop.permute.xlu1 %1168 }
 0x518   :  { %v1174_v30 = vsub.f32 %v3155_v53, %v1169_v12 }
 0x51a   :  { %v1194_v63 = vmul.f32 %v1174_v30, %v1174_v30  ;;  %v1184_v18 = vsel %vm536_vm3, %v1174_v30, 0.0 }
 0x51c   :  { %v1204_v10 = vsel %vm536_vm3, %v1194_v63, 0.0 }
 0x51f   :  { %v1154_v60 = vpop.permute.xlu1 %1153 }
 0x520   :  { %v1171_v4 = vsub.f32 %v3159_v40, %v1154_v60 }
 0x522   :  { %v1175_v45 = vsel %vm536_vm3, %v1171_v4, 0.0  ;;  %v1191_v58 = vmul.f32 %v1171_v4, %v1171_v4 }
 0x523   :  { %1176 = vadd.xlane.f32.xlu0 %v1175_v45 }
 0x524   :  { %v1195_v52 = vsel %vm536_vm3, %v1191_v58, 0.0 }
 0x525   :  { %1196 = vadd.xlane.f32.xlu2 %v1195_v52 }
 0x52b   :  { %1199 = vadd.xlane.f32.xlu0 %v1198_v49 }
 0x52d   :  { %1182 = vadd.xlane.f32.xlu2 %v1181_v35 }
 0x533   :  { %1185 = vadd.xlane.f32.xlu0 %v1184_v18 }
 0x535   :  { %1205 = vadd.xlane.f32.xlu2 %v1204_v10 }
 0x566   :  { %v1180_v54 = vpop.xlane.xlu1 %1179 }
 0x567   :  { %v1188_v56 = vmul.f32 0.0625, %v1180_v54 }
 0x569   :  { %v1212_v19 = vadd.f32 %v1188_v56, %v3133_v51  ;;  %v1216_v29 = vmul.f32 %v1188_v56, %v1188_v56 }
 0x56b   :  { %1230 = vperm.xlu2 %2393, %v1212_v19  }
 0x573   :  { %1317 = vperm.xlu2 %2393, %v2329_v55  }
 0x57b   :  { %1569 = vperm.xlu2 %2393, %v2346_v0  }
 0x583   :  { %1554 = vperm.xlu2 %2393, %v2343_v1  }
 0x589   :  { %v1203_v36 = vpop.xlane.xlu1 %1202 }
 0x58a   :  { %v1209_v32 = vmul.f32 0.0625, %v1203_v36 }
 0x596   :  { %v1177_v21 = vpop.xlane.xlu0 %1176 }
 0x597   :  { %v1187_v43 = vmul.f32 0.0625, %v1177_v21 }
 0x598   :  { %v1197_v20 = vpop.xlane.xlu2 %1196 }
 0x599   :  { %v1215_v28 = vmul.f32 %v1187_v43, %v1187_v43  ;;  %v1207_v39 = vmul.f32 0.0625, %v1197_v20  ;;  %v1211_v13 = vadd.f32 %v1187_v43, %v3159_v40 }
 0x59b   :  { %v1219_v8 = vsub.f32 %v1207_v39, %v1215_v28 }
 0x59d   :  { %v1247_v44 = vadd.f32 1e-05, %v1219_v8 }
 0x59e   :  { %v1200_v50 = vpop.xlane.xlu0 %1199 }
 0x59f   :  { %v1208_v42 = vmul.f32 0.0625, %v1200_v50  ;;  %vm1257_vm1 = vweird.f32 %v1247_v44 }
 0x5a0   :  { %v1183_v9 = vpop.xlane.xlu2 %1182 }
 0x5a1   :  { %v1220_v23 = vsub.f32 %v1208_v42, %v1216_v29  ;;  %v1189_v24 = vmul.f32 0.0625, %v1183_v9 }
 0x5a3   :  { %v1213_v47 = vadd.f32 %v1189_v24, %v3149_v22  ;;  %v1217_v62 = vmul.f32 %v1189_v24, %v1189_v24  ;;  %v1248_v7 = vadd.f32 1e-05, %v1220_v23 }
 0x5a5   :  { %1235 = vperm.xlu0 %2391, %v1213_v47   ;;  %v1221_v38 = vsub.f32 %v1209_v32, %v1217_v62  ;;  %vm1267_vm13 = vweird.f32 %v1248_v7  ;;  %v2325_v47 = vld [vmem:[%s3668_s1 + $0x90] sm:$0xff] }
 0x5a6   :  { %v1186_v48 = vpop.xlane.xlu0 %1185 }
 0x5a7   :  { %v1190_v33 = vmul.f32 0.0625, %v1186_v48  ;;  %v1249_v41 = vadd.f32 1e-05, %v1221_v38  ;;  %v2326_v48 = vld [vmem:[%s3668_s1 + $0x98] sm:$0xff] }
 0x5a8   :  { %v1206_v34 = vpop.xlane.xlu2 %1205 }
 0x5a9   :  { %v1214_v5 = vadd.f32 %v1190_v33, %v3155_v53  ;;  %v1218_v3 = vmul.f32 %v1190_v33, %v1190_v33  ;;  %v1210_v61 = vmul.f32 0.0625, %v1206_v34  ;;  %vm1277_vm11 = vweird.f32 %v1249_v41 }
 0x5ab   :  { %1240 = vperm.xlu1 %2392, %v1214_v5   ;;  %v1222_v59 = vsub.f32 %v1210_v61, %v1218_v3 }
 0x5ad   :  { %1225 = vperm.xlu0 %2391, %v1211_v13   ;;  %v1250_v17 = vadd.f32 1e-05, %v1222_v59 }
 0x5af   :  { %2434 = vrsqrt.f32 %v1250_v17  ;;  %vm1287_vm8 = vweird.f32 %v1250_v17 }
 0x5b0   :  { %2436 = vrsqrt.f32 %v1249_v41 }
 0x5b1   :  { %2438 = vrsqrt.f32 %v1248_v7 }
 0x5b2   :  { %2440 = vrsqrt.f32 %v1247_v44 }
 0x5b3   :  { %1322 = vperm.xlu1 %2392, %v2330_v14  }
 0x5b5   :  { %1312 = vperm.xlu0 %2391, %v2328_v15   ;;  %v2435_v37 = vpop.eup %2434 }
 0x5b6   :  { %v2437_v27 = vpop.eup %2436  ;;  %v1282_v46 = vmul.f32 %v2435_v37, %v1250_v17  ;;  %vm1288_vm6 = vweird.f32 %v2435_v37 }
 0x5b7   :  { %v2439_v11 = vpop.eup %2438  ;;  %v1272_v57 = vmul.f32 %v2437_v27, %v1249_v41  ;;  %vm1278_vm7 = vweird.f32 %v2437_v27  ;;  %vm1289_vm9 = vmor %vm1287_vm8, %vm1288_vm6 }
 0x5b8   :  { %v2441_v31 = vpop.eup %2440  ;;  %v1262_v6 = vmul.f32 %v2439_v11, %v1248_v7  ;;  %v1283_v12 = vmul.f32 %v2435_v37, %v1282_v46  ;;  %vm1268_vm10 = vweird.f32 %v2439_v11  ;;  %vm1279_vm12 = vmor %vm1277_vm11, %vm1278_vm7 }
 0x5b9   :  { %v1252_v60 = vmul.f32 %v2441_v31, %v1247_v44  ;;  %v1273_v4 = vmul.f32 %v2437_v27, %v1272_v57  ;;  %vm1258_vm14 = vweird.f32 %v2441_v31  ;;  %vm1269_vm15 = vmor %vm1267_vm13, %vm1268_vm10 }
 0x5ba   :  { %v1263_v45 = vmul.f32 %v2439_v11, %v1262_v6  ;;  %v1284_v58 = vmul.f32 0.5, %v1283_v12  ;;  %vm1259_vm2 = vmor %vm1257_vm1, %vm1258_vm14 }
 0x5bb   :  { %1307 = vperm.xlu1 %2392, %v2327_v25   ;;  %v1253_v52 = vmul.f32 %v2441_v31, %v1252_v60  ;;  %v1274_v2 = vmul.f32 0.5, %v1273_v4 }
 0x5bc   :  { %v1264_v49 = vmul.f32 0.5, %v1263_v45  ;;  %v1285_v35 = vsub.f32 1.5, %v1284_v58 }
 0x5bd   :  { %1564 = vperm.xlu0 %2391, %v2345_v16   ;;  %v1254_v63 = vmul.f32 0.5, %v1253_v52  ;;  %v1275_v18 = vsub.f32 1.5, %v1274_v2 }
 0x5be   :  { %v1265_v10 = vsub.f32 1.5, %v1264_v49  ;;  %v1286_v54 = vmul.f32 %v2435_v37, %v1285_v35 }
 0x5bf   :  { %v1276_v19 = vmul.f32 %v2437_v27, %v1275_v18  ;;  %v1255_v0 = vsub.f32 1.5, %v1254_v63 }
 0x5c0   :  { %v1266_v43 = vmul.f32 %v2439_v11, %v1265_v10  ;;  %v1290_v20 = vsel %vm1289_vm9, %v2435_v37, %v1286_v54 }
 0x5c1   :  { %v1280_v50 = vsel %vm1279_vm12, %v2437_v27, %v1276_v19  ;;  %v1256_v29 = vmul.f32 %v2441_v31, %v1255_v0 }
 0x5c3   :  { %1559 = vperm.xlu1 %2392, %v2344_v26   ;;  %v1260_v23 = vsel %vm1259_vm2, %v2441_v31, %v1256_v29 }
 0x5c5   :  { %v1231_v56 = vpop.permute.xlu2 %1230 }
 0x5c6   :  { %v1244_v39 = vsub.f32 %v3133_v51, %v1231_v56  ;;  %v2323_v51 = vld [vmem:[%s3668_s1 + $0x80] sm:$0xff] }
 0x5cd   :  { %v1318_v17 = vpop.permute.xlu2 %1317 }
 0x617   :  { %v1236_v30 = vpop.permute.xlu0 %1235 }
 0x618   :  { %v1245_v1 = vsub.f32 %v3149_v22, %v1236_v30 }
 0x61a   :  { %v1293_v42 = vmul.f32 %v1280_v50, %v1245_v1 }
 0x61d   :  { %v1241_v55 = vpop.permute.xlu1 %1240 }
 0x61e   :  { %v1246_v21 = vsub.f32 %v3155_v53, %v1241_v55  ;;  %v1270_v53 = vsel %vm1269_vm15, %v2439_v11, %v1266_v43 }
 0x61f   :  { %v1226_v28 = vpop.permute.xlu0 %1225  ;;  %v1292_v9 = vmul.f32 %v1270_v53, %v1244_v39 }
 0x620   :  { %v1294_v8 = vmul.f32 %v1290_v20, %v1246_v21  ;;  %v1243_v22 = vsub.f32 %v3159_v40, %v1226_v28  ;;  %v2324_v40 = vld [vmem:[%s3668_s1 + $0x88] sm:$0xff] }
 0x622   :  { %1349 = vmatpush.msrb.mxu0 %v1294_v8  ;;  %v1291_v24 = vmul.f32 %v1260_v23, %v1243_v22 }
 0x624   :  { %1350 = vmatpush.msrb.mxu0 %v1293_v42 }
 0x625   :  { %v1323_v33 = vpop.permute.xlu1 %1322 }
 0x626   :  { %1351 = vmatpush.msrb.mxu0 %v1292_v9 }
 0x627   :  { %v1313_v26 = vpop.permute.xlu0 %1312 }
 0x628   :  { %1352 = vmatpush.msrb.mxu0 %v1291_v24 }
 0x629   :  { %2331 = vmatmul.msk.f32.vlgmr.msrb.gmra.mxu0 %vm47_vm0, %v2323_v51 }
 0x62d   :  { %v1308_v5 = vpop.permute.xlu1 %1307 }
 0x631   :  { %2332 = vmatmul.msk.f32.gmra.mxu0 %vm47_vm0, %v2324_v40 }
 0x639   :  { %2333 = vmatmul.msk.f32.gmra.mxu0 %vm47_vm0, %v2325_v47 }
 0x641   :  { %2334 = vmatmul.msk.f32.gmra.mxu0 %vm47_vm0, %v2326_v48 }
 0x6a6   :  { %v1354_v13 = vpop.f32.mrf.mxu0 }
 0x6a7   :  { %v3222_v14 = vadd.f32 %v1354_v13, %v1308_v5 }
 0x6a9   :  { %v3225_v15 = vmul.f32 0.70710677, %v3222_v14 }
 0x6ab   :  { %v1374_v25 = vmul.f32 %v3225_v15, %v3225_v15 }
 0x6ad   :  { %v3229_v16 = vmin.f32 %v1374_v25, 16.0 }
 0x6ae   :  { %v1357_v34 = vpop.f32.mrf.mxu0 }
 0x6af   :  { %v3231_v3 = vadd.f32 %v1357_v34, %v1313_v26  ;;  %v1387_v61 = vmul.f32 3.8918573e-05, %v3229_v16  ;;  %v1376_v46 = vmul.f32 2.1237322e-06, %v3229_v16 }
 0x6b1   :  { %v3235_v36 = vmul.f32 0.70710677, %v3231_v3  ;;  %v1388_v62 = vadd.f32 0.001143296, %v1387_v61  ;;  %v1377_v4 = vadd.f32 0.00028619796, %v1376_v46 }
 0x6b3   :  { %v1414_v32 = vmul.f32 %v3235_v36, %v3235_v36  ;;  %v1389_v59 = vmul.f32 %v1388_v62, %v3229_v16  ;;  %v1378_v10 = vmul.f32 %v1377_v4, %v3229_v16 }
 0x6b5   :  { %v3240_v38 = vmin.f32 %v1414_v32, 16.0  ;;  %v1390_v7 = vadd.f32 0.014752088, %v1389_v59  ;;  %v1379_v20 = vadd.f32 0.0036580483, %v1378_v10 }
 0x6b6   :  { %v1360_v41 = vpop.f32.mrf.mxu0 }
 0x6b7   :  { %v3242_v44 = vadd.f32 %v1360_v41, %v1318_v17  ;;  %v1427_v37 = vmul.f32 3.8918573e-05, %v3240_v38  ;;  %v1391_v27 = vmul.f32 %v1390_v7, %v3229_v16  ;;  %v1416_v2 = vmul.f32 2.1237322e-06, %v3240_v38 }
 0x6b8   :  { %v1380_v24 = vmul.f32 %v1379_v20, %v3229_v16 }
 0x6b9   :  { %v3248_v11 = vmul.f32 0.70710677, %v3242_v44  ;;  %v1428_v57 = vadd.f32 0.001143296, %v1427_v37  ;;  %v1392_v31 = vadd.f32 0.112945676, %v1391_v27 }
 0x6ba   :  { %v1417_v55 = vadd.f32 0.00028619796, %v1416_v2  ;;  %v1381_v34 = vadd.f32 0.05243302, %v1380_v24 }
 0x6bb   :  { %v1454_v6 = vmul.f32 %v3248_v11, %v3248_v11  ;;  %v1429_v12 = vmul.f32 %v1428_v57, %v3240_v38  ;;  %v1393_v60 = vmul.f32 %v1392_v31, %v3229_v16 }
 0x6bc   :  { %v1418_v29 = vmul.f32 %v1417_v55, %v3240_v38  ;;  %v1382_v37 = vmul.f32 %v1381_v34, %v3229_v16 }
 0x6bd   :  { %v3254_v45 = vmin.f32 %v1454_v6, 16.0  ;;  %v1430_v52 = vadd.f32 0.014752088, %v1429_v12  ;;  %v1394_v18 = vadd.f32 0.4994258, %v1393_v60 }
 0x6be   :  { %v1363_v58 = vpop.f32.mrf.mxu0 }
 0x6bf   :  { %v3257_v49 = vadd.f32 %v1363_v58, %v1323_v33  ;;  %v1456_v30 = vmul.f32 2.1237322e-06, %v3254_v45  ;;  %v1467_v35 = vmul.f32 3.8918573e-05, %v3254_v45  ;;  %v1431_v63 = vmul.f32 %v1430_v52, %v3240_v38 }
 0x6c0   :  { %v1395_v43 = vmul.f32 %v1394_v18, %v3229_v16  ;;  %v1419_v33 = vadd.f32 0.0036580483, %v1418_v29  ;;  %v1383_v52 = vadd.f32 0.18741608, %v1382_v37 }
 0x6c1   :  { %v1457_v54 = vadd.f32 0.00028619796, %v1456_v30  ;;  %v3264_v56 = vmul.f32 0.70710677, %v3257_v49  ;;  %v1468_v19 = vadd.f32 0.001143296, %v1467_v35 }
 0x6c2   :  { %v1432_v0 = vadd.f32 0.112945676, %v1431_v63  ;;  %v3278_v23 = vadd.f32 1.0, %v1395_v43  ;;  %v1420_v59 = vmul.f32 %v1419_v33, %v3240_v38 }
 0x6c3   :  { %v1494_v1 = vmul.f32 %v3264_v56, %v3264_v56  ;;  %v1469_v21 = vmul.f32 %v1468_v19, %v3254_v45  ;;  %v1458_v39 = vmul.f32 %v1457_v54, %v3254_v45  ;;  %v1384_v19 = vmul.f32 %v1383_v52, %v3229_v16 }
 0x6c4   :  { %v1433_v28 = vmul.f32 %v1432_v0, %v3240_v38  ;;  %2442 = vrcp.f32 %v3278_v23  ;;  %v1421_v12 = vadd.f32 0.05243302, %v1420_v59  ;;  %vm1402_vm4 = vweird.f32 %v3278_v23 }
 0x6c5   :  { %v3272_v8 = vmin.f32 %v1494_v1, 16.0  ;;  %v1470_v50 = vadd.f32 0.014752088, %v1469_v21  ;;  %v1459_v40 = vadd.f32 0.0036580483, %v1458_v39  ;;  %v1408_v16 = vand.u32 2147483648, %v3278_v23 }
 0x6c6   :  { %v1434_v42 = vadd.f32 0.4994258, %v1433_v28  ;;  %v1422_v18 = vmul.f32 %v1421_v12, %v3240_v38  ;;  %v1385_v39 = vadd.f32 1.1283791, %v1384_v19 }
 0x6c7   :  { %v1496_v22 = vmul.f32 2.1237322e-06, %v3272_v8  ;;  %v1507_v53 = vmul.f32 3.8918573e-05, %v3272_v8  ;;  %v1471_v9 = vmul.f32 %v1470_v50, %v3254_v45  ;;  %v1460_v62 = vmul.f32 %v1459_v40, %v3254_v45 }
 0x6c8   :  { %v1435_v51 = vmul.f32 %v1434_v42, %v3240_v38  ;;  %v1423_v20 = vadd.f32 0.18741608, %v1422_v18 }
 0x6c9   :  { %v1497_v47 = vadd.f32 0.00028619796, %v1496_v22  ;;  %v1508_v48 = vadd.f32 0.001143296, %v1507_v53  ;;  %v1472_v5 = vadd.f32 0.112945676, %v1471_v9 }
 0x6ca   :  { %v3282_v13 = vadd.f32 1.0, %v1435_v51  ;;  %v3294_v46 = vpop.eup %2442  ;;  %v1461_v57 = vadd.f32 0.05243302, %v1460_v62  ;;  %v1424_v53 = vmul.f32 %v1423_v20, %v3240_v38  ;;  %v1406_v51 = vand.u32 2147483647, %v3278_v23 }
 0x6cb   :  { %v1498_v25 = vmul.f32 %v1497_v47, %v3272_v8  ;;  %v1509_v26 = vmul.f32 %v1508_v48, %v3272_v8  ;;  %v1473_v61 = vmul.f32 %v1472_v5, %v3254_v45  ;;  %v1398_v63 = vmul.f32 %v3294_v46, %v3278_v23 }
 0x6cc   :  { %2444 = vrcp.f32 %v3282_v13  ;;  %v1462_v30 = vmul.f32 %v1461_v57, %v3254_v45  ;;  %v1446_v47 = vand.u32 2147483647, %v3282_v13  ;;  %v1448_v48 = vand.u32 2147483648, %v3282_v13 }
 0x6cd   :  { %v1510_v32 = vadd.f32 0.014752088, %v1509_v26  ;;  %v1499_v17 = vadd.f32 0.0036580483, %v1498_v25  ;;  %v1474_v41 = vadd.f32 0.4994258, %v1473_v61  ;;  %vm1442_vm7 = vweird.f32 %v3282_v13 }
 0x6ce   :  { %v1463_v0 = vadd.f32 0.18741608, %v1462_v30  ;;  %v1399_v21 = vsub.f32 1.0, %v1398_v63  ;;  %vm1403_vm8 = vweird.f32 %v3294_v46  ;;  %v1425_v59 = vadd.f32 1.1283791, %v1424_v53 }
 0x6cf   :  { %v1511_v7 = vmul.f32 %v1510_v32, %v3272_v8  ;;  %v1475_v27 = vmul.f32 %v1474_v41, %v3254_v45  ;;  %v1500_v60 = vmul.f32 %v1499_v17, %v3272_v8  ;;  %vm1447_vm12 = vcmp.eq.f32.partialorder %v1446_v47, 8.507059e+37  ;;  %vm3341_vm14 = vmor %vm1402_vm4, %vm1403_vm8  ;;  %v1565_v32 = vpop.permute.xlu0 %1564 }
 0x6d0   :  { %v1464_v42 = vmul.f32 %v1463_v0, %v3254_v45  ;;  %v1400_v22 = vmul.f32 %v3294_v46, %v1399_v21  ;;  %vm1407_vm1 = vcmp.eq.f32.partialorder %v1406_v51, 8.507059e+37  ;;  %v1409_v23 = vor.u32 1.1754944e-38, %v1408_v16 }
 0x6d1   :  { %v1512_v31 = vadd.f32 0.112945676, %v1511_v7  ;;  %v1476_v4 = vadd.f32 1.0, %v1475_v27  ;;  %v1501_v10 = vadd.f32 0.05243302, %v1500_v60  ;;  %v1426_v52 = vmul.f32 %v1425_v59, %v3235_v36 }
 0x6d2   :  { %v3296_v6 = vpop.eup %2444  ;;  %v1465_v26 = vadd.f32 1.1283791, %v1464_v42  ;;  %v1401_v38 = vadd.f32 %v3294_v46, %v1400_v22  ;;  %v1386_v30 = vmul.f32 %v1385_v39, %v3225_v15  ;;  %v1368_v15 = vmul.f32 0.5, %v3242_v44  ;;  %v2342_v44 = vld [vmem:[%s3668_s1 + $0xb8] sm:$0xff] }
 0x6d3   :  { %v1513_v58 = vmul.f32 %v1512_v31, %v3272_v8  ;;  %2446 = vrcp.f32 %v1476_v4  ;;  %v1438_v2 = vmul.f32 %v3296_v6, %v3282_v13  ;;  %v1502_v28 = vmul.f32 %v1501_v10, %v3272_v8 }
 0x6d4   :  { %v1488_v40 = vand.u32 2147483648, %v1476_v4  ;;  %vm1443_vm5 = vweird.f32 %v3296_v6  ;;  %v1486_v33 = vand.u32 2147483647, %v1476_v4  ;;  %vm1482_vm9 = vweird.f32 %v1476_v4 }
 0x6d5   :  { %v1514_v35 = vadd.f32 0.4994258, %v1513_v58  ;;  %v1439_v55 = vsub.f32 1.0, %v1438_v2  ;;  %v1503_v9 = vadd.f32 0.18741608, %v1502_v28  ;;  %vm3330_vm10 = vmor %vm1442_vm7, %vm1443_vm5  ;;  %v1449_v13 = vor.u32 1.1754944e-38, %v1448_v48 }
 0x6d6   :  { %v1489_v17 = vor.u32 1.1754944e-38, %v1488_v40  ;;  %vm1487_vm13 = vcmp.eq.f32.partialorder %v1486_v33, 8.507059e+37  ;;  %v1466_v27 = vmul.f32 %v1465_v26, %v3248_v11  ;;  %v1405_v12 = vsel %vm3341_vm14, %v3294_v46, %v1401_v38  ;;  %v1560_v33 = vpop.permute.xlu1 %1559 }
 0x6d7   :  { %v1515_v54 = vmul.f32 %v1514_v35, %v3272_v8  ;;  %v1440_v29 = vmul.f32 %v3296_v6, %v1439_v55  ;;  %v1504_v34 = vmul.f32 %v1503_v9, %v3272_v8  ;;  %v1410_v63 = vsel %vm1407_vm1, %v1409_v23, %v1405_v12  ;;  %v1570_v9 = vpop.permute.xlu2 %1569 }
 0x6d8   :  { %v1411_v0 = vmul.f32 %v1410_v63, %v1386_v30  ;;  %v1366_v22 = vmul.f32 0.5, %v3222_v14  ;;  %v2341_v14 = vld [vmem:[%s3668_s1 + $0xb0] sm:$0xff] }
 0x6d9   :  { %v3308_v1 = vadd.f32 1.0, %v1515_v54  ;;  %v2447_v43 = vpop.eup %2446  ;;  %v1441_v5 = vadd.f32 %v3296_v6, %v1440_v29  ;;  %v1505_v60 = vadd.f32 1.1283791, %v1504_v34 }
 0x6da   :  { %v1478_v50 = vmul.f32 %v2447_v43, %v1476_v4  ;;  %vm1483_vm6 = vweird.f32 %v2447_v43  ;;  %v2335_v28 = vclamps-f32 %v1411_v0, 1.0 }
 0x6db   :  { %2448 = vrcp.f32 %v3308_v1  ;;  %vm1484_vm11 = vmor %vm1482_vm9, %vm1483_vm6  ;;  %v1445_v8 = vsel %vm3330_vm10, %v3296_v6, %v1441_v5  ;;  %v1528_v57 = vand.u32 2147483648, %v3308_v1  ;;  %v1526_v6 = vand.u32 2147483647, %v3308_v1 }
 0x6dc   :  { %v1479_v24 = vsub.f32 1.0, %v1478_v50  ;;  %v1450_v58 = vsel %vm1447_vm12, %v1449_v13, %v1445_v8  ;;  %vm1522_vm2 = vweird.f32 %v3308_v1  ;;  %v1506_v46 = vmul.f32 %v1505_v60, %v3264_v56 }
 0x6dd   :  { %v1529_v35 = vor.u32 1.1754944e-38, %v1528_v57  ;;  %vm1527_vm5 = vcmp.eq.f32.partialorder %v1526_v6, 8.507059e+37  ;;  %v1451_v10 = vmul.f32 %v1450_v58, %v1426_v52  ;;  %v1367_v56 = vmul.f32 0.5, %v3231_v3  ;;  %v2340_v3 = vld [vmem:[%s3668_s1 + $0xa8] sm:$0xff] }
 0x6de   :  { %v1480_v45 = vmul.f32 %v2447_v43, %v1479_v24  ;;  %v1534_v42 = vadd.f32 1.0, %v2335_v28 }
 0x6df   :  { %v2336_v36 = vclamps-f32 %v1451_v10, 1.0  ;;  %v1555_v24 = vpop.permute.xlu2 %1554 }
 0x6e0   :  { %v1481_v62 = vadd.f32 %v2447_v43, %v1480_v45  ;;  %v1538_v53 = vmul.f32 %v1534_v42, %v1366_v22 }
 0x6e1   :  { %v2449_v25 = vpop.eup %2448  ;;  %v1535_v50 = vadd.f32 1.0, %v2336_v36 }
 0x6e2   :  { %v1518_v61 = vmul.f32 %v2449_v25, %v3308_v1  ;;  %v1485_v7 = vsel %vm1484_vm11, %v2447_v43, %v1481_v62  ;;  %vm1523_vm15 = vweird.f32 %v2449_v25  ;;  %v1369_v43 = vmul.f32 0.5, %v3257_v49  ;;  %v2339_v49 = vld [vmem:[%s3668_s1 + $0xa0] sm:$0xff] }
 0x6e3   :  { %v1490_v31 = vsel %vm1487_vm13, %v1489_v17, %v1485_v7  ;;  %vm1524_vm4 = vmor %vm1522_vm2, %vm1523_vm15  ;;  %v1539_v16 = vmul.f32 %v1535_v50, %v1367_v56 }
 0x6e4   :  { %v1519_v41 = vsub.f32 1.0, %v1518_v61  ;;  %v1491_v11 = vmul.f32 %v1490_v31, %v1466_v27 }
 0x6e6   :  { %v1520_v4 = vmul.f32 %v2449_v25, %v1519_v41  ;;  %v2337_v55 = vclamps-f32 %v1491_v11, 1.0 }
 0x6e8   :  { %v1521_v2 = vadd.f32 %v2449_v25, %v1520_v4  ;;  %v1536_v20 = vadd.f32 1.0, %v2337_v55 }
 0x6ea   :  { %v1525_v18 = vsel %vm1524_vm4, %v2449_v25, %v1521_v2  ;;  %v1540_v29 = vmul.f32 %v1536_v20, %v1368_v15 }
 0x6eb   :  { %v1530_v54 = vsel %vm1527_vm5, %v1529_v35, %v1525_v18 }
 0x6ec   :  { %v1531_v19 = vmul.f32 %v1530_v54, %v1506_v46 }
 0x6ee   :  { %v2338_v21 = vclamps-f32 %v1531_v19, 1.0 }
 0x6f0   :  { %v1537_v1 = vadd.f32 1.0, %v2338_v21 }
 0x6f2   :  { %v1541_v39 = vmul.f32 %v1537_v1, %v1369_v43 }
 0x6f4   :  { %1596 = vmatpush.msrb.mxu1 %v1541_v39 }
 0x6f6   :  { %1597 = vmatpush.msrb.mxu1 %v1540_v29 }
 0x6f8   :  { %1598 = vmatpush.msrb.mxu1 %v1539_v16 }
 0x6fa   :  { %1599 = vmatpush.msrb.mxu1 %v1538_v53 }
 0x6fb   :  { %2347 = vmatmul.msk.f32.vlgmr.msrb.gmra.mxu1 %vm47_vm0, %v2339_v49 }
 0x703   :  { %2348 = vmatmul.msk.f32.gmra.mxu1 %vm47_vm0, %v2340_v3 }
 0x70b   :  { %2349 = vmatmul.msk.f32.gmra.mxu1 %vm47_vm0, %v2341_v14 }
 0x713   :  { %2350 = vmatmul.msk.f32.gmra.mxu1 %vm47_vm0, %v2342_v44 }
 0x778   :  { %v1601_v51 = vpop.f32.mrf.mxu1 }
 0x779   :  { %v3375_v40 = vadd.f32 %v1601_v51, %v1555_v24 }
 0x77b   :  { %v3378_v47 = vmul.f32 0.70710677, %v3375_v40 }
 0x77d   :  { %v1621_v48 = vmul.f32 %v3378_v47, %v3378_v47 }
 0x77f   :  { %v3382_v45 = vmin.f32 %v1621_v48, 16.0 }
 0x780   :  { %v1604_v5 = vpop.f32.mrf.mxu1 }
 0x781   :  { %v1634_v25 = vmul.f32 3.8918573e-05, %v3382_v45  ;;  %v3385_v26 = vadd.f32 %v1604_v5, %v1560_v33  ;;  %v1623_v15 = vmul.f32 2.1237322e-06, %v3382_v45 }
 0x783   :  { %v1635_v38 = vadd.f32 0.001143296, %v1634_v25  ;;  %v3388_v34 = vmul.f32 0.70710677, %v3385_v26  ;;  %v1624_v44 = vadd.f32 0.00028619796, %v1623_v15 }
 0x785   :  { %v1636_v61 = vmul.f32 %v1635_v38, %v3382_v45  ;;  %v1661_v62 = vmul.f32 %v3388_v34, %v3388_v34  ;;  %v1625_v38 = vmul.f32 %v1624_v44, %v3382_v45 }
 0x787   :  { %v3393_v59 = vmin.f32 %v1661_v62, 16.0  ;;  %v1637_v41 = vadd.f32 0.014752088, %v1636_v61 }
 0x788   :  { %v1607_v17 = vpop.f32.mrf.mxu1 }
 0x789   :  { %v3395_v13 = vadd.f32 %v1607_v17, %v1565_v32  ;;  %v1663_v7 = vmul.f32 2.1237322e-06, %v3393_v59  ;;  %v1674_v8 = vmul.f32 3.8918573e-05, %v3393_v59  ;;  %v1638_v31 = vmul.f32 %v1637_v41, %v3382_v45 }
 0x78b   :  { %v1664_v37 = vadd.f32 0.00028619796, %v1663_v7  ;;  %v1675_v27 = vadd.f32 0.001143296, %v1674_v8  ;;  %v3400_v57 = vmul.f32 0.70710677, %v3395_v13 }
 0x78c   :  { %v1639_v11 = vadd.f32 0.112945676, %v1638_v31  ;;  %v1626_v31 = vadd.f32 0.0036580483, %v1625_v38 }
 0x78d   :  { %v1665_v12 = vmul.f32 %v1664_v37, %v3393_v59  ;;  %v1676_v60 = vmul.f32 %v1675_v27, %v3393_v59  ;;  %v1701_v4 = vmul.f32 %v3400_v57, %v3400_v57 }
 0x78e   :  { %v1640_v19 = vmul.f32 %v1639_v11, %v3382_v45 }
 0x78f   :  { %v1677_v6 = vadd.f32 0.014752088, %v1676_v60  ;;  %v3407_v58 = vmin.f32 %v1701_v4, 16.0  ;;  %v1666_v52 = vadd.f32 0.0036580483, %v1665_v12 }
 0x790   :  { %v1610_v23 = vpop.f32.mrf.mxu1  ;;  %v1641_v39 = vadd.f32 0.4994258, %v1640_v19 }
 0x791   :  { %v3409_v2 = vadd.f32 %v1610_v23, %v1570_v9  ;;  %v1678_v30 = vmul.f32 %v1677_v6, %v3393_v59  ;;  %v1703_v35 = vmul.f32 2.1237322e-06, %v3407_v58  ;;  %v1714_v63 = vmul.f32 3.8918573e-05, %v3407_v58 }
 0x792   :  { %v1667_v54 = vmul.f32 %v1666_v52, %v3393_v59  ;;  %v1642_v9 = vmul.f32 %v1641_v39, %v3382_v45 }
 0x793   :  { %v3415_v46 = vmul.f32 0.70710677, %v3409_v2  ;;  %v1679_v18 = vadd.f32 0.112945676, %v1678_v30  ;;  %v1704_v10 = vadd.f32 0.00028619796, %v1703_v35 }
 0x794   :  { %v1715_v0 = vadd.f32 0.001143296, %v1714_v63  ;;  %v1668_v1 = vadd.f32 0.05243302, %v1667_v54  ;;  %v3438_v61 = vadd.f32 1.0, %v1642_v9 }
 0x795   :  { %v1680_v55 = vmul.f32 %v1679_v18, %v3393_v59  ;;  %v1741_v21 = vmul.f32 %v3415_v46, %v3415_v46  ;;  %v1705_v43 = vmul.f32 %v1704_v10, %v3407_v58  ;;  %v1627_v18 = vmul.f32 %v1626_v31, %v3382_v45 }
 0x796   :  { %v1716_v20 = vmul.f32 %v1715_v0, %v3407_v58  ;;  %v1669_v53 = vmul.f32 %v1668_v1, %v3393_v59  ;;  %vm1649_vm14 = vweird.f32 %v3438_v61 }
 0x797   :  { %v1681_v36 = vadd.f32 0.4994258, %v1680_v55  ;;  %v3424_v28 = vmin.f32 %v1741_v21, 16.0  ;;  %v1706_v16 = vadd.f32 0.0036580483, %v1705_v43 }
 0x798   :  { %v1717_v56 = vadd.f32 0.014752088, %v1716_v20  ;;  %v1670_v5 = vadd.f32 0.18741608, %v1669_v53  ;;  %v1628_v20 = vadd.f32 0.05243302, %v1627_v18 }
 0x799   :  { %v1682_v50 = vmul.f32 %v1681_v36, %v3393_v59  ;;  %v1743_v29 = vmul.f32 2.1237322e-06, %v3424_v28  ;;  %v1754_v42 = vmul.f32 3.8918573e-05, %v3424_v28  ;;  %v1707_v51 = vmul.f32 %v1706_v16, %v3407_v58 }
 0x79a   :  { %v1718_v49 = vmul.f32 %v1717_v56, %v3407_v58  ;;  %v1671_v37 = vmul.f32 %v1670_v5, %v3393_v59 }
 0x79b   :  { %v1683_v22 = vadd.f32 1.0, %v1682_v50  ;;  %v1744_v3 = vadd.f32 0.00028619796, %v1743_v29  ;;  %v1755_v14 = vadd.f32 0.001143296, %v1754_v42 }
 0x79c   :  { %v1719_v24 = vadd.f32 0.112945676, %v1718_v49  ;;  %v1708_v41 = vadd.f32 0.05243302, %v1707_v51  ;;  %v1672_v35 = vadd.f32 1.1283791, %v1671_v37 }
 0x79d   :  { %2450 = vrcp.f32 %v1683_v22  ;;  %v1745_v48 = vmul.f32 %v1744_v3, %v3424_v28  ;;  %v1756_v33 = vmul.f32 %v1755_v14, %v3424_v28  ;;  %v1695_v6 = vand.u32 2147483648, %v1683_v22 }
 0x79e   :  { %v1720_v25 = vmul.f32 %v1719_v24, %v3407_v58  ;;  %2452 = vrcp.f32 %v3438_v61  ;;  %v1709_v23 = vmul.f32 %v1708_v41, %v3407_v58  ;;  %v1693_v59 = vand.u32 2147483647, %v1683_v22 }
 0x79f   :  { %v1757_v62 = vadd.f32 0.014752088, %v1756_v33  ;;  %v1746_v7 = vadd.f32 0.0036580483, %v1745_v48  ;;  %vm1689_vm7 = vweird.f32 %v1683_v22  ;;  %v1696_v55 = vor.u32 1.1754944e-38, %v1695_v6 }
 0x7a0   :  { %v1721_v32 = vadd.f32 0.4994258, %v1720_v25  ;;  %v1710_v0 = vadd.f32 0.18741608, %v1709_v23  ;;  %v1673_v36 = vmul.f32 %v1672_v35, %v3388_v34  ;;  %vm1694_vm9 = vcmp.eq.f32.partialorder %v1693_v59, 8.507059e+37 }
 0x7a1   :  { %v1758_v8 = vmul.f32 %v1757_v62, %v3424_v28  ;;  %v1747_v11 = vmul.f32 %v1746_v7, %v3424_v28  ;;  %v1629_v34 = vmul.f32 %v1628_v20, %v3382_v45  ;;  %v1614_v3 = vmul.f32 0.5, %v3385_v26 }
 0x7a2   :  { %v1722_v12 = vmul.f32 %v1721_v32, %v3407_v58  ;;  %v1711_v42 = vmul.f32 %v1710_v0, %v3407_v58 }
 0x7a3   :  { %v2451_v17 = vpop.eup %2450  ;;  %v1759_v60 = vadd.f32 0.112945676, %v1758_v8  ;;  %v1748_v21 = vadd.f32 0.05243302, %v1747_v11  ;;  %v1630_v5 = vadd.f32 0.18741608, %v1629_v34 }
 0x7a4   :  { %v1685_v27 = vmul.f32 %v2451_v17, %v1683_v22  ;;  %v1723_v52 = vadd.f32 1.0, %v1722_v12  ;;  %vm1690_vm6 = vweird.f32 %v2451_v17  ;;  %v3448_v19 = vpop.eup %2452  ;;  %v1712_v9 = vadd.f32 1.1283791, %v1711_v42 }
 0x7a5   :  { %v1760_v30 = vmul.f32 %v1759_v60, %v3424_v28  ;;  %vm1691_vm8 = vmor %vm1689_vm7, %vm1690_vm6  ;;  %v1645_v39 = vmul.f32 %v3448_v19, %v3438_v61  ;;  %v1749_v22 = vmul.f32 %v1748_v21, %v3424_v28  ;;  %v1631_v8 = vmul.f32 %v1630_v5, %v3382_v45 }
 0x7a6   :  { %v1686_v4 = vsub.f32 1.0, %v1685_v27  ;;  %2454 = vrcp.f32 %v1723_v52  ;;  %v1735_v24 = vand.u32 2147483648, %v1723_v52  ;;  %v1733_v58 = vand.u32 2147483647, %v1723_v52 }
 0x7a7   :  { %v1761_v54 = vadd.f32 0.4994258, %v1760_v30  ;;  %v1646_v49 = vsub.f32 1.0, %v1645_v39  ;;  %v1750_v51 = vadd.f32 0.18741608, %v1749_v22  ;;  %vm1729_vm11 = vweird.f32 %v1723_v52 }
 0x7a8   :  { %v1687_v63 = vmul.f32 %v2451_v17, %v1686_v4  ;;  %v1736_v26 = vor.u32 1.1754944e-38, %v1735_v24  ;;  %vm1734_vm13 = vcmp.eq.f32.partialorder %v1733_v58, 8.507059e+37  ;;  %vm1650_vm15 = vweird.f32 %v3448_v19 }
 0x7a9   :  { %v1762_v1 = vmul.f32 %v1761_v54, %v3424_v28  ;;  %v1647_v25 = vmul.f32 %v3448_v19, %v1646_v49  ;;  %v1751_v32 = vmul.f32 %v1750_v51, %v3424_v28  ;;  %v1653_v60 = vand.u32 2147483647, %v3438_v61  ;;  %vm1651_vm2 = vmor %vm1649_vm14, %vm1650_vm15 }
 0x7aa   :  { %v1688_v10 = vadd.f32 %v2451_v17, %v1687_v63  ;;  %v1655_v28 = vand.u32 2147483648, %v3438_v61  ;;  %v1632_v45 = vadd.f32 1.1283791, %v1631_v8  ;;  %v1615_v11 = vmul.f32 0.5, %v3395_v13 }
 0x7ab   :  { %v1763_v56 = vadd.f32 1.0, %v1762_v1  ;;  %v1648_v27 = vadd.f32 %v3448_v19, %v1647_v25  ;;  %v1752_v4 = vadd.f32 1.1283791, %v1751_v32  ;;  %vm1654_vm5 = vcmp.eq.f32.partialorder %v1653_v60, 8.507059e+37  ;;  %v2372_v32 = vld [vmem:[%s3669_s2 + $0xe8] sm:$0xff] }
 0x7ac   :  { %v1692_v43 = vsel %vm1691_vm8, %v2451_v17, %v1688_v10  ;;  %v2455_v29 = vpop.eup %2454  ;;  %v1713_v17 = vmul.f32 %v1712_v9, %v3400_v57  ;;  %v1656_v59 = vor.u32 1.1754944e-38, %v1655_v28  ;;  %v1633_v21 = vmul.f32 %v1632_v45, %v3378_v47  ;;  %v2373_v28 = vld [vmem:[%s3669_s2 + $0xf0] sm:$0xff]  ;;  %v2374_v45 = vld [vmem:[%s3669_s2 + $0xf8] sm:$0xff] }
 0x7ad   :  { %v1697_v15 = vsel %vm1694_vm9, %v1696_v55, %v1692_v43  ;;  %v1725_v53 = vmul.f32 %v2455_v29, %v1723_v52  ;;  %2456 = vrcp.f32 %v1763_v56  ;;  %vm1730_vm10 = vweird.f32 %v2455_v29 }
 0x7ae   :  { %v1698_v50 = vmul.f32 %v1697_v15, %v1673_v36  ;;  %vm1731_vm12 = vmor %vm1729_vm11, %vm1730_vm10  ;;  %v1775_v57 = vand.u32 2147483648, %v1763_v56  ;;  %v1773_v52 = vand.u32 2147483647, %v1763_v56  ;;  %v1652_v30 = vsel %vm1651_vm2, %v3448_v19, %v1648_v27 }
 0x7af   :  { %v1726_v44 = vsub.f32 1.0, %v1725_v53  ;;  %vm1769_vm4 = vweird.f32 %v1763_v56  ;;  %v1753_v54 = vmul.f32 %v1752_v4, %v3415_v46  ;;  %v1657_v0 = vsel %vm1654_vm5, %v1656_v59, %v1652_v30 }
 0x7b0   :  { %v2352_v16 = vclamps-f32 %v1698_v50, 1.0  ;;  %v1776_v18 = vor.u32 1.1754944e-38, %v1775_v57  ;;  %vm1774_vm7 = vcmp.eq.f32.partialorder %v1773_v52, 8.507059e+37  ;;  %v1658_v19 = vmul.f32 %v1657_v0, %v1633_v21  ;;  %v2371_v52 = vld [vmem:[%s3669_s2 + $0xe0] sm:$0xff] }
 0x7b1   :  { %v1727_v33 = vmul.f32 %v2455_v29, %v1726_v44  ;;  %v1616_v43 = vmul.f32 0.5, %v3409_v2  ;;  %v1613_v39 = vmul.f32 0.5, %v3375_v40 }
 0x7b2   :  { %v1782_v14 = vadd.f32 1.0, %v2352_v16  ;;  %v2351_v20 = vclamps-f32 %v1658_v19, 1.0 }
 0x7b3   :  { %v1728_v38 = vadd.f32 %v2455_v29, %v1727_v33  ;;  %v2457_v62 = vpop.eup %2456 }
 0x7b4   :  { %v3458_v48 = vmul.f32 %v1782_v14, %v1614_v3  ;;  %v1765_v7 = vmul.f32 %v2457_v62, %v1763_v56  ;;  %vm1770_vm1 = vweird.f32 %v2457_v62  ;;  %v1781_v46 = vadd.f32 1.0, %v2351_v20 }
 0x7b5   :  { %v1732_v41 = vsel %vm1731_vm12, %v2455_v29, %v1728_v38  ;;  %vm1771_vm6 = vmor %vm1769_vm4, %vm1770_vm1 }
 0x7b6   :  { %1796 = vperm.xlu2 %2393, %v3458_v48   ;;  %v1737_v37 = vsel %vm1734_vm13, %v1736_v26, %v1732_v41  ;;  %v1766_v12 = vsub.f32 1.0, %v1765_v7  ;;  %v3484_v50 = vmul.f32 %v1781_v46, %v1613_v39  ;;  %v2361_v26 = vld [vmem:[%s3669_s2 + $0xd0] sm:$0xff] }
 0x7b7   :  { %v1738_v31 = vmul.f32 %v1737_v37, %v1713_v17  ;;  %v2375_v17 = vld [vmem:[%s3669_s2 + $0x100] sm:$0xff] }
 0x7b8   :  { %v1767_v23 = vmul.f32 %v2457_v62, %v1766_v12  ;;  %v2359_v37 = vld [vmem:[%s3669_s2 + $0xc0] sm:$0xff] }
 0x7b9   :  { %v2353_v6 = vclamps-f32 %v1738_v31, 1.0  ;;  %v2362_v31 = vld [vmem:[%s3669_s2 + $0xd8] sm:$0xff] }
 0x7ba   :  { %v1768_v63 = vadd.f32 %v2457_v62, %v1767_v23  ;;  %v2360_v23 = vld [vmem:[%s3669_s2 + $0xc8] sm:$0xff] }
 0x7bb   :  { %v1783_v35 = vadd.f32 1.0, %v2353_v6 }
 0x7bc   :  { %v1772_v55 = vsel %vm1771_vm6, %v2457_v62, %v1768_v63 }
 0x7bd   :  { %v3474_v10 = vmul.f32 %v1783_v35, %v1615_v11  ;;  %v1777_v61 = vsel %vm1774_vm7, %v1776_v18, %v1772_v55 }
 0x7be   :  { %v1778_v13 = vmul.f32 %v1777_v61, %v1753_v54 }
 0x7bf   :  { %1801 = vperm.xlu1 %2392, %v3474_v10  }
 0x7c0   :  { %v2354_v36 = vclamps-f32 %v1778_v13, 1.0 }
 0x7c2   :  { %v1784_v1 = vadd.f32 1.0, %v2354_v36 }
 0x7c4   :  { %v3480_v15 = vmul.f32 %v1784_v1, %v1616_v43 }
 0x7c6   :  { %1806 = vperm.xlu0 %2391, %v3480_v15  }
 0x7ce   :  { %1791 = vperm.xlu0 %2391, %v3484_v50  }
 0x810   :  { %v1797_v47 = vpop.permute.xlu2 %1796 }
 0x811   :  { %v1810_v56 = vsub.f32 %v3458_v48, %v1797_v47 }
 0x813   :  { %v1816_v29 = vsel %vm536_vm3, %v1810_v56, 0.0  ;;  %v1830_v58 = vmul.f32 %v1810_v56, %v1810_v56 }
 0x814   :  { %1817 = vadd.xlane.f32.xlu0 %v1816_v29 }
 0x815   :  { %v1836_v5 = vsel %vm536_vm3, %v1830_v58, 0.0 }
 0x831   :  { %v1802_v2 = vpop.permute.xlu1 %1801 }
 0x832   :  { %v1811_v42 = vsub.f32 %v3474_v10, %v1802_v2 }
 0x834   :  { %v1819_v22 = vsel %vm536_vm3, %v1811_v42, 0.0  ;;  %v1831_v16 = vmul.f32 %v1811_v42, %v1811_v42 }
 0x835   :  { %1820 = vadd.xlane.f32.xlu2 %v1819_v22 }
 0x836   :  { %v1839_v53 = vsel %vm536_vm3, %v1831_v16, 0.0 }
 0x837   :  { %1840 = vadd.xlane.f32.xlu0 %v1839_v53 }
 0x838   :  { %v1807_v40 = vpop.permute.xlu0 %1806 }
 0x839   :  { %v1812_v44 = vsub.f32 %v3480_v15, %v1807_v40 }
 0x83b   :  { %v1832_v24 = vmul.f32 %v1812_v44, %v1812_v44  ;;  %v1822_v51 = vsel %vm536_vm3, %v1812_v44, 0.0 }
 0x83d   :  { %v1842_v33 = vsel %vm536_vm3, %v1832_v24, 0.0 }
 0x840   :  { %v1792_v34 = vpop.permute.xlu0 %1791 }
 0x841   :  { %v1809_v49 = vsub.f32 %v3484_v50, %v1792_v34 }
 0x843   :  { %v1813_v3 = vsel %vm536_vm3, %v1809_v49, 0.0  ;;  %v1829_v14 = vmul.f32 %v1809_v49, %v1809_v49 }
 0x844   :  { %1814 = vadd.xlane.f32.xlu1 %v1813_v3 }
 0x845   :  { %v1833_v9 = vsel %vm536_vm3, %v1829_v14, 0.0 }
 0x846   :  { %1834 = vadd.xlane.f32.xlu2 %v1833_v9 }
 0x84c   :  { %1823 = vadd.xlane.f32.xlu1 %v1822_v51 }
 0x84e   :  { %1843 = vadd.xlane.f32.xlu2 %v1842_v33 }
 0x854   :  { %1837 = vadd.xlane.f32.xlu1 %v1836_v5 }
 0x887   :  { %v1818_v25 = vpop.xlane.xlu0 %1817 }
 0x888   :  { %v1826_v38 = vmul.f32 0.0625, %v1818_v25 }
 0x88a   :  { %v1850_v62 = vadd.f32 %v1826_v38, %v3458_v48  ;;  %v1854_v21 = vmul.f32 %v1826_v38, %v1826_v38 }
 0x88c   :  { %1868 = vperm.xlu2 %2393, %v1850_v62  }
 0x894   :  { %1955 = vperm.xlu2 %2393, %v2361_v26  }
 0x89c   :  { %2194 = vperm.xlu2 %2393, %v2372_v32  }
 0x8a4   :  { %2226 = vperm.xlu2 %2393, %v2375_v17  }
 0x8a8   :  { %v1821_v41 = vpop.xlane.xlu2 %1820 }
 0x8a9   :  { %v1827_v7 = vmul.f32 0.0625, %v1821_v41 }
 0x8aa   :  { %v1841_v35 = vpop.xlane.xlu0 %1840 }
 0x8ab   :  { %v1851_v8 = vadd.f32 %v1827_v7, %v3474_v10  ;;  %v1855_v54 = vmul.f32 %v1827_v7, %v1827_v7  ;;  %v1847_v55 = vmul.f32 0.0625, %v1841_v35 }
 0x8ad   :  { %1873 = vperm.xlu1 %2392, %v1851_v8   ;;  %v1859_v13 = vsub.f32 %v1847_v55, %v1855_v54 }
 0x8af   :  { %v1887_v20 = vadd.f32 1e-05, %v1859_v13 }
 0x8b1   :  { %vm1915_vm12 = vweird.f32 %v1887_v20 }
 0x8b5   :  { %1945 = vperm.xlu1 %2392, %v2359_v37  }
 0x8b7   :  { %v1815_v27 = vpop.xlane.xlu1 %1814 }
 0x8b8   :  { %v1825_v57 = vmul.f32 0.0625, %v1815_v27 }
 0x8b9   :  { %v1835_v11 = vpop.xlane.xlu2 %1834 }
 0x8ba   :  { %v1849_v6 = vadd.f32 %v1825_v57, %v3484_v50  ;;  %v1853_v19 = vmul.f32 %v1825_v57, %v1825_v57  ;;  %v1845_v36 = vmul.f32 0.0625, %v1835_v11 }
 0x8bc   :  { %v1857_v46 = vsub.f32 %v1845_v36, %v1853_v19 }
 0x8bd   :  { %1960 = vperm.xlu1 %2392, %v2362_v31  }
 0x8be   :  { %v1885_v47 = vadd.f32 1e-05, %v1857_v46 }
 0x8bf   :  { %v1824_v12 = vpop.xlane.xlu1 %1823 }
 0x8c0   :  { %v1828_v60 = vmul.f32 0.0625, %v1824_v12  ;;  %vm1895_vm4 = vweird.f32 %v1885_v47 }
 0x8c1   :  { %v1844_v30 = vpop.xlane.xlu2 %1843 }
 0x8c2   :  { %v1852_v4 = vadd.f32 %v1828_v60, %v3480_v15  ;;  %v1856_v63 = vmul.f32 %v1828_v60, %v1828_v60  ;;  %v1848_v59 = vmul.f32 0.0625, %v1844_v30 }
 0x8c4   :  { %1878 = vperm.xlu0 %2391, %v1852_v4   ;;  %v1860_v0 = vsub.f32 %v1848_v59, %v1856_v63 }
 0x8c5   :  { %2199 = vperm.xlu1 %2392, %v2373_v28  }
 0x8c6   :  { %v1888_v43 = vadd.f32 1e-05, %v1860_v0 }
 0x8c7   :  { %v1838_v18 = vpop.xlane.xlu1 %1837 }
 0x8c8   :  { %v1846_v61 = vmul.f32 0.0625, %v1838_v18  ;;  %2458 = vrsqrt.f32 %v1888_v43  ;;  %vm1925_vm9 = vweird.f32 %v1888_v43 }
 0x8c9   :  { %2460 = vrsqrt.f32 %v1887_v20 }
 0x8ca   :  { %v1858_v1 = vsub.f32 %v1846_v61, %v1854_v21 }
 0x8cc   :  { %1863 = vperm.xlu0 %2391, %v1849_v6   ;;  %v1886_v39 = vadd.f32 1e-05, %v1858_v1 }
 0x8ce   :  { %2462 = vrsqrt.f32 %v1886_v39  ;;  %v2459_v56 = vpop.eup %2458  ;;  %vm1905_vm15 = vweird.f32 %v1886_v39 }
 0x8cf   :  { %v2461_v29 = vpop.eup %2460  ;;  %2464 = vrsqrt.f32 %v1885_v47  ;;  %v1920_v2 = vmul.f32 %v2459_v56, %v1888_v43  ;;  %vm1926_vm8 = vweird.f32 %v2459_v56 }
 0x8d0   :  { %v1910_v22 = vmul.f32 %v2461_v29, %v1887_v20  ;;  %vm1916_vm10 = vweird.f32 %v2461_v29  ;;  %vm1927_vm11 = vmor %vm1925_vm9, %vm1926_vm8 }
 0x8d1   :  { %v1921_v16 = vmul.f32 %v2459_v56, %v1920_v2  ;;  %vm1917_vm14 = vmor %vm1915_vm12, %vm1916_vm10 }
 0x8d2   :  { %v1911_v34 = vmul.f32 %v2461_v29, %v1910_v22 }
 0x8d3   :  { %v1922_v14 = vmul.f32 0.5, %v1921_v16 }
 0x8d4   :  { %1950 = vperm.xlu0 %2391, %v2360_v23   ;;  %v2463_v42 = vpop.eup %2462  ;;  %v1912_v44 = vmul.f32 0.5, %v1911_v34  ;;  %v2355_v23 = vld [vmem:[%s3668_s1 + $0xc0] sm:$0xff] }
 0x8d5   :  { %v1900_v53 = vmul.f32 %v2463_v42, %v1886_v39  ;;  %v2465_v40 = vpop.eup %2464  ;;  %v1923_v24 = vsub.f32 1.5, %v1922_v14  ;;  %vm1906_vm13 = vweird.f32 %v2463_v42 }
 0x8d6   :  { %v1890_v49 = vmul.f32 %v2465_v40, %v1885_v47  ;;  %v1913_v33 = vsub.f32 1.5, %v1912_v44  ;;  %vm1907_vm1 = vmor %vm1905_vm15, %vm1906_vm13  ;;  %vm1896_vm2 = vweird.f32 %v2465_v40 }
 0x8d7   :  { %v1901_v3 = vmul.f32 %v2463_v42, %v1900_v53  ;;  %v1924_v5 = vmul.f32 %v2459_v56, %v1923_v24  ;;  %vm1897_vm5 = vmor %vm1895_vm4, %vm1896_vm2 }
 0x8d8   :  { %v1891_v9 = vmul.f32 %v2465_v40, %v1890_v49  ;;  %v1914_v32 = vmul.f32 %v2461_v29, %v1913_v33 }
 0x8d9   :  { %v1902_v51 = vmul.f32 0.5, %v1901_v3  ;;  %v1928_v7 = vsel %vm1927_vm11, %v2459_v56, %v1924_v5 }
 0x8da   :  { %v1892_v38 = vmul.f32 0.5, %v1891_v9  ;;  %v1918_v12 = vsel %vm1917_vm14, %v2461_v29, %v1914_v32 }
 0x8db   :  { %v1903_v25 = vsub.f32 1.5, %v1902_v51 }
 0x8dc   :  { %2189 = vperm.xlu0 %2391, %v2371_v52   ;;  %v1893_v37 = vsub.f32 1.5, %v1892_v38  ;;  %v2356_v52 = vld [vmem:[%s3668_s1 + $0xc8] sm:$0xff] }
 0x8dd   :  { %v1904_v8 = vmul.f32 %v2463_v42, %v1903_v25 }
 0x8de   :  { %v1894_v4 = vmul.f32 %v2465_v40, %v1893_v37 }
 0x8df   :  { %v1908_v28 = vsel %vm1907_vm1, %v2463_v42, %v1904_v8 }
 0x8e0   :  { %v1898_v6 = vsel %vm1897_vm5, %v2465_v40, %v1894_v4 }
 0x8e4   :  { %2204 = vperm.xlu0 %2391, %v2374_v45   ;;  %v2358_v45 = vld [vmem:[%s3668_s1 + $0xd8] sm:$0xff] }
 0x8e6   :  { %v1869_v62 = vpop.permute.xlu2 %1868 }
 0x8e7   :  { %v1882_v27 = vsub.f32 %v3458_v48, %v1869_v62 }
 0x8ee   :  { %v1956_v20 = vpop.permute.xlu2 %1955 }
 0x91f   :  { %v1874_v58 = vpop.permute.xlu1 %1873 }
 0x920   :  { %v1883_v17 = vsub.f32 %v3474_v10, %v1874_v58  ;;  %v1930_v10 = vmul.f32 %v1908_v28, %v1882_v27 }
 0x922   :  { %v1931_v60 = vmul.f32 %v1918_v12, %v1883_v17 }
 0x927   :  { %v1946_v11 = vpop.permute.xlu1 %1945 }
 0x92f   :  { %v1961_v9 = vpop.permute.xlu1 %1960 }
 0x936   :  { %v1879_v26 = vpop.permute.xlu0 %1878 }
 0x937   :  { %v1884_v41 = vsub.f32 %v3480_v15, %v1879_v26 }
 0x939   :  { %v1932_v31 = vmul.f32 %v1928_v7, %v1884_v41 }
 0x93b   :  { %1987 = vmatpush.msrb.mxu2 %v1932_v31 }
 0x93d   :  { %1988 = vmatpush.msrb.mxu2 %v1931_v60 }
 0x93e   :  { %v1864_v15 = vpop.permute.xlu0 %1863 }
 0x93f   :  { %v1881_v57 = vsub.f32 %v3484_v50, %v1864_v15  ;;  %1989 = vmatpush.msrb.mxu2 %v1930_v10  ;;  %v2357_v50 = vld [vmem:[%s3668_s1 + $0xd0] sm:$0xff]  ;;  %s2505_s1 = smov [#allocation2]  }
 0x940   :  { %s2256_s28 = sshll.u32 %s2505_s1, 4  ;;  %s2257_s28 = int_to_ptr.vmem [resolvable:$true] %s2256_s28 }
 0x941   :  { %v1929_v48 = vmul.f32 %v1898_v6, %v1881_v57 }
 0x943   :  { %1990 = vmatpush.msrb.mxu2 %v1929_v48 }
 0x944   :  { %2363 = vmatmul.msk.f32.vlgmr.msrb.gmra.mxu2 %vm47_vm0, %v2355_v23 }
 0x946   :  { %v1951_v54 = vpop.permute.xlu0 %1950 }
 0x94c   :  { %2364 = vmatmul.msk.f32.gmra.mxu2 %vm47_vm0, %v2356_v52 }
 0x954   :  { %2365 = vmatmul.msk.f32.gmra.mxu2 %vm47_vm0, %v2357_v50 }
 0x95c   :  { %2366 = vmatmul.msk.f32.gmra.mxu2 %vm47_vm0, %v2358_v45 }
 0x9c7   :  { %v1992_v30 = vpop.f32.mrf.mxu2 }
 0x9c8   :  { %v3550_v35 = vadd.f32 %v1992_v30, %v1946_v11 }
 0x9ca   :  { %v3553_v63 = vmul.f32 0.70710677, %v3550_v35 }
 0x9cc   :  { %v2012_v59 = vmul.f32 %v3553_v63, %v3553_v63 }
 0x9ce   :  { %v3557_v18 = vmin.f32 %v2012_v59, 16.0 }
 0x9cf   :  { %v1995_v55 = vpop.f32.mrf.mxu2 }
 0x9d0   :  { %v2025_v0 = vmul.f32 3.8918573e-05, %v3557_v18  ;;  %v3560_v61 = vadd.f32 %v1995_v55, %v1951_v54  ;;  %v2014_v36 = vmul.f32 2.1237322e-06, %v3557_v18 }
 0x9d2   :  { %v2026_v21 = vadd.f32 0.001143296, %v2025_v0  ;;  %v3563_v13 = vmul.f32 0.70710677, %v3560_v61  ;;  %v2015_v29 = vadd.f32 0.00028619796, %v2014_v36 }
 0x9d4   :  { %v2027_v19 = vmul.f32 %v2026_v21, %v3557_v18  ;;  %v2052_v43 = vmul.f32 %v3563_v13, %v3563_v13  ;;  %v2016_v49 = vmul.f32 %v2015_v29, %v3557_v18 }
 0x9d6   :  { %v2028_v1 = vadd.f32 0.014752088, %v2027_v19  ;;  %v3569_v46 = vmin.f32 %v2052_v43, 16.0  ;;  %v2017_v38 = vadd.f32 0.0036580483, %v2016_v49 }
 0x9d7   :  { %v1998_v39 = vpop.f32.mrf.mxu2 }
 0x9d8   :  { %v2029_v47 = vmul.f32 %v2028_v1, %v3557_v18  ;;  %v3572_v56 = vadd.f32 %v1998_v39, %v1956_v20  ;;  %v2054_v2 = vmul.f32 2.1237322e-06, %v3569_v46  ;;  %v2065_v42 = vmul.f32 3.8918573e-05, %v3569_v46 }
 0x9d9   :  { %v2018_v27 = vmul.f32 %v2017_v38, %v3557_v18 }
 0x9da   :  { %v2030_v22 = vadd.f32 0.112945676, %v2029_v47  ;;  %v2055_v16 = vadd.f32 0.00028619796, %v2054_v2  ;;  %v2066_v53 = vadd.f32 0.001143296, %v2065_v42 }
 0x9db   :  { %v3577_v40 = vmul.f32 0.70710677, %v3572_v56  ;;  %v2019_v6 = vadd.f32 0.05243302, %v2018_v27 }
 0x9dc   :  { %v2031_v34 = vmul.f32 %v2030_v22, %v3557_v18  ;;  %v2067_v3 = vmul.f32 %v2066_v53, %v3569_v46  ;;  %v2056_v24 = vmul.f32 %v2055_v16, %v3569_v46 }
 0x9dd   :  { %v2092_v14 = vmul.f32 %v3577_v40, %v3577_v40  ;;  %v2020_v19 = vmul.f32 %v2019_v6, %v3557_v18 }
 0x9de   :  { %v2032_v44 = vadd.f32 0.4994258, %v2031_v34  ;;  %v2068_v51 = vadd.f32 0.014752088, %v2067_v3  ;;  %v2057_v7 = vadd.f32 0.0036580483, %v2056_v24 }
 0x9df   :  { %v3585_v33 = vmin.f32 %v2092_v14, 16.0  ;;  %v2001_v58 = vpop.f32.mrf.mxu2  ;;  %v2021_v42 = vadd.f32 0.18741608, %v2020_v19 }
 0x9e0   :  { %v2033_v5 = vmul.f32 %v2032_v44, %v3557_v18  ;;  %v3588_v25 = vadd.f32 %v2001_v58, %v1961_v9  ;;  %v2069_v62 = vmul.f32 %v2068_v51, %v3569_v46  ;;  %v2058_v28 = vmul.f32 %v2057_v7, %v3569_v46 }
 0x9e1   :  { %v2094_v26 = vmul.f32 2.1237322e-06, %v3585_v33  ;;  %v2105_v17 = vmul.f32 3.8918573e-05, %v3585_v33  ;;  %v2022_v51 = vmul.f32 %v2021_v42, %v3557_v18 }
 0x9e2   :  { %v3592_v32 = vadd.f32 1.0, %v2033_v5  ;;  %v3596_v41 = vmul.f32 0.70710677, %v3588_v25  ;;  %v2070_v8 = vadd.f32 0.112945676, %v2069_v62 }
 0x9e3   :  { %v2095_v37 = vadd.f32 0.00028619796, %v2094_v26  ;;  %v2106_v12 = vadd.f32 0.001143296, %v2105_v17  ;;  %v2059_v11 = vadd.f32 0.05243302, %v2058_v28 }
 0x9e4   :  { %2466 = vrcp.f32 %v3592_v32  ;;  %v2071_v31 = vmul.f32 %v2070_v8, %v3569_v46  ;;  %v2132_v60 = vmul.f32 %v3596_v41, %v3596_v41  ;;  %v2046_v5 = vand.u32 2147483648, %v3592_v32 }
 0x9e5   :  { %v2096_v10 = vmul.f32 %v2095_v37, %v3585_v33  ;;  %v2107_v15 = vmul.f32 %v2106_v12, %v3585_v33  ;;  %v2060_v20 = vmul.f32 %v2059_v11, %v3569_v46  ;;  %vm2040_vm8 = vweird.f32 %v3592_v32 }
 0x9e6   :  { %v2072_v4 = vadd.f32 0.4994258, %v2071_v31  ;;  %v3606_v57 = vmin.f32 %v2132_v60, 16.0  ;;  %v2044_v60 = vand.u32 2147483647, %v3592_v32 }
 0x9e7   :  { %v2108_v52 = vadd.f32 0.014752088, %v2107_v15  ;;  %v2097_v59 = vadd.f32 0.0036580483, %v2096_v10  ;;  %v2061_v49 = vadd.f32 0.18741608, %v2060_v20 }
 0x9e8   :  { %v2073_v48 = vmul.f32 %v2072_v4, %v3569_v46  ;;  %v2134_v50 = vmul.f32 2.1237322e-06, %v3606_v57  ;;  %v2145_v45 = vmul.f32 3.8918573e-05, %v3606_v57  ;;  %vm2045_vm12 = vcmp.eq.f32.partialorder %v2044_v60, 8.507059e+37  ;;  %v2195_v60 = vpop.permute.xlu2 %2194 }
 0x9e9   :  { %v2109_v54 = vmul.f32 %v2108_v52, %v3585_v33  ;;  %v2098_v39 = vmul.f32 %v2097_v59, %v3585_v33  ;;  %v2062_v17 = vmul.f32 %v2061_v49, %v3569_v46  ;;  %v2023_v52 = vadd.f32 1.1283791, %v2022_v51 }
 0x9ea   :  { %v3609_v23 = vpop.eup %2466  ;;  %v2074_v30 = vadd.f32 1.0, %v2073_v48  ;;  %v2135_v55 = vadd.f32 0.00028619796, %v2134_v50  ;;  %v2146_v0 = vadd.f32 0.001143296, %v2145_v45  ;;  %v2047_v45 = vor.u32 1.1754944e-38, %v2046_v5 }
 0x9eb   :  { %v2036_v21 = vmul.f32 %v3609_v23, %v3592_v32  ;;  %v2110_v36 = vadd.f32 0.112945676, %v2109_v54  ;;  %v2099_v14 = vadd.f32 0.05243302, %v2098_v39  ;;  %vm2041_vm6 = vweird.f32 %v3609_v23 }
 0x9ec   :  { %2468 = vrcp.f32 %v2074_v30  ;;  %v2136_v43 = vmul.f32 %v2135_v55, %v3606_v57  ;;  %v2147_v1 = vmul.f32 %v2146_v0, %v3606_v57  ;;  %v2086_v27 = vand.u32 2147483648, %v2074_v30  ;;  %vm3639_vm10 = vmor %vm2040_vm8, %vm2041_vm6 }
 0x9ed   :  { %v2111_v47 = vmul.f32 %v2110_v36, %v3585_v33  ;;  %v2037_v29 = vsub.f32 1.0, %v2036_v21  ;;  %v2100_v8 = vmul.f32 %v2099_v14, %v3585_v33  ;;  %vm2080_vm7 = vweird.f32 %v2074_v30 }
 0x9ee   :  { %v2148_v2 = vadd.f32 0.014752088, %v2147_v1  ;;  %v2137_v53 = vadd.f32 0.0036580483, %v2136_v43  ;;  %v2084_v31 = vand.u32 2147483647, %v2074_v30  ;;  %v2024_v36 = vmul.f32 %v2023_v52, %v3553_v63 }
 0x9ef   :  { %v2112_v22 = vadd.f32 0.4994258, %v2111_v47  ;;  %v2038_v44 = vmul.f32 %v3609_v23, %v2037_v29  ;;  %v2063_v10 = vadd.f32 1.1283791, %v2062_v17  ;;  %v2101_v6 = vadd.f32 0.18741608, %v2100_v8 }
 0x9f0   :  { %v2149_v34 = vmul.f32 %v2148_v2, %v3606_v57  ;;  %v2138_v62 = vmul.f32 %v2137_v53, %v3606_v57  ;;  %v2087_v50 = vor.u32 1.1754944e-38, %v2086_v27  ;;  %vm2085_vm11 = vcmp.eq.f32.partialorder %v2084_v31, 8.507059e+37 }
 0x9f1   :  { %v2113_v9 = vmul.f32 %v2112_v22, %v3585_v33  ;;  %v2039_v37 = vadd.f32 %v3609_v23, %v2038_v44  ;;  %v2064_v0 = vmul.f32 %v2063_v10, %v3563_v13  ;;  %v2102_v21 = vmul.f32 %v2101_v6, %v3585_v33 }
 0x9f2   :  { %v2469_v16 = vpop.eup %2468  ;;  %v2150_v24 = vadd.f32 0.112945676, %v2149_v34  ;;  %v2139_v28 = vadd.f32 0.05243302, %v2138_v62  ;;  %v2005_v51 = vmul.f32 0.5, %v3560_v61  ;;  %vm2249_vm8 = vcmask 122880  }
 0x9f3   :  { %v2076_v3 = vmul.f32 %v2469_v16, %v2074_v30  ;;  %v2114_v38 = vadd.f32 1.0, %v2113_v9  ;;  %vm2081_vm0 = vweird.f32 %v2469_v16  ;;  %v2043_v32 = vsel %vm3639_vm10, %v3609_v23, %v2039_v37  ;;  %v2190_v37 = vpop.permute.xlu0 %2189 }
 0x9f4   :  { %v2151_v26 = vmul.f32 %v2150_v24, %v3606_v57  ;;  %vm3635_vm9 = vmor %vm2080_vm7, %vm2081_vm0  ;;  %v2140_v54 = vmul.f32 %v2139_v28, %v3606_v57  ;;  %v2048_v55 = vsel %vm2045_vm12, %v2047_v45, %v2043_v32  ;;  %v2103_v47 = vadd.f32 1.1283791, %v2102_v21 }
 0x9f5   :  { %v2077_v58 = vsub.f32 1.0, %v2076_v3  ;;  %2470 = vrcp.f32 %v2114_v38  ;;  %v2049_v1 = vmul.f32 %v2048_v55, %v2024_v36  ;;  %v2126_v20 = vand.u32 2147483648, %v2114_v38 }
 0x9f6   :  { %v2152_v12 = vadd.f32 0.4994258, %v2151_v26  ;;  %v2141_v39 = vadd.f32 0.18741608, %v2140_v54  ;;  %v2124_v2 = vand.u32 2147483647, %v2114_v38  ;;  %vm2120_vm14 = vweird.f32 %v2114_v38 }
 0x9f7   :  { %v2078_v7 = vmul.f32 %v2469_v16, %v2077_v58  ;;  %v2367_v13 = vclamps-f32 %v2049_v1, 1.0  ;;  %v2127_v33 = vor.u32 1.1754944e-38, %v2126_v20  ;;  %v2104_v63 = vmul.f32 %v2103_v47, %v3577_v40 }
 0x9f8   :  { %v2153_v48 = vmul.f32 %v2152_v12, %v3606_v57  ;;  %v2142_v53 = vmul.f32 %v2141_v39, %v3606_v57  ;;  %vm2125_vm1 = vcmp.eq.f32.partialorder %v2124_v2, 8.507059e+37  ;;  %v2004_v57 = vmul.f32 0.5, %v3550_v35  ;;  %v2200_v35 = vpop.permute.xlu1 %2199 }
 0x9f9   :  { %v2079_v18 = vadd.f32 %v2469_v16, %v2078_v7  ;;  %v2172_v24 = vadd.f32 1.0, %v2367_v13  ;;  %v2006_v40 = vmul.f32 0.5, %v3572_v56 }
 0x9fa   :  { %v2154_v11 = vadd.f32 1.0, %v2153_v48  ;;  %v2143_v58 = vadd.f32 1.1283791, %v2142_v53  ;;  %v2007_v48 = vmul.f32 0.5, %v3588_v25  ;;  %v2227_v25 = vpop.permute.xlu2 %2226 }
 0x9fb   :  { %v2083_v15 = vsel %vm3635_vm9, %v2469_v16, %v2079_v18  ;;  %v2471_v30 = vpop.eup %2470  ;;  %v2176_v27 = vmul.f32 %v2172_v24, %v2004_v57  ;;  %v2205_v45 = vpop.permute.xlu0 %2204 }
 0x9fc   :  { %v2088_v59 = vsel %vm2085_vm11, %v2087_v50, %v2083_v15  ;;  %v2116_v19 = vmul.f32 %v2471_v30, %v2114_v38  ;;  %2472 = vrcp.f32 %v2154_v11  ;;  %vm2121_vm13 = vweird.f32 %v2471_v30 }
 0x9fd   :  { %v2089_v43 = vmul.f32 %v2088_v59, %v2064_v0  ;;  %vm2122_vm15 = vmor %vm2120_vm14, %vm2121_vm13  ;;  %v2166_v5 = vand.u32 2147483648, %v2154_v11  ;;  %v2164_v26 = vand.u32 2147483647, %v2154_v11  ;;  %vm2160_vm4 = vweird.f32 %v2154_v11 }
 0x9fe   :  { %v2117_v23 = vsub.f32 1.0, %v2116_v19  ;;  %v2144_v61 = vmul.f32 %v2143_v58, %v3596_v41  ;;  %v2207_v10 = vmul.f32 %v2190_v37, %v2176_v27 }
 0x9ff   :  { %v2368_v42 = vclamps-f32 %v2089_v43, 1.0  ;;  %v2167_v18 = vor.u32 1.1754944e-38, %v2166_v5  ;;  %vm2165_vm0 = vcmp.eq.f32.partialorder %v2164_v26, 8.507059e+37 }
 0xa00   :  { %v2118_v29 = vmul.f32 %v2471_v30, %v2117_v23  ;;  %v2211_v32 = vsel %vm536_vm3, %v2207_v10, 0.0 }
 0xa01   :  { %v2173_v14 = vadd.f32 1.0, %v2368_v42 }
 0xa02   :  { %v2119_v22 = vadd.f32 %v2471_v30, %v2118_v29  ;;  %v2473_v16 = vpop.eup %2472 }
 0xa03   :  { %v2156_v49 = vmul.f32 %v2473_v16, %v2154_v11  ;;  %vm2161_vm2 = vweird.f32 %v2473_v16  ;;  %v2177_v17 = vmul.f32 %v2173_v14, %v2005_v51 }
 0xa04   :  { %v2123_v34 = vsel %vm2122_vm15, %v2471_v30, %v2119_v22  ;;  %vm2162_vm5 = vmor %vm2160_vm4, %vm2161_vm2 }
 0xa05   :  { %v2128_v3 = vsel %vm2125_vm1, %v2127_v33, %v2123_v34  ;;  %v2157_v9 = vsub.f32 1.0, %v2156_v49  ;;  %v2208_v28 = vmul.f32 %v2195_v60, %v2177_v17 }
 0xa06   :  { %v2129_v44 = vmul.f32 %v2128_v3, %v2104_v63 }
 0xa07   :  { %v2158_v62 = vmul.f32 %v2473_v16, %v2157_v9  ;;  %v2212_v6 = vsel %vm536_vm3, %v2208_v28, 0.0 }
 0xa08   :  { %v2369_v38 = vclamps-f32 %v2129_v44, 1.0  ;;  %v2213_v11 = vadd.f32 %v2212_v6, %v2211_v32 }
 0xa09   :  { %v2159_v8 = vadd.f32 %v2473_v16, %v2158_v62 }
 0xa0a   :  { %v2174_v7 = vadd.f32 1.0, %v2369_v38 }
 0xa0b   :  { %v2163_v12 = vsel %vm2162_vm5, %v2473_v16, %v2159_v8 }
 0xa0c   :  { %v2178_v31 = vmul.f32 %v2174_v7, %v2006_v40  ;;  %v2168_v46 = vsel %vm2165_vm0, %v2167_v18, %v2163_v12 }
 0xa0d   :  { %v2169_v4 = vmul.f32 %v2168_v46, %v2144_v61 }
 0xa0e   :  { %v2209_v56 = vmul.f32 %v2200_v35, %v2178_v31 }
 0xa0f   :  { %v2370_v15 = vclamps-f32 %v2169_v4, 1.0 }
 0xa10   :  { %v2214_v50 = vsel %vm536_vm3, %v2209_v56, 0.0 }
 0xa11   :  { %v2175_v52 = vadd.f32 1.0, %v2370_v15  ;;  %v2215_v59 = vadd.f32 %v2214_v50, %v2213_v11 }
 0xa13   :  { %v2179_v41 = vmul.f32 %v2175_v52, %v2007_v48 }
 0xa15   :  { %v2210_v30 = vmul.f32 %v2205_v45, %v2179_v41 }
 0xa17   :  { %v2216_v54 = vsel %vm536_vm3, %v2210_v30, 0.0 }
 0xa18   :  { %v2217_v55 = vadd.f32 %v2216_v54, %v2215_v59 }
 0xa1a   :  { %v2218_v0 = vrot.slane %v2217_v55, 4 }
 0xa1c   :  { %v2219_v21 = vadd.f32 %v2218_v0, %v2217_v55 }
 0xa1e   :  { %v2220_v19 = vrot.slane %v2219_v21, 2 }
 0xa20   :  { %v2221_v36 = vadd.f32 %v2220_v19, %v2219_v21 }
 0xa22   :  { %v2222_v43 = vrot.slane %v2221_v36, 1 }
 0xa24   :  { %v2223_v23 = vadd.f32 %v2222_v43, %v2221_v36 }
 0xa26   :  { %v2229_v1 = vadd.f32 %v2227_v25, %v2223_v23 }
 0xa28   :  { %v2376_v20 = vmul.f32 -1.442695, %v2229_v1 }
 0xa2a   :  { %2474 = vpow2.f32 %v2376_v20 }
 0xa30   :  { %v2475_v39 = vpop.eup %2474 }
 0xa31   :  { %v2233_v47 = vadd.f32 1.0, %v2475_v39 }
 0xa33   :  { %2476 = vrcp.f32 %v2233_v47  ;;  %v2245_v22 = vand.u32 2147483648, %v2233_v47  ;;  %v2243_v13 = vand.u32 2147483647, %v2233_v47  ;;  %vm2239_vm6 = vweird.f32 %v2233_v47 }
 0xa35   :  { %v2246_v53 = vor.u32 1.1754944e-38, %v2245_v22  ;;  %vm2244_vm9 = vcmp.eq.f32.partialorder %v2243_v13, 8.507059e+37 }
 0xa39   :  { %v2477_v29 = vpop.eup %2476 }
 0xa3a   :  { %v2235_v2 = vmul.f32 %v2477_v29, %v2233_v47  ;;  %vm2240_vm3 = vweird.f32 %v2477_v29 }
 0xa3b   :  { %vm2241_vm7 = vmor %vm2239_vm6, %vm2240_vm3 }
 0xa3c   :  { %v2236_v42 = vsub.f32 1.0, %v2235_v2 }
 0xa3e   :  { %v2237_v16 = vmul.f32 %v2477_v29, %v2236_v42 }
 0xa40   :  { %v2238_v33 = vadd.f32 %v2477_v29, %v2237_v16 }
 0xa42   :  { %v2242_v63 = vsel %vm2241_vm7, %v2477_v29, %v2238_v33 }
 0xa43   :  { %v2247_v34 = vsel %vm2244_vm9, %v2246_v53, %v2242_v63 }
 0xa44   :  { %2250 = vst.msk [vmem:[#allocation2] sm:$0x1] %vm2249_vm8, %v2247_v34 }
 0xa45   :  { %2261 = dma.vmem_to_hbm [thread:$0]  %s2257_s28, 16, %s2259_s4, [#allocation3]  }
 0xa46   :  { %2502 = dma.done.wait [#allocation3], 16  }
 0xa47   :  { %2503 = vsyncadd [#allocation3], 4294967280 }
 0xa48   :  { %2266 = vsyncpa [#allocation3], 1 }

</bundles_post_ra>
